<compile_context>
chip_gen: v6e
topology: v6e:2x2x1
jax: 0.10.0
libtpu: 0.0.40
codegen_flags: <defaults>
</compile_context>

<pallas_src>
import functools

import jax
import jax.numpy as jnp
import numpy as np
from jax.experimental import pallas as pl
from jax.experimental.pallas import tpu as pltpu


# ----------------------------------------------------------------------------
# Kernels
# ----------------------------------------------------------------------------
def _sine_kernel_single_k(x_ref, w_ref, b_ref, o_ref, *, omega_0):
    """Grid (Mt, Nt); whole K contracted in one MXU step. No scratch."""
    acc = jnp.dot(x_ref[...], w_ref[...], preferred_element_type=jnp.float32)
    pre = omega_0 * (acc + b_ref[...].astype(jnp.float32))  # bias broadcasts over rows
    o_ref[...] = jnp.sin(pre).astype(o_ref.dtype)


def _sine_kernel_small_k(x_ref, w_ref, b_ref, o_ref, *, omega_0, k_dim):
    """First SIREN layer (K = 2..4 coords): VPU broadcast-FMA, no MXU."""
    acc = jnp.broadcast_to(b_ref[...].astype(jnp.float32), o_ref.shape)
    for k in range(k_dim):  # static unroll over the tiny K
        acc = acc + (x_ref[:, k : k + 1].astype(jnp.float32)
                     * w_ref[k : k + 1, :].astype(jnp.float32))
    o_ref[...] = jnp.sin(omega_0 * acc).astype(o_ref.dtype)


def _sine_kernel_multi_k(x_ref, w_ref, b_ref, o_ref, acc_ref, *, omega_0):
    """Grid (Mt, Nt, Kt); f32 accumulator, bias folded into k==0 init."""
    k = pl.program_id(2)

    @pl.when(k == 0)
    def _():
        acc_ref[...] = jnp.broadcast_to(b_ref[...].astype(jnp.float32), acc_ref.shape)

    acc_ref[...] += jnp.dot(x_ref[...], w_ref[...],
                            preferred_element_type=jnp.float32)

    @pl.when(k == pl.num_programs(2) - 1)
    def _():
        o_ref[...] = jnp.sin(omega_0 * acc_ref[...]).astype(o_ref.dtype)


# ----------------------------------------------------------------------------
# Wrapper
# ----------------------------------------------------------------------------
def _sublane(dtype):
    return {4: 8, 2: 16, 1: 32}[jnp.dtype(dtype).itemsize]


def _round_up(a, b):
    return -(-a // b) * b


def _cdiv(a, b):
    return -(-a // b)


def _vmem_bytes(tm, tn, tk, nk, in_sz, w_sz, out_sz):
    """Double-buffered streaming tiles + resident W/bias + f32 acc/epilogue."""
    x_b = 2 * tm * tk * in_sz
    w_b = 2 * tk * tn * w_sz
    b_b = 2 * tn * 4
    o_b = 2 * tm * tn * out_sz
    acc_b = 4 * tm * tn if nk > 1 else 0
    eps_b = 4 * tm * tn                      # f32 epilogue temporaries
    return x_b + w_b + b_b + o_b + acc_b + eps_b


def sine_layer_forward(x, weight, bias, omega_0=30.0, *, tm=None, tn=None, tk=None):
    """x: [M, in_features]; weight: [out_features, in_features] (PyTorch layout);
    bias: [out_features]. Returns sin(omega_0 * (x @ weight.T + bias)): [M, out]."""
    M, K = x.shape
    N, K2 = weight.shape
    assert K == K2 and bias.shape == (N,)

    # One-time layout fix (amortized over all M tiles): contract against W^T
    # stored as [K, N] so the MXU sees a plain (M,K)x(K,N) matmul.
    w_t = jnp.transpose(weight)              # [K, N]
    b2 = bias.reshape(1, N)

    in_sz = jnp.dtype(x.dtype).itemsize
    w_sz = jnp.dtype(weight.dtype).itemsize
    out_dtype = x.dtype
    out_sz = jnp.dtype(out_dtype).itemsize
    sub = _sublane(x.dtype)

    try:
        vmem_cap = int(pltpu.get_tpu_info().vmem_capacity_bytes)
    except Exception:
        vmem_cap = 64 * 1024 * 1024          # conservative (v7x per-TensorCore)
    budget = int(vmem_cap * 0.7)

    # --- N tile: keep W/bias resident for typical SIREN widths ---------------
    if tn is None:
        tn = N if N <= 1024 else 512         # 512 is lane-dense; cdiv masks the edge
    if tn != N:
        assert tn % 128 == 0, "tn must be a multiple of 128 (or tn == N)"

    # --- K tile: single full-extent block unless K is huge AND divisible -----
    if tk is None:
        tk = K
        if K > 2048:
            t = 2048
            while t >= 128:
                if K % t == 0:
                    tk = t
                    break
                t -= 128
    if tk != K:
        # A partial K edge block would pollute the reduction with garbage.
        assert K % tk == 0 and tk % 128 == 0, \
            "splitting K requires a lane-dense divisor of K"
    nk = K // tk

    # --- M tile ---------------------------------------------------------------
    n_tiles = _cdiv(N, tn)
    if tm is None:
        if M <= sub:
            tm = M                           # full-extent tiny block
        elif M <= 1024:
            tm = (M // sub) * sub            # <= M; cdiv masks the ragged edge
        elif M <= 2048 and n_tiles == 1:
            # two balanced tiles so both v7x TensorCores get work
            tm = _round_up(_cdiv(M, 2), sub)
        else:
            tm = 1024
        # Shrink until the live set fits a conservative VMEM budget.
        while tm > sub and _vmem_bytes(tm, tn, tk, nk, in_sz, w_sz, out_sz) > budget:
            tm = max(sub, (tm // 2 // sub) * sub)
    assert tm == M or tm % sub == 0, "tm must be a multiple of the sublane size"

    m_tiles = _cdiv(M, tm)

    live = _vmem_bytes(tm, tn, tk, nk, in_sz, w_sz, out_sz)
    vmem_limit = max(int(live * 1.25), 16 * 1024 * 1024)
    vmem_limit = int(min(vmem_limit, vmem_cap * 3 // 4))

    cost = pl.CostEstimate(
        flops=2 * M * N * K,
        transcendentals=M * N,
        bytes_accessed=M * K * in_sz + K * N * w_sz + N * w_sz + M * N * out_sz,
    )

    out_shape = jax.ShapeDtypeStruct((M, N), out_dtype)

    if nk == 1:
        if K <= 4:
            kernel = functools.partial(_sine_kernel_small_k,
                                       omega_0=float(omega_0), k_dim=K)
        else:
            kernel = functools.partial(_sine_kernel_single_k,
                                       omega_0=float(omega_0))
        grid_spec = pltpu.PrefetchScalarGridSpec(
            num_scalar_prefetch=0,
            grid=(m_tiles, n_tiles),
            in_specs=[
                pl.BlockSpec((tm, tk), lambda i, j: (i, 0)),   # x tile (streams)
                pl.BlockSpec((tk, tn), lambda i, j: (0, j)),   # W^T tile (resident if n_tiles==1)
                pl.BlockSpec((1, tn), lambda i, j: (0, j)),    # bias tile
            ],
            out_specs=pl.BlockSpec((tm, tn), lambda i, j: (i, j)),
        )
        dim_sem = ("parallel", "parallel")
    else:
        kernel = functools.partial(_sine_kernel_multi_k, omega_0=float(omega_0))
        grid_spec = pltpu.PrefetchScalarGridSpec(
            num_scalar_prefetch=0,
            grid=(m_tiles, n_tiles, nk),                       # reduction axis last
            in_specs=[
                pl.BlockSpec((tm, tk), lambda i, j, k: (i, k)),
                pl.BlockSpec((tk, tn), lambda i, j, k: (k, j)),
                pl.BlockSpec((1, tn), lambda i, j, k: (0, j)),
            ],
            out_specs=pl.BlockSpec((tm, tn), lambda i, j, k: (i, j)),
            scratch_shapes=[pltpu.VMEM((tm, tn), jnp.float32)],
        )
        dim_sem = ("parallel", "parallel", "arbitrary")

    return pl.pallas_call(
        kernel,
        out_shape=out_shape,
        grid_spec=grid_spec,
        compiler_params=pltpu.CompilerParams(
            dimension_semantics=dim_sem,
            vmem_limit_bytes=vmem_limit,
        ),
        cost_estimate=cost,
    )(x, w_t, b2)


# ----------------------------------------------------------------------------
# SIREN init (matches SineLayer.init_weights semantics) and a numpy reference
# ----------------------------------------------------------------------------
def init_sine_layer_params(key, in_features, out_features, is_first, omega_0):
    kw, kb = jax.random.split(key)
    if is_first:
        bound_w = 1.0 / in_features
    else:
        bound_w = np.sqrt(6.0 / in_features) / omega_0
    weight = jax.random.uniform(
        kw, (out_features, in_features), jnp.float32, -bound_w, bound_w
    )
    # nn.Linear default bias init: U(-1/sqrt(in_features), 1/sqrt(in_features))
    bound_b = 1.0 / np.sqrt(in_features)
    bias = jax.random.uniform(kb, (out_features,), jnp.float32, -bound_b, bound_b)
    return weight, bias


def _numpy_ref(x, w, b, omega_0):
    x64 = np.asarray(x, np.float64)
    w64 = np.asarray(w, np.float64)
    b64 = np.asarray(b, np.float64)
    return np.sin(omega_0 * (x64 @ w64.T + b64))


if __name__ == "__main__":
    key = jax.random.PRNGKey(0)
    k1, k2, k3, k4, k5, k6 = jax.random.split(key, 6)
    omega_0 = 30.0

    # Case 1: first SIREN layer (in_features=2 coords), ragged M -> small-K VPU path.
    M1, K1, N1 = 200, 2, 64
    x1 = jax.random.uniform(k1, (M1, K1), jnp.float32, -1.0, 1.0)
    w1, b1 = init_sine_layer_params(k2, K1, N1, True, omega_0)
    out1 = jax.block_until_ready(sine_layer_forward(x1, w1, b1, omega_0))
    np.testing.assert_allclose(
        np.asarray(out1), _numpy_ref(x1, w1, b1, omega_0), rtol=2e-4, atol=2e-4
    )

    # Case 2: small hidden layer, single-K MXU path, W/bias fully resident, ragged M.
    M2, K2, N2 = 200, 32, 32
    x2 = jax.random.uniform(k3, (M2, K2), jnp.float32, -1.0, 1.0)
    w2, b2 = init_sine_layer_params(k4, K2, N2, False, omega_0)
    out2 = jax.block_until_ready(sine_layer_forward(x2, w2, b2, omega_0))
    np.testing.assert_allclose(
        np.asarray(out2), _numpy_ref(x2, w2, b2, omega_0), rtol=2e-4, atol=2e-4
    )

    # Case 3: hidden layer with a forced K split (multi-K accumulator path).
    M3, K3, N3 = 64, 256, 128
    x3 = jax.random.uniform(k5, (M3, K3), jnp.float32, -1.0, 1.0)
    w3, b3 = init_sine_layer_params(k6, K3, N3, False, omega_0)
    out3 = jax.block_until_ready(sine_layer_forward(x3, w3, b3, omega_0, tk=128))
    np.testing.assert_allclose(
        np.asarray(out3), _numpy_ref(x3, w3, b3, omega_0), rtol=2e-4, atol=2e-4
    )

    print("KERNEL_OK")
</pallas_src>

<mosaic_0001>
module attributes {stable_mosaic.version = 11 : i64} {
  func.func @_sine_kernel_small_k(%arg0: i32, %arg1: i32, %arg2: memref<200x2xf32, #tpu.memory_space<vmem>>, %arg3: memref<2x64xf32, #tpu.memory_space<vmem>>, %arg4: memref<1x64xf32, #tpu.memory_space<vmem>>, %arg5: memref<200x64xf32, #tpu.memory_space<vmem>>) attributes {dimension_semantics = [#tpu.dimension_semantics<parallel>, #tpu.dimension_semantics<parallel>], iteration_bounds = array<i64: 1, 1>, scalar_prefetch = 0 : i64, scratch_operands = 0 : i64, tpu.core_type = #tpu.core_type<tc>, window_params = [{transform_indices = @transform_0, window_bounds = array<i64: 200, 2>}, {transform_indices = @transform_1, window_bounds = array<i64: 2, 64>}, {transform_indices = @transform_2, window_bounds = array<i64: 1, 64>}, {transform_indices = @transform_3, window_bounds = array<i64: 200, 64>}]} {
    %c0 = arith.constant 0 : index
    %c0_0 = arith.constant 0 : index
    %0 = vector.load %arg4[%c0, %c0_0] : memref<1x64xf32, #tpu.memory_space<vmem>>, vector<1x64xf32>
    %1 = vector.shape_cast %0 : vector<1x64xf32> to vector<1x64xf32>
    %2 = vector.broadcast %1 : vector<1x64xf32> to vector<200x64xf32>
    %c0_1 = arith.constant 0 : index
    %c0_2 = arith.constant 0 : index
    %3 = vector.load %arg2[%c0_1, %c0_2] : memref<200x2xf32, #tpu.memory_space<vmem>>, vector<200x1xf32>
    %c0_3 = arith.constant 0 : index
    %c0_4 = arith.constant 0 : index
    %4 = vector.load %arg3[%c0_3, %c0_4] : memref<2x64xf32, #tpu.memory_space<vmem>>, vector<1x64xf32>
    %5 = vector.broadcast %3 : vector<200x1xf32> to vector<200x64xf32>
    %6 = vector.broadcast %4 : vector<1x64xf32> to vector<200x64xf32>
    %7 = arith.mulf %5, %6 : vector<200x64xf32>
    %8 = arith.addf %2, %7 : vector<200x64xf32>
    %c0_5 = arith.constant 0 : index
    %c1 = arith.constant 1 : index
    %9 = vector.load %arg2[%c0_5, %c1] : memref<200x2xf32, #tpu.memory_space<vmem>>, vector<200x1xf32>
    %c1_6 = arith.constant 1 : index
    %c0_7 = arith.constant 0 : index
    %10 = vector.load %arg3[%c1_6, %c0_7] : memref<2x64xf32, #tpu.memory_space<vmem>>, vector<1x64xf32>
    %11 = vector.broadcast %9 : vector<200x1xf32> to vector<200x64xf32>
    %12 = vector.broadcast %10 : vector<1x64xf32> to vector<200x64xf32>
    %13 = arith.mulf %11, %12 : vector<200x64xf32>
    %14 = arith.addf %8, %13 : vector<200x64xf32>
    %cst = arith.constant 3.000000e+01 : f32
    %15 = vector.broadcast %cst : f32 to vector<200x64xf32>
    %16 = arith.mulf %15, %14 : vector<200x64xf32>
    %17 = math.sin %16 : vector<200x64xf32>
    %c0_8 = arith.constant 0 : index
    %c0_9 = arith.constant 0 : index
    %18 = vector.load %arg5[%c0_8, %c0_9] : memref<200x64xf32, #tpu.memory_space<vmem>>, vector<200x64xf32>
    tpu.vector_store %arg5[%c0_8, %c0_9], %17 {strides = array<i32>} : memref<200x64xf32, #tpu.memory_space<vmem>>, vector<200x64xf32>,
    return
  }
  func.func @transform_0(%arg0: i32, %arg1: i32) -> (i32, i32) {
    %c0_i32 = arith.constant 0 : i32
    %c0_i32_0 = arith.constant 0 : i32
    return %arg0, %c0_i32 : i32, i32
  }
  func.func @transform_1(%arg0: i32, %arg1: i32) -> (i32, i32) {
    %c0_i32 = arith.constant 0 : i32
    %c0_i32_0 = arith.constant 0 : i32
    return %c0_i32, %arg1 : i32, i32
  }
  func.func @transform_2(%arg0: i32, %arg1: i32) -> (i32, i32) {
    %c0_i32 = arith.constant 0 : i32
    %c0_i32_0 = arith.constant 0 : i32
    return %c0_i32, %arg1 : i32, i32
  }
  func.func @transform_3(%arg0: i32, %arg1: i32) -> (i32, i32) {
    %c0_i32 = arith.constant 0 : i32
    return %arg0, %arg1 : i32, i32
  }
}

</mosaic_0001>

<bundles_post_ra>
// kernel: tpu_custom_call.1
= control target key start
LH: loop header
LB: loop body
LE: loop exit
PB: predicated region body
PF: predicated region fallthrough
CT: control target
= control target key end

     0   :  { %v3354_v0 = vmov 0   ;;  %v3355_v26 = vmov 1   ;;  %s5649_s0 = inlined_call_operand.vmem [shape: f32[200,2], index: 0, kind: input, shape index: {}]   ;;  %s5650_s1 = inlined_call_operand.vmem [shape: f32[2,64], index: 1, kind: input, shape index: {}]   ;;  %s5651_s2 = inlined_call_operand.vmem [shape: f32[1,64], index: 2, kind: input, shape index: {}]   ;;  %s5652_s3 = inlined_call_operand.vmem [shape: f32[200,64], index: 3, kind: output, shape index: {}]  }
   0x1   :  { %3248 = vset.pattern.permute.xlu1 %v3354_v0  ;;  %3247 = vset.pattern.permute.xlu0 %v3354_v0  ;;  %v23_v1 = vld [vmem:[%s5649_s0 + $0x10] sm:$0xff]  ;;  %v21_v2 = vld [vmem:[%s5649_s0] sm:$0xff]  ;;  %v24_v3 = vld [vmem:[%s5649_s0 + $0x18] sm:$0xff] }
   0x2   :  { %59 = vperm.xlu1 %3248, %v23_v1   ;;  %49 = vperm.xlu0 %3247, %v21_v2   ;;  %v22_v4 = vld [vmem:[%s5649_s0 + $0x8] sm:$0xff]  ;;  %v25_v6 = vld [vmem:[%s5649_s0 + $0x20] sm:$0xff]  ;;  %v28_v7 = vld [vmem:[%s5649_s0 + $0x38] sm:$0xff] }
   0x3   :  { %v26_v5 = vld [vmem:[%s5649_s0 + $0x28] sm:$0xff]  ;;  %v27_v8 = vld [vmem:[%s5649_s0 + $0x30] sm:$0xff]  ;;  %v29_v10 = vld [vmem:[%s5649_s0 + $0x40] sm:$0xff] }
   0x4   :  { %v30_v9 = vld [vmem:[%s5649_s0 + $0x48] sm:$0xff]  ;;  %v32_v11 = vld [vmem:[%s5649_s0 + $0x58] sm:$0xff]  ;;  %v31_v12 = vld [vmem:[%s5649_s0 + $0x50] sm:$0xff] }
   0x5   :  { %v34_v13 = vld [vmem:[%s5649_s0 + $0x68] sm:$0xff]  ;;  %v33_v14 = vld [vmem:[%s5649_s0 + $0x60] sm:$0xff]  ;;  %v36_v15 = vld [vmem:[%s5649_s0 + $0x78] sm:$0xff] }
   0x6   :  { %64 = vperm.xlu1 %3248, %v24_v3   ;;  %54 = vperm.xlu0 %3247, %v22_v4   ;;  %v35_v16 = vld [vmem:[%s5649_s0 + $0x70] sm:$0xff]  ;;  %v38_v17 = vld [vmem:[%s5649_s0 + $0x88] sm:$0xff]  ;;  %v37_v18 = vld [vmem:[%s5649_s0 + $0x80] sm:$0xff] }
   0x7   :  { %v40_v19 = vld [vmem:[%s5649_s0 + $0x98] sm:$0xff]  ;;  %v39_v20 = vld [vmem:[%s5649_s0 + $0x90] sm:$0xff]  ;;  %v42_v21 = vld [vmem:[%s5649_s0 + $0xa8] sm:$0xff] }
   0x8   :  { %v41_v22 = vld [vmem:[%s5649_s0 + $0xa0] sm:$0xff]  ;;  %v44_v23 = vld [vmem:[%s5649_s0 + $0xb8] sm:$0xff]  ;;  %v43_v24 = vld [vmem:[%s5649_s0 + $0xb0] sm:$0xff] }
   0x9   :  { %v45_v25 = vld [vmem:[%s5649_s0 + $0xc0] sm:$0xff] }
   0xa   :  { %74 = vperm.xlu1 %3248, %v26_v5   ;;  %69 = vperm.xlu0 %3247, %v25_v6   ;;  %v3464_v29 = vld [vmem:[%s5650_s1] ss:$0 sm:$0xff] }
   0xb   :  { %v3472_v33 = vld [vmem:[%s5651_s2] ss:$0 sm:$0xff] }
   0xe   :  { %84 = vperm.xlu1 %3248, %v28_v7   ;;  %79 = vperm.xlu0 %3247, %v27_v8  }
  0x12   :  { %94 = vperm.xlu1 %3248, %v30_v9   ;;  %89 = vperm.xlu0 %3247, %v29_v10  }
  0x16   :  { %104 = vperm.xlu1 %3248, %v32_v11   ;;  %99 = vperm.xlu0 %3247, %v31_v12  }
  0x1a   :  { %114 = vperm.xlu1 %3248, %v34_v13   ;;  %109 = vperm.xlu0 %3247, %v33_v14  }
  0x1e   :  { %124 = vperm.xlu1 %3248, %v36_v15   ;;  %119 = vperm.xlu0 %3247, %v35_v16  }
  0x22   :  { %134 = vperm.xlu1 %3248, %v38_v17   ;;  %129 = vperm.xlu0 %3247, %v37_v18  }
  0x26   :  { %144 = vperm.xlu1 %3248, %v40_v19   ;;  %139 = vperm.xlu0 %3247, %v39_v20  }
  0x2a   :  { %154 = vperm.xlu1 %3248, %v42_v21   ;;  %149 = vperm.xlu0 %3247, %v41_v22  }
  0x2e   :  { %164 = vperm.xlu1 %3248, %v44_v23   ;;  %159 = vperm.xlu0 %3247, %v43_v24  }
  0x32   :  { %3249 = vset.pattern.permute.xlu1 %v3355_v26  ;;  %169 = vperm.xlu0 %3247, %v45_v25  }
  0x33   :  { %228 = vperm.xlu1 %3249, %v21_v2  }
  0x36   :  { %3250 = vset.pattern.permute.xlu0 %v3355_v26 }
  0x37   :  { %236 = vperm.xlu1 %3249, %v23_v1   ;;  %232 = vperm.xlu0 %3250, %v22_v4  }
  0x3b   :  { %240 = vperm.xlu1 %3249, %v24_v3   ;;  %244 = vperm.xlu0 %3250, %v25_v6  }
  0x3f   :  { %248 = vperm.xlu1 %3249, %v26_v5   ;;  %252 = vperm.xlu0 %3250, %v27_v8  }
  0x43   :  { %256 = vperm.xlu1 %3249, %v28_v7   ;;  %260 = vperm.xlu0 %3250, %v29_v10  }
  0x47   :  { %264 = vperm.xlu1 %3249, %v30_v9   ;;  %268 = vperm.xlu0 %3250, %v31_v12  }
  0x4b   :  { %272 = vperm.xlu1 %3249, %v32_v11   ;;  %276 = vperm.xlu0 %3250, %v33_v14  }
  0x4f   :  { %280 = vperm.xlu1 %3249, %v34_v13   ;;  %284 = vperm.xlu0 %3250, %v35_v16  }
  0x53   :  { %288 = vperm.xlu1 %3249, %v36_v15   ;;  %292 = vperm.xlu0 %3250, %v37_v18  }
  0x57   :  { %296 = vperm.xlu1 %3249, %v38_v17   ;;  %300 = vperm.xlu0 %3250, %v39_v20  }
  0x5b   :  { %304 = vperm.xlu1 %3249, %v40_v19   ;;  %308 = vperm.xlu0 %3250, %v41_v22  }
  0x5f   :  { %312 = vperm.xlu1 %3249, %v42_v21   ;;  %316 = vperm.xlu0 %3250, %v43_v24  }
  0x63   :  { %320 = vperm.xlu1 %3249, %v44_v23   ;;  %324 = vperm.xlu0 %3250, %v45_v25  }
  0x7d   :  { %v3457_v27 = vpop.permute.xlu1 %59  ;;  %v3459_v28 = vpop.permute.xlu0 %49 }
  0x81   :  { %v65_v30 = vpop.permute.xlu1 %64  ;;  %v3466_v31 = vpop.permute.xlu0 %54 }
  0x82   :  { %v179_v32 = vmul.f32 %v3464_v29, %v65_v30 }
  0x84   :  { %v3475_v34 = vadd.f32 %v3472_v33, %v179_v32 }
  0x85   :  { %v75_v35 = vpop.permute.xlu1 %74  ;;  %v70_v36 = vpop.permute.xlu0 %69 }
  0x86   :  { %v181_v37 = vmul.f32 %v3464_v29, %v75_v35  ;;  %v180_v38 = vmul.f32 %v3464_v29, %v70_v36  ;;  %v176_v35 = vmul.f32 %v3464_v29, %v3459_v28  ;;  %v178_v28 = vmul.f32 %v3464_v29, %v3457_v27 }
  0x88   :  { %v3480_v39 = vadd.f32 %v3472_v33, %v181_v37  ;;  %v3483_v40 = vadd.f32 %v3472_v33, %v180_v38  ;;  %v3562_v38 = vld [vmem:[%s5650_s1 + $0x1] ss:$0 sm:$0xff] }
  0x89   :  { %v85_v41 = vpop.permute.xlu1 %84  ;;  %v80_v42 = vpop.permute.xlu0 %79 }
  0x8a   :  { %v183_v43 = vmul.f32 %v3464_v29, %v85_v41  ;;  %v182_v44 = vmul.f32 %v3464_v29, %v80_v42 }
  0x8c   :  { %v3488_v45 = vadd.f32 %v3472_v33, %v183_v43  ;;  %v3491_v46 = vadd.f32 %v3472_v33, %v182_v44  ;;  %v201_v44 = vadd.f32 %v3472_v33, %v176_v35 }
  0x8d   :  { %v95_v47 = vpop.permute.xlu1 %94  ;;  %v90_v48 = vpop.permute.xlu0 %89 }
  0x8e   :  { %v185_v49 = vmul.f32 %v3464_v29, %v95_v47  ;;  %v184_v50 = vmul.f32 %v3464_v29, %v90_v48  ;;  %v177_v48 = vmul.f32 %v3464_v29, %v3466_v31 }
  0x90   :  { %v3496_v51 = vadd.f32 %v3472_v33, %v185_v49  ;;  %v3499_v52 = vadd.f32 %v3472_v33, %v184_v50 }
  0x91   :  { %v105_v53 = vpop.permute.xlu1 %104  ;;  %v100_v54 = vpop.permute.xlu0 %99 }
  0x92   :  { %v187_v55 = vmul.f32 %v3464_v29, %v105_v53  ;;  %v186_v56 = vmul.f32 %v3464_v29, %v100_v54 }
  0x94   :  { %v3504_v57 = vadd.f32 %v3472_v33, %v187_v55  ;;  %v3507_v58 = vadd.f32 %v3472_v33, %v186_v56 }
  0x95   :  { %v115_v59 = vpop.permute.xlu1 %114  ;;  %v110_v60 = vpop.permute.xlu0 %109 }
  0x96   :  { %v189_v61 = vmul.f32 %v3464_v29, %v115_v59  ;;  %v188_v62 = vmul.f32 %v3464_v29, %v110_v60  ;;  %v203_v60 = vadd.f32 %v3472_v33, %v178_v28 }
  0x98   :  { %v3512_v63 = vadd.f32 %v3472_v33, %v189_v61  ;;  %v3515_v0 = vadd.f32 %v3472_v33, %v188_v62  ;;  %v202_v61 = vadd.f32 %v3472_v33, %v177_v48  ;;  %v5658_v48 = vmov 2131351028  }
  0x99   :  { %v125_v1 = vpop.permute.xlu1 %124  ;;  %v120_v2 = vpop.permute.xlu0 %119 }
  0x9a   :  { %v191_v3 = vmul.f32 %v3464_v29, %v125_v1  ;;  %v190_v4 = vmul.f32 %v3464_v29, %v120_v2 }
  0x9c   :  { %v3520_v5 = vadd.f32 %v3472_v33, %v191_v3  ;;  %v3523_v6 = vadd.f32 %v3472_v33, %v190_v4 }
  0x9d   :  { %v135_v7 = vpop.permute.xlu1 %134  ;;  %v130_v8 = vpop.permute.xlu0 %129 }
  0x9e   :  { %v193_v9 = vmul.f32 %v3464_v29, %v135_v7  ;;  %v192_v10 = vmul.f32 %v3464_v29, %v130_v8 }
  0xa0   :  { %v3528_v11 = vadd.f32 %v3472_v33, %v193_v9  ;;  %v3531_v12 = vadd.f32 %v3472_v33, %v192_v10 }
  0xa1   :  { %v145_v13 = vpop.permute.xlu1 %144  ;;  %v140_v14 = vpop.permute.xlu0 %139 }
  0xa2   :  { %v195_v15 = vmul.f32 %v3464_v29, %v145_v13  ;;  %v194_v16 = vmul.f32 %v3464_v29, %v140_v14 }
  0xa4   :  { %v3536_v17 = vadd.f32 %v3472_v33, %v195_v15  ;;  %v3539_v18 = vadd.f32 %v3472_v33, %v194_v16 }
  0xa5   :  { %v155_v19 = vpop.permute.xlu1 %154  ;;  %v150_v20 = vpop.permute.xlu0 %149 }
  0xa6   :  { %v197_v21 = vmul.f32 %v3464_v29, %v155_v19  ;;  %v196_v22 = vmul.f32 %v3464_v29, %v150_v20 }
  0xa8   :  { %v3544_v23 = vadd.f32 %v3472_v33, %v197_v21  ;;  %v3547_v24 = vadd.f32 %v3472_v33, %v196_v22 }
  0xa9   :  { %v165_v25 = vpop.permute.xlu1 %164  ;;  %v160_v26 = vpop.permute.xlu0 %159 }
  0xaa   :  { %v199_v30 = vmul.f32 %v3464_v29, %v165_v25  ;;  %v198_v32 = vmul.f32 %v3464_v29, %v160_v26 }
  0xac   :  { %v3554_v36 = vadd.f32 %v3472_v33, %v199_v30  ;;  %v3557_v37 = vadd.f32 %v3472_v33, %v198_v32 }
  0xad   :  { %v170_v41 = vpop.permute.xlu0 %169 }
  0xae   :  { %v200_v42 = vmul.f32 %v3464_v29, %v170_v41  ;;  %v229_v43 = vpop.permute.xlu1 %228 }
  0xaf   :  { %v331_v47 = vmul.f32 %v3562_v38, %v229_v43 }
  0xb0   :  { %v3572_v49 = vadd.f32 %v3472_v33, %v200_v42  ;;  %v5665_v42 = vmov 683565275  }
  0xb1   :  { %v356_v50 = vadd.f32 %v331_v47, %v201_v44  ;;  %v5663_v44 = vmov 2475754826  }
  0xb2   :  { %v237_v53 = vpop.permute.xlu1 %236  ;;  %v233_v54 = vpop.permute.xlu0 %232 }
  0xb3   :  { %v3574_v55 = vmul.f32 30.0, %v356_v50  ;;  %v333_v56 = vmul.f32 %v3562_v38, %v237_v53  ;;  %v332_v59 = vmul.f32 %v3562_v38, %v233_v54  ;;  %v5660_v53 = vmov 2102212464  }
  0xb5   :  { %v5654_v27 = vand.u32 2147483647, %v3574_v55  ;;  %v409_v29 = vand.u32 2139095040, %v3574_v55  ;;  %v358_v31 = vadd.f32 %v333_v56, %v203_v60  ;;  %v357_v62 = vadd.f32 %v332_v59, %v202_v61 }
  0xb6   :  { %v241_v16 = vpop.permute.xlu1 %240  ;;  %v3360_v56 = vmov 920167782   ;;  %vm408_vm13 = vcmp.lt.s32.totalorder %v3574_v55, 0 }
  0xb7   :  { %v410_v1 = vshrl.u32 %v409_v29, 23  ;;  %v413_v2 = vand.u32 8388607, %v5654_v27  ;;  %v3584_v3 = vmul.f32 30.0, %v358_v31  ;;  %v3586_v4 = vmul.f32 30.0, %v357_v62 }
  0xb8   :  { %v3596_v35 = vmul.f32 %v3562_v38, %v241_v16 }
  0xb9   :  { %v3039_v7 = vadd.s32 4294967169, %v410_v1  ;;  %v5653_v8 = vand.u32 2147483647, %v3584_v3  ;;  %v617_v9 = vand.u32 2139095040, %v3584_v3  ;;  %v414_v10 = vor.u32 8388608, %v413_v2 }
  0xba   :  { %v513_v15 = vand.u32 2139095040, %v3586_v4  ;;  %v5656_v1 = vmov 1326507024  }
  0xbb   :  { %v416_v33 = vadd.s32 1, %v3039_v7  ;;  %v618_v13 = vshrl.u32 %v617_v9, 23  ;;  %v621_v14 = vand.u32 8388607, %v5653_v8  ;;  %v3593_v26 = vshll.u32 %v414_v10, 8 }
  0xbc   :  { %v514_v21 = vshrl.u32 %v513_v15, 23 }
  0xbd   :  { %vm417_vm0 = vcmp.gt.s32.totalorder %v416_v33, 0  ;;  %v3047_v20 = vadd.s32 4294967169, %v618_v13  ;;  %v622_v30 = vor.u32 8388608, %v621_v14 }
  0xbe   :  { %v418_v19 = vsel %vm417_vm0, %v416_v33, 0  ;;  %v3043_v28 = vadd.s32 4294967169, %v514_v21 }
  0xbf   :  { %v419_v22 = vshrl.u32 %v418_v19, 5  ;;  %v420_v25 = vand.u32 31, %v418_v19  ;;  %v624_v32 = vadd.s32 1, %v3047_v20 }
  0xc1   :  { %v421_v41 = vsub.s32 32, %v420_v25  ;;  %v423_v43 = vshll.u32 %v5665_v42, %v420_v25  ;;  %v426_v47 = vshll.u32 %v5663_v44, %v420_v25  ;;  %v429_v50 = vshll.u32 %v5658_v48, %v420_v25 }
  0xc2   :  { %v432_v54 = vshll.u32 %v5660_v53, %v420_v25  ;;  %v435_v59 = vshll.u32 %v3360_v56, %v420_v25  ;;  %vm438_vm1 = vcmp.lt.s32.totalorder %v419_v22, 1  ;;  %vm439_vm2 = vcmp.lt.s32.totalorder %v419_v22, 2 }
  0xc3   :  { %v424_v60 = vshrl.u32 %v5663_v44, %v421_v41  ;;  %v427_v61 = vshrl.u32 %v5658_v48, %v421_v41  ;;  %v430_v29 = vshrl.u32 %v5660_v53, %v421_v41  ;;  %v422_v31 = vshrl.u32 %v5665_v42, %v421_v41 }
  0xc4   :  { %v433_v62 = vshrl.u32 %v3360_v56, %v421_v41  ;;  %v436_v2 = vshrl.u32 %v5656_v1, %v421_v41  ;;  %vm440_vm3 = vcmp.lt.s32.totalorder %v419_v22, 3  ;;  %vm625_vm4 = vcmp.gt.s32.totalorder %v624_v32, 0 }
  0xc5   :  { %v425_v7 = vor.u32 %v424_v60, %v423_v43  ;;  %v428_v9 = vor.u32 %v427_v61, %v426_v47  ;;  %v431_v33 = vor.u32 %v430_v29, %v429_v50  ;;  %vm441_vm5 = vcmp.lt.s32.totalorder %v419_v22, 4 }
  0xc6   :  { %v434_v10 = vor.u32 %v433_v62, %v432_v54  ;;  %v437_v13 = vor.u32 %v436_v2, %v435_v59  ;;  %v626_v14 = vsel %vm625_vm4, %v624_v32, 0  ;;  %v3618_v60 = vshll.u32 %v622_v30, 8 }
  0xc7   :  { %v442_v15 = vsel %vm438_vm1, %v422_v31, %v425_v7  ;;  %v443_v16 = vsel %vm441_vm5, %v431_v33, 2102212464  ;;  %v446_v19 = vsel %vm438_vm1, %v425_v7, %v428_v9  ;;  %v450_v20 = vsel %vm438_vm1, %v428_v9, %v431_v33 }
  0xc8   :  { %v444_v21 = vsel %vm440_vm3, %v428_v9, %v443_v16  ;;  %v447_v25 = vsel %vm441_vm5, %v434_v10, 920167782  ;;  %v451_v41 = vsel %vm441_vm5, %v437_v13, 1326507024  ;;  %v627_v8 = vshrl.u32 %v626_v14, 5 }
  0xc9   :  { %v445_v43 = vsel %vm439_vm2, %v442_v15, %v444_v21  ;;  %v448_v47 = vsel %vm440_vm3, %v431_v33, %v447_v25  ;;  %v452_v50 = vsel %vm440_vm3, %v434_v10, %v451_v41  ;;  %v628_v54 = vand.u32 31, %v626_v14 }
  0xca   :  { %v449_v32 = vsel %vm439_vm2, %v446_v19, %v448_v47  ;;  %v453_v59 = vsel %vm439_vm2, %v450_v20, %v452_v50  ;;  %v5655_v61 = vand.u32 2147483647, %v3586_v4  ;;  %v461_v7 = vmul.u32 %v3593_v26, %v445_v43 }
  0xcb   :  { %v3622_v29 = vmul.u32.u64.low %v3593_v26, %v453_v59  ;;  %v3623_v31 = vmul.u32.u64.high %v3593_v26, %v453_v59, %v3622_v29  ;;  %v3626_v62 = vmul.u32.u64.low %v3593_v26, %v449_v32  ;;  %v3627_v2 = vmul.u32.u64.high %v3593_v26, %v449_v32, %v3626_v62 }
  0xcc   :  { %v629_v9 = vsub.s32 32, %v628_v54  ;;  %vm646_vm6 = vcmp.lt.s32.totalorder %v627_v8, 1  ;;  %v520_v33 = vadd.s32 1, %v3043_v28  ;;  %v631_v22 = vshll.u32 %v5665_v42, %v628_v54 }
  0xcd   :  { %v634_v30 = vshll.u32 %v5663_v44, %v628_v54  ;;  %v637_v10 = vshll.u32 %v5658_v48, %v628_v54  ;;  %v640_v13 = vshll.u32 %v5660_v53, %v628_v54  ;;  %v643_v19 = vshll.u32 %v3360_v56, %v628_v54 }
  0xce   :  { %v632_v14 = vshrl.u32 %v5663_v44, %v629_v9  ;;  %v635_v15 = vshrl.u32 %v5658_v48, %v629_v9  ;;  %v638_v16 = vshrl.u32 %v5660_v53, %v629_v9  ;;  %vm463_vm7 = vc.u32 %v3623_v31, %v3626_v62 }
  0xcf   :  { %v464_v26 = vadd.s32 1, %v3627_v2  ;;  %v641_v28 = vshrl.u32 %v3360_v56, %v629_v9  ;;  %vm647_vm8 = vcmp.lt.s32.totalorder %v627_v8, 2  ;;  %v644_v41 = vshrl.u32 %v5656_v1, %v629_v9 }
  0xd0   :  { %v633_v20 = vor.u32 %v632_v14, %v631_v22  ;;  %v636_v21 = vor.u32 %v635_v15, %v634_v30  ;;  %v639_v25 = vor.u32 %v638_v16, %v637_v10  ;;  %v630_v47 = vshrl.u32 %v5665_v42, %v629_v9 }
  0xd1   :  { %v465_v43 = vsel %vm463_vm7, %v464_v26, %v3627_v2  ;;  %v642_v50 = vor.u32 %v641_v28, %v640_v13  ;;  %vm649_vm9 = vcmp.lt.s32.totalorder %v627_v8, 4  ;;  %v645_v32 = vor.u32 %v644_v41, %v643_v19 }
  0xd2   :  { %v466_v54 = vadd.s32 %v465_v43, %v461_v7  ;;  %v651_v59 = vsel %vm649_vm9, %v639_v25, 2102212464  ;;  %vm521_vm10 = vcmp.gt.s32.totalorder %v520_v33, 0  ;;  %vm648_vm11 = vcmp.lt.s32.totalorder %v627_v8, 3 }
  0xd3   :  { %v654_v29 = vsel %vm646_vm6, %v633_v20, %v636_v21  ;;  %v655_v27 = vsel %vm649_vm9, %v642_v50, 920167782  ;;  %v658_v22 = vsel %vm646_vm6, %v636_v21, %v639_v25  ;;  %v650_v10 = vsel %vm646_vm6, %v630_v47, %v633_v20 }
  0xd4   :  { %v467_v30 = vadd.s32 536870912, %v466_v54  ;;  %v656_v14 = vsel %vm648_vm11, %v639_v25, %v655_v27  ;;  %v659_v15 = vsel %vm649_vm9, %v645_v32, 1326507024  ;;  %v652_v2 = vsel %vm648_vm11, %v636_v21, %v651_v59  ;;  %v245_v59 = vpop.permute.xlu0 %244 }
  0xd5   :  { %v657_v9 = vsel %vm647_vm8, %v654_v29, %v656_v14  ;;  %v660_v13 = vsel %vm648_vm11, %v642_v50, %v659_v15  ;;  %v522_v16 = vsel %vm521_vm10, %v520_v33, 0  ;;  %v653_v21 = vsel %vm647_vm8, %v650_v10, %v652_v2 }
  0xd6   :  { %v468_v7 = vshrl.u32 %v467_v30, 30  ;;  %v661_v19 = vsel %vm647_vm8, %v658_v22, %v660_v13  ;;  %v3652_v26 = vmul.u32.u64.low %v3618_v60, %v657_v9  ;;  %v3653_v28 = vmul.u32.u64.high %v3618_v60, %v657_v9, %v3652_v26 }
  0xd7   :  { %v3657_v41 = vmul.u32.u64.low %v3618_v60, %v661_v19  ;;  %v3658_v43 = vmul.u32.u64.high %v3618_v60, %v661_v19, %v3657_v41  ;;  %v524_v20 = vand.u32 31, %v522_v16  ;;  %v517_v25 = vand.u32 8388607, %v5655_v61 }
  0xd8   :  { %v469_v27 = vshll.u32 %v468_v7, 30  ;;  %v672_v50 = vadd.s32 1, %v3653_v28  ;;  %v359_v32 = vadd.f32 %v3596_v35, %v3475_v34  ;;  %v669_v29 = vmul.u32 %v3618_v60, %v653_v21 }
  0xd9   :  { %v525_v33 = vsub.s32 32, %v524_v20  ;;  %vm671_vm12 = vc.u32 %v3658_v43, %v3652_v26  ;;  %v3676_v14 = vmul.f32 %v3562_v38, %v245_v59  ;;  %v536_v60 = vshll.u32 %v5660_v53, %v524_v20 }
  0xda   :  { %v3663_v47 = vsub.s32 %v466_v54, %v469_v27  ;;  %v673_v22 = vsel %vm671_vm12, %v672_v50, %v3653_v28  ;;  %v518_v54 = vor.u32 8388608, %v517_v25  ;;  %v3681_v15 = vmul.f32 30.0, %v359_v32 }
  0xdb   :  { %v674_v30 = vadd.s32 %v673_v22, %v669_v29  ;;  %v537_v10 = vshrl.u32 %v3360_v56, %v525_v33  ;;  %v528_v35 = vshrl.u32 %v5663_v44, %v525_v33  ;;  %v3683_v9 = vshrl.u32 %v522_v16, 5 }
  0xdc   :  { %v472_v8 = vsub.s32 0, %v3663_v47  ;;  %v531_v13 = vshrl.u32 %v5658_v48, %v525_v33  ;;  %v534_v19 = vshrl.u32 %v5660_v53, %v525_v33  ;;  %v492_v41 = vsub.s32 4, %v468_v7 }
  0xdd   :  { %v675_v2 = vadd.s32 536870912, %v674_v30  ;;  %v527_v27 = vshll.u32 %v5665_v42, %v524_v20  ;;  %v538_v21 = vor.u32 %v537_v10, %v536_v60  ;;  %v530_v50 = vshll.u32 %v5663_v44, %v524_v20 }
  0xde   :  { %v3040_v34 = vmin.u32 %v472_v8, %v3663_v47  ;;  %v533_v59 = vshll.u32 %v5658_v48, %v524_v20  ;;  %v540_v32 = vshrl.u32 %v5656_v1, %v525_v33  ;;  %v5667_v16 = vand.u32 2147483647, %v3574_v55 }
  0xdf   :  { %v3688_v25 = vshrl.u32 %v675_v2, 30  ;;  %v462_v8 = vadd.s32 %v3626_v62, %v3623_v31  ;;  %v539_v10 = vshll.u32 %v3360_v56, %v524_v20  ;;  %v532_v2 = vor.u32 %v531_v13, %v530_v50 }
  0xe0   :  { %v474_v28 = vclz %v3040_v34  ;;  %vm3695_vm14 = vcmp.le.f32.partialorder %v5667_v16, 0.7853982  ;;  %v529_v34 = vor.u32 %v528_v35, %v527_v27  ;;  %v535_v61 = vor.u32 %v534_v19, %v533_v59 }
  0xe1   :  { %v677_v60 = vshll.u32 %v3688_v25, 30  ;;  %vm545_vm15 = vcmp.lt.s32.totalorder %v3683_v9, 4  ;;  %v541_v1 = vor.u32 %v540_v32, %v539_v10  ;;  %v3706_v48 = vshll.u32 %v518_v54, 8 }
  0xe2   :  { %v3041_v22 = vadd.s32 4294967294, %v474_v28  ;;  %v551_v16 = vsel %vm545_vm15, %v538_v21, 920167782  ;;  %v493_v31 = vsel %vm408_vm13, %v492_v41, %v468_v7  ;;  %v526_v20 = vshrl.u32 %v5665_v42, %v525_v33 }
  0xe3   :  { %v3710_v62 = vsub.s32 %v674_v30, %v677_v60  ;;  %vm542_vm1 = vcmp.lt.s32.totalorder %v3683_v9, 1  ;;  %vm544_vm2 = vcmp.lt.s32.totalorder %v3683_v9, 3  ;;  %vm616_vm3 = vcmp.lt.s32.totalorder %v3584_v3, 0 }
  0xe4   :  { %vm3042_vm0 = vcmp.lt.s32.totalorder %v3041_v22, 0  ;;  %v550_v54 = vsel %vm542_vm1, %v529_v34, %v532_v2  ;;  %v552_v28 = vsel %vm544_vm2, %v535_v61, %v551_v16  ;;  %v554_v7 = vsel %vm542_vm1, %v532_v2, %v535_v61 }
  0xe5   :  { %v477_v53 = vsel %vm3042_vm0, 0, %v3041_v22  ;;  %v680_v19 = vsub.s32 0, %v3710_v62  ;;  %v555_v27 = vsel %vm545_vm15, %v541_v1, 1326507024  ;;  %vm543_vm4 = vcmp.lt.s32.totalorder %v3683_v9, 2 }
  0xe6   :  { %v478_v35 = vsub.s32 32, %v477_v53  ;;  %v482_v13 = vsub.s32 4294967266, %v477_v53  ;;  %v479_v30 = vshll.u32 %v3663_v47, %v477_v53  ;;  %v547_v59 = vsel %vm545_vm15, %v535_v61, 2102212464 }
  0xe7   :  { %v3048_v50 = vmin.u32 %v680_v19, %v3710_v62  ;;  %v556_v32 = vsel %vm544_vm2, %v538_v21, %v555_v27  ;;  %v553_v53 = vsel %vm543_vm4, %v550_v54, %v552_v28  ;;  %v495_v1 = vsel %vm3695_vm14, 0, %v493_v31 }
  0xe8   :  { %v480_v33 = vshrl.u32 %v462_v8, %v478_v35  ;;  %v483_v41 = vadd.s32 127, %v482_v13  ;;  %v557_v47 = vsel %vm543_vm4, %v554_v7, %v556_v32  ;;  %v5670_v8 = vand.u32 2147483647, %v3584_v3 }
  0xe9   :  { %v682_v61 = vclz %v3048_v50  ;;  %v546_v21 = vsel %vm542_vm1, %v526_v20, %v529_v34  ;;  %v548_v35 = vsel %vm544_vm2, %v532_v2, %v547_v59  ;;  %v700_v31 = vsub.s32 4, %v3688_v25 }
  0xea   :  { %v481_v22 = vor.u32 %v480_v33, %v479_v30  ;;  %v484_v10 = vshll.u32 %v483_v41, 23  ;;  %vm3740_vm5 = vcmp.le.f32.partialorder %v5670_v8, 0.7853982  ;;  %v721_v41 = vand.u32 2139095040, %v3681_v15 }
  0xeb   :  { %v3749_v13 = vmul.u32.u64.low %v3706_v48, %v557_v47  ;;  %v3750_v19 = vmul.u32.u64.high %v3706_v48, %v557_v47, %v3749_v13  ;;  %v3049_v54 = vadd.s32 4294967294, %v682_v61  ;;  %v360_v34 = vadd.f32 %v3676_v14, %v3483_v40 }
  0xec   :  { %v485_v16 = vor.u32 4788187, %v484_v10  ;;  %v3754_v28 = vmul.u32.u64.low %v3706_v48, %v553_v53  ;;  %v3755_v7 = vmul.u32.u64.high %v3706_v48, %v553_v53, %v3754_v28  ;;  %v488_v33 = vcvt.s32.f32 %v481_v22 }
  0xed   :  { %v670_v2 = vadd.s32 %v3652_v26, %v3658_v43  ;;  %vm3050_vm6 = vcmp.lt.s32.totalorder %v3049_v54, 0  ;;  %v549_v20 = vsel %vm543_vm4, %v546_v21, %v548_v35  ;;  %v5662_v27 = vand.u32 2147483647, %v3681_v15 }
  0xee   :  { %v486_v30 = vand.u32 2147483647, %v485_v16  ;;  %v499_v59 = vadd.s32 3, %v495_v1  ;;  %v685_v32 = vsel %vm3050_vm6, 0, %v3049_v54  ;;  %vm567_vm7 = vc.u32 %v3750_v19, %v3754_v28 }
  0xef   :  { %v686_v22 = vsub.s32 32, %v685_v32  ;;  %v690_v10 = vsub.s32 4294967266, %v685_v32  ;;  %v701_v40 = vsel %vm616_vm3, %v700_v31, %v3688_v25  ;;  %v568_v14 = vadd.s32 1, %v3755_v7 }
  0xf0   :  { %v489_v50 = vmul.f32 %v488_v33, %v486_v30  ;;  %v565_v43 = vmul.u32 %v3706_v48, %v549_v20  ;;  %v722_v9 = vshrl.u32 %v721_v41, 23  ;;  %v3771_v53 = vmul.f32 30.0, %v360_v34  ;;  %v249_v41 = vpop.permute.xlu1 %248 }
  0xf1   :  { %v687_v47 = vshll.u32 %v3710_v62, %v685_v32  ;;  %v688_v1 = vshrl.u32 %v670_v2, %v686_v22  ;;  %v691_v8 = vadd.s32 127, %v690_v10  ;;  %v569_v61 = vsel %vm567_vm7, %v568_v14, %v3755_v7 }
  0xf2   :  { %v490_v26 = vxor.u32 2147483648, %v489_v50  ;;  %v703_v25 = vsel %vm3740_vm5, 0, %v701_v40  ;;  %v570_v16 = vadd.s32 %v569_v61, %v565_v43  ;;  %v3051_v35 = vadd.s32 4294967169, %v722_v9 }
  0xf3   :  { %v689_v13 = vor.u32 %v688_v1, %v687_v47  ;;  %v692_v54 = vshll.u32 %v691_v8, 23  ;;  %v725_v62 = vand.u32 8388607, %v5662_v27  ;;  %v825_v33 = vand.u32 2139095040, %v3771_v53 }
  0xf4   :  { %v491_v21 = vsel %vm408_vm13, %v490_v26, %v489_v50  ;;  %v571_v31 = vadd.s32 536870912, %v570_v16  ;;  %v728_v7 = vadd.s32 1, %v3051_v35  ;;  %v3785_v34 = vand.u32 3, %v499_v59 }
  0xf5   :  { %v494_v48 = vsel %vm3695_vm14, %v3574_v55, %v491_v21  ;;  %v693_v30 = vor.u32 4788187, %v692_v54  ;;  %v707_v2 = vadd.s32 3, %v703_v25  ;;  %v696_v50 = vcvt.s32.f32 %v689_v13 }
  0xf6   :  { %3251 = vcosq.f32 %v494_v48  ;;  %v3787_v20 = vshrl.u32 %v571_v31, 30  ;;  %vm729_vm8 = vcmp.gt.s32.totalorder %v728_v7, 0  ;;  %v726_v32 = vor.u32 8388608, %v725_v62 }
  0xf7   :  { %3253 = vsinq.f32 %v494_v48  ;;  %v694_v29 = vand.u32 2147483647, %v693_v30  ;;  %v730_v22 = vsel %vm729_vm8, %v728_v7, 0  ;;  %v336_v14 = vmul.f32 %v3562_v38, %v249_v41 }
  0xf8   :  { %v573_v10 = vshll.u32 %v3787_v20, 30  ;;  %v732_v40 = vand.u32 31, %v730_v22  ;;  %v826_v43 = vshrl.u32 %v825_v33, 23  ;;  %v3791_v9 = vand.u32 3, %v707_v2 }
  0xf9   :  { %v697_v26 = vmul.f32 %v696_v50, %v694_v29  ;;  %vm505_vm9 = vcmp.eq.s32.totalorder %v3785_v34, 2  ;;  %v3797_v8 = vadd.s32 %v3754_v28, %v3750_v19  ;;  %v3799_v61 = vshll.u32 %v726_v32, 8 }
  0xfa   :  { %v3793_v47 = vsub.s32 %v570_v16, %v573_v10  ;;  %v733_v59 = vsub.s32 32, %v732_v40  ;;  %vm502_vm10 = vcmp.eq.s32.totalorder %v3785_v34, 0  ;;  %v596_v35 = vsub.s32 4, %v3787_v20 }
  0xfb   :  { %v698_v1 = vxor.u32 2147483648, %v697_v26  ;;  %v3805_v48 = vshrl.u32 %v730_v22, 5  ;;  %v3808_v16 = vadd.f32 %v336_v14, %v3480_v39  ;;  %vm3006_vm11 = vcmask 523264  }
  0xfc   :  { %v576_v25 = vsub.s32 0, %v3793_v47  ;;  %vm501_vm12 = vcmp.lt.s32.totalorder %v3785_v34, 2  ;;  %v736_v28 = vshrl.u32 %v5663_v44, %v733_v59  ;;  %v5673_v13 = vmov 2102212464  }
  0xfd   :  { %v699_v19 = vsel %vm616_vm3, %v698_v1, %v697_v26  ;;  %v742_v54 = vshrl.u32 %v5673_v13, %v733_v59  ;;  %v3055_v62 = vadd.s32 4294967169, %v826_v43  ;;  %vm498_vm13 = vweird.f32 %v3574_v55 }
  0xfe   :  { %v702_v31 = vsel %vm3740_vm5, %v3584_v3, %v699_v19  ;;  %v3044_v39 = vmin.u32 %v576_v25, %v3793_v47  ;;  %v735_v7 = vshll.u32 %v5665_v42, %v732_v40  ;;  %v5674_v30 = vmov 2131351028  }
  0xff   :  { %v739_v33 = vshrl.u32 %v5674_v30, %v733_v59  ;;  %3255 = vcosq.f32 %v702_v31  ;;  %v738_v41 = vshll.u32 %v5663_v44, %v732_v40  ;;  %v741_v2 = vshll.u32 %v5674_v30, %v732_v40 }
 0x100   :  { %v745_v29 = vshrl.u32 %v3360_v56, %v733_v59  ;;  %3257 = vsinq.f32 %v702_v31  ;;  %v578_v50 = vclz %v3044_v39  ;;  %v734_v32 = vshrl.u32 %v5665_v42, %v733_v59 }
 0x101   :  { %v744_v60 = vshll.u32 %v5673_v13, %v732_v40  ;;  %vm512_vm14 = vcmp.lt.s32.totalorder %v3586_v4, 0  ;;  %v737_v10 = vor.u32 %v736_v28, %v735_v7  ;;  %v743_v14 = vor.u32 %v742_v54, %v741_v2 }
 0x102   :  { %v747_v26 = vshll.u32 %v3360_v56, %v732_v40  ;;  %v5675_v43 = vmov 1326507024   ;;  %v3045_v27 = vadd.s32 4294967294, %v578_v50  ;;  %v740_v44 = vor.u32 %v739_v33, %v738_v41 }
 0x103   :  { %v3252_v22 = vpop.eup %3251  ;;  %v748_v1 = vshrl.u32 %v5675_v43, %v733_v59  ;;  %v746_v21 = vor.u32 %v745_v29, %v744_v60  ;;  %vm750_vm15 = vcmp.lt.s32.totalorder %v3805_v48, 1  ;;  %vm751_vm0 = vcmp.lt.s32.totalorder %v3805_v48, 2 }
 0x104   :  { %v3254_v25 = vpop.eup %3253  ;;  %v506_v19 = vxor.u32 2147483648, %v3252_v22  ;;  %v5676_v28 = vand.u32 2147483647, %v3586_v4  ;;  %vm3046_vm2 = vcmp.lt.s32.totalorder %v3045_v27, 0  ;;  %vm752_vm3 = vcmp.lt.s32.totalorder %v3805_v48, 3 }
 0x105   :  { %v503_v31 = vxor.u32 2147483648, %v3254_v25  ;;  %v749_v39 = vor.u32 %v748_v1, %v747_v26  ;;  %vm753_vm4 = vcmp.lt.s32.totalorder %v3805_v48, 4  ;;  %v581_v54 = vsel %vm3046_vm2, 0, %v3045_v27 }
 0x106   :  { %v507_v42 = vsel %vm505_vm9, %v506_v19, %v3254_v25  ;;  %vm3836_vm1 = vcmp.le.f32.partialorder %v5676_v28, 0.7853982  ;;  %v754_v7 = vsel %vm750_vm15, %v734_v32, %v737_v10  ;;  %v755_v33 = vsel %vm753_vm4, %v743_v14, 2102212464 }
 0x107   :  { %v504_v59 = vsel %vm502_vm10, %v3252_v22, %v503_v31  ;;  %vm713_vm5 = vcmp.eq.s32.totalorder %v3791_v9, 2  ;;  %v582_v2 = vsub.s32 32, %v581_v54  ;;  %v586_v29 = vsub.s32 4294967266, %v581_v54 }
 0x108   :  { %v508_v41 = vsel %vm501_vm12, %v504_v59, %v507_v42  ;;  %v758_v50 = vsel %vm750_vm15, %v737_v10, %v740_v44  ;;  %vm710_vm6 = vcmp.eq.s32.totalorder %v3791_v9, 0  ;;  %v583_v27 = vshll.u32 %v3793_v47, %v581_v54 }
 0x109   :  { %v509_v60 = vsel %vm498_vm13, nan, %v508_v41  ;;  %v759_v32 = vsel %vm753_vm4, %v746_v21, 920167782  ;;  %v762_v42 = vsel %vm750_vm15, %v740_v44, %v743_v14  ;;  %vm709_vm7 = vcmp.lt.s32.totalorder %v3791_v9, 2 }
 0x10a   :  { %3007 = vst.msk [vmem:[%s5652_s3] sm:$0xff] %vm3006_vm11, %v509_v60  ;;  %v584_v55 = vshrl.u32 %v3797_v8, %v582_v2  ;;  %v587_v34 = vadd.s32 127, %v586_v29  ;;  %v760_v22 = vsel %vm752_vm3, %v743_v14, %v759_v32  ;;  %v763_v47 = vsel %vm753_vm4, %v749_v39, 1326507024 }
 0x10b   :  { %vm706_vm8 = vweird.f32 %v3584_v3  ;;  %v756_v10 = vsel %vm752_vm3, %v740_v44, %v755_v33  ;;  %v761_v26 = vsel %vm751_vm0, %v758_v50, %v760_v22  ;;  %v764_v1 = vsel %vm752_vm3, %v746_v21, %v763_v47 }
 0x10c   :  { %v832_v25 = vadd.s32 1, %v3055_v62  ;;  %v585_v8 = vor.u32 %v584_v55, %v583_v27  ;;  %v588_v19 = vshll.u32 %v587_v34, 23  ;;  %v597_v14 = vsel %vm512_vm14, %v596_v35, %v3787_v20  ;;  %v3256_v21 = vpop.eup %3255 }
 0x10d   :  { %v765_v31 = vsel %vm751_vm0, %v762_v42, %v764_v1  ;;  %v3890_v28 = vmul.u32.u64.low %v3799_v61, %v761_v26  ;;  %v3891_v59 = vmul.u32.u64.high %v3799_v61, %v761_v26, %v3890_v28  ;;  %v757_v54 = vsel %vm751_vm0, %v754_v7, %v756_v10  ;;  %v3258_v35 = vpop.eup %3257 }
 0x10e   :  { %v3886_v44 = vmul.u32.u64.low %v3799_v61, %v765_v31  ;;  %v3887_v39 = vmul.u32.u64.high %v3799_v61, %v765_v31, %v3886_v44  ;;  %v589_v62 = vor.u32 4788187, %v588_v19  ;;  %v5679_v33 = vand.u32 2147483647, %v3771_v53 }
 0x10f   :  { %vm833_vm9 = vcmp.gt.s32.totalorder %v832_v25, 0  ;;  %v714_v41 = vxor.u32 2147483648, %v3256_v21  ;;  %v599_v2 = vsel %vm3836_vm1, 0, %v597_v14  ;;  %v3903_v50 = vmul.f32 30.0, %v3808_v16 }
 0x110   :  { %v3898_v20 = vand.u32 8388607, %v5679_v33  ;;  %v834_v29 = vsel %vm833_vm9, %v832_v25, 0  ;;  %v711_v60 = vxor.u32 2147483648, %v3258_v35  ;;  %v590_v27 = vand.u32 2147483647, %v589_v62 }
 0x111   :  { %v592_v32 = vcvt.s32.f32 %v585_v8  ;;  %v836_v42 = vand.u32 31, %v834_v29  ;;  %v715_v48 = vsel %vm713_vm5, %v714_v41, %v3258_v35  ;;  %v773_v7 = vmul.u32 %v3799_v61, %v757_v54 }
 0x112   :  { %vm775_vm10 = vc.u32 %v3887_v39, %v3890_v28  ;;  %v776_v55 = vadd.s32 1, %v3891_v59  ;;  %v712_v34 = vsel %vm710_vm6, %v3256_v21, %v711_v60  ;;  %v3913_v16 = vshrl.u32 %v834_v29, 5 }
 0x113   :  { %v593_v22 = vmul.f32 %v592_v32, %v590_v27  ;;  %v837_v47 = vsub.s32 32, %v836_v42  ;;  %v716_v10 = vsel %vm709_vm7, %v712_v34, %v715_v48  ;;  %v5680_v1 = vmov 683565275  }
 0x114   :  { %v777_v26 = vsel %vm775_vm10, %v776_v55, %v3891_v59  ;;  %v839_v25 = vshll.u32 %v5680_v1, %v836_v42  ;;  %v5681_v61 = vmov 2475754826   ;;  %v717_v19 = vsel %vm706_vm8, nan, %v716_v10 }
 0x115   :  { %v842_v8 = vshll.u32 %v5681_v61, %v836_v42  ;;  %v594_v14 = vxor.u32 2147483648, %v593_v22  ;;  %v778_v31 = vadd.s32 %v777_v26, %v773_v7  ;;  %v845_v44 = vshll.u32 %v5674_v30, %v836_v42  ;;  %3009 = vst.msk [vmem:[%s5652_s3 + $0x10] sm:$0xff] %vm3006_vm11, %v717_v19 }
 0x116   :  { %v840_v9 = vshrl.u32 %v5681_v61, %v837_v47  ;;  %v843_v59 = vshrl.u32 %v5674_v30, %v837_v47  ;;  %v846_v21 = vshrl.u32 %v5673_v13, %v837_v47  ;;  %v848_v62 = vshll.u32 %v5673_v13, %v836_v42 }
 0x117   :  { %v595_v3 = vsel %vm512_vm14, %v594_v14, %v593_v22  ;;  %v779_v54 = vadd.s32 536870912, %v778_v31  ;;  %v849_v33 = vshrl.u32 %v3360_v56, %v837_v47  ;;  %v851_v35 = vshll.u32 %v3360_v56, %v836_v42 }
 0x118   :  { %v598_v41 = vsel %vm3836_vm1, %v3586_v4, %v595_v3  ;;  %v841_v29 = vor.u32 %v840_v9, %v839_v25  ;;  %v844_v60 = vor.u32 %v843_v59, %v842_v8  ;;  %v847_v27 = vor.u32 %v846_v21, %v845_v44 }
 0x119   :  { %3259 = vcosq.f32 %v598_v41  ;;  %v3938_v32 = vshrl.u32 %v779_v54, 30  ;;  %v850_v48 = vor.u32 %v849_v33, %v848_v62  ;;  %v852_v7 = vshrl.u32 %v5675_v43, %v837_v47 }
 0x11a   :  { %3261 = vsinq.f32 %v598_v41  ;;  %v603_v55 = vadd.s32 3, %v599_v2  ;;  %v830_v34 = vor.u32 8388608, %v3898_v20  ;;  %v929_v22 = vand.u32 2139095040, %v3903_v50 }
 0x11b   :  { %v781_v42 = vshll.u32 %v3938_v32, 30  ;;  %v853_v10 = vor.u32 %v852_v7, %v851_v35  ;;  %vm854_vm12 = vcmp.lt.s32.totalorder %v3913_v16, 1  ;;  %vm857_vm13 = vcmp.lt.s32.totalorder %v3913_v16, 4 }
 0x11c   :  { %vm856_vm14 = vcmp.lt.s32.totalorder %v3913_v16, 3  ;;  %v859_v40 = vsel %vm857_vm13, %v847_v27, 2102212464  ;;  %v862_v26 = vsel %vm854_vm12, %v841_v29, %v844_v60  ;;  %v863_v2 = vsel %vm857_vm13, %v850_v48, 920167782 }
 0x11d   :  { %v3951_v25 = vsub.s32 %v778_v31, %v781_v42  ;;  %v838_v20 = vshrl.u32 %v5680_v1, %v837_v47  ;;  %vm855_vm15 = vcmp.lt.s32.totalorder %v3913_v16, 2  ;;  %v864_v8 = vsel %vm856_vm14, %v847_v27, %v863_v2 }
 0x11e   :  { %v604_v19 = vand.u32 3, %v603_v55  ;;  %v865_v14 = vsel %vm855_vm15, %v862_v26, %v864_v8  ;;  %v866_v44 = vsel %vm854_vm12, %v844_v60, %v847_v27  ;;  %v870_v9 = vshll.u32 %v830_v34, 8 }
 0x11f   :  { %v784_v59 = vsub.s32 0, %v3951_v25  ;;  %v858_v21 = vsel %vm854_vm12, %v838_v20, %v841_v29  ;;  %v860_v31 = vsel %vm856_vm14, %v844_v60, %v859_v40  ;;  %v867_v47 = vsel %vm857_vm13, %v853_v10, 1326507024  ;;  %v253_v29 = vpop.permute.xlu0 %252 }
 0x120   :  { %v868_v62 = vsel %vm856_vm14, %v850_v48, %v867_v47  ;;  %v3966_v3 = vmul.u32.u64.low %v870_v9, %v865_v14  ;;  %v3967_v54 = vmul.u32.u64.high %v870_v9, %v865_v14, %v3966_v3  ;;  %v930_v33 = vshrl.u32 %v929_v22, 23 }
 0x121   :  { %v3052_v35 = vmin.u32 %v784_v59, %v3951_v25  ;;  %v869_v41 = vsel %vm855_vm15, %v866_v44, %v868_v62  ;;  %vm602_vm0 = vweird.f32 %v3586_v4  ;;  %vm720_vm1 = vcmp.lt.s32.totalorder %v3681_v15, 0 }
 0x122   :  { %v3973_v27 = vmul.u32.u64.low %v870_v9, %v869_v41  ;;  %v3974_v7 = vmul.u32.u64.high %v870_v9, %v869_v41, %v3973_v27  ;;  %v3059_v60 = vadd.s32 4294967169, %v930_v33  ;;  %v861_v55 = vsel %vm855_vm15, %v858_v21, %v860_v31 }
 0x123   :  { %v786_v48 = vclz %v3052_v35  ;;  %vm605_vm2 = vcmp.lt.s32.totalorder %v604_v19, 2  ;;  %v880_v34 = vadd.s32 1, %v3967_v54  ;;  %v337_v42 = vmul.f32 %v3562_v38, %v253_v29 }
 0x124   :  { %v936_v22 = vadd.s32 1, %v3059_v60  ;;  %vm606_vm3 = vcmp.eq.s32.totalorder %v604_v19, 0  ;;  %vm609_vm4 = vcmp.eq.s32.totalorder %v604_v19, 2  ;;  %v804_v40 = vsub.s32 4, %v3938_v32 }
 0x125   :  { %v3053_v10 = vadd.s32 4294967294, %v786_v48  ;;  %v877_v2 = vmul.u32 %v870_v9, %v861_v55  ;;  %vm879_vm5 = vc.u32 %v3974_v7, %v3966_v3  ;;  %v926_v20 = vand.u32 2147483647, %v3903_v50 }
 0x126   :  { %v3260_v26 = vpop.eup %3259  ;;  %vm937_vm6 = vcmp.gt.s32.totalorder %v936_v22, 0  ;;  %v881_v14 = vsel %vm879_vm5, %v880_v34, %v3967_v54  ;;  %v774_v59 = vadd.s32 %v3890_v28, %v3887_v39  ;;  %v3993_v33 = vsel %vm720_vm1, %v804_v40, %v3938_v32 }
 0x127   :  { %v3262_v16 = vpop.eup %3261  ;;  %v610_v8 = vxor.u32 2147483648, %v3260_v26  ;;  %vm3054_vm7 = vcmp.lt.s32.totalorder %v3053_v10, 0  ;;  %v938_v44 = vsel %vm937_vm6, %v936_v22, 0  ;;  %v882_v31 = vadd.s32 %v881_v14, %v877_v2 }
 0x128   :  { %v607_v38 = vxor.u32 2147483648, %v3262_v16  ;;  %v789_v21 = vsel %vm3054_vm7, 0, %v3053_v10  ;;  %v933_v54 = vand.u32 8388607, %v926_v20  ;;  %v940_v29 = vand.u32 31, %v938_v44 }
 0x129   :  { %v611_v9 = vsel %vm609_vm4, %v610_v8, %v3262_v16  ;;  %v790_v47 = vsub.s32 32, %v789_v21  ;;  %v794_v62 = vsub.s32 4294967266, %v789_v21  ;;  %v883_v41 = vadd.s32 536870912, %v882_v31 }
 0x12a   :  { %v608_v35 = vsel %vm606_vm3, %v3260_v26, %v607_v38  ;;  %v791_v28 = vshll.u32 %v3951_v25, %v789_v21  ;;  %v5682_v55 = vand.u32 2147483647, %v3681_v15  ;;  %v941_v22 = vsub.s32 32, %v940_v29 }
 0x12b   :  { %v612_v39 = vsel %vm605_vm2, %v608_v35, %v611_v9  ;;  %v792_v27 = vshrl.u32 %v774_v59, %v790_v47  ;;  %v795_v60 = vadd.s32 127, %v794_v62  ;;  %v4008_v34 = vshrl.u32 %v883_v41, 30  ;;  %v257_v62 = vpop.permute.xlu1 %256 }
 0x12c   :  { %v613_v48 = vsel %vm602_vm0, nan, %v612_v39  ;;  %vm4004_vm8 = vcmp.le.f32.partialorder %v5682_v55, 0.7853982  ;;  %v934_v40 = vor.u32 8388608, %v933_v54  ;;  %v944_v26 = vshrl.u32 %v5681_v61, %v941_v22 }
 0x12d   :  { %3008 = vst.msk [vmem:[%s5652_s3 + $0x8] sm:$0xff] %vm3006_vm11, %v613_v48  ;;  %v793_v25 = vor.u32 %v792_v27, %v791_v28  ;;  %v796_v19 = vshll.u32 %v795_v60, 23  ;;  %v807_v4 = vsel %vm4004_vm8, 0, %v3993_v33  ;;  %v885_v10 = vshll.u32 %v4008_v34, 30  ;;  %v4035_v48 = vld [vmem:[%s5650_s1 + $0x1] ss:$0 sm:$0xff] }
 0x12e   :  { %v362_v2 = vadd.f32 %v337_v42, %v3491_v46  ;;  %v943_v8 = vshll.u32 %v5680_v1, %v940_v29  ;;  %v947_v14 = vshrl.u32 %v5674_v30, %v941_v22  ;;  %v950_v38 = vshrl.u32 %v5673_v13, %v941_v22 }
 0x12f   :  { %v797_v16 = vor.u32 4788187, %v796_v19  ;;  %v4023_v59 = vsub.s32 %v882_v31, %v885_v10  ;;  %v939_v21 = vshrl.u32 %v938_v44, 5  ;;  %v946_v9 = vshll.u32 %v5681_v61, %v940_v29 }
 0x130   :  { %v949_v47 = vshll.u32 %v5674_v30, %v940_v29  ;;  %v800_v41 = vcvt.s32.f32 %v793_v25  ;;  %v945_v54 = vor.u32 %v944_v26, %v943_v8  ;;  %v952_v46 = vshll.u32 %v5673_v13, %v940_v29 }
 0x131   :  { %v798_v35 = vand.u32 2147483647, %v797_v16  ;;  %v888_v42 = vsub.s32 0, %v4023_v59  ;;  %v948_v39 = vor.u32 %v947_v14, %v946_v9  ;;  %v953_v27 = vshrl.u32 %v3360_v56, %v941_v22 }
 0x132   :  { %v951_v28 = vor.u32 %v950_v38, %v949_v47  ;;  %v955_v31 = vshll.u32 %v3360_v56, %v940_v29  ;;  %v956_v44 = vshrl.u32 %v5675_v43, %v941_v22  ;;  %v338_v55 = vmul.f32 %v4035_v48, %v257_v62 }
 0x133   :  { %v801_v60 = vmul.f32 %v800_v41, %v798_v35  ;;  %v3056_v25 = vmin.u32 %v888_v42, %v4023_v59  ;;  %v954_v19 = vor.u32 %v953_v27, %v952_v46  ;;  %vm958_vm9 = vcmp.lt.s32.totalorder %v939_v21, 1 }
 0x134   :  { %v974_v10 = vshll.u32 %v934_v40, 8  ;;  %v942_v16 = vshrl.u32 %v5680_v1, %v941_v22  ;;  %v957_v8 = vor.u32 %v956_v44, %v955_v31  ;;  %vm961_vm10 = vcmp.lt.s32.totalorder %v939_v21, 4 }
 0x135   :  { %v802_v26 = vxor.u32 2147483648, %v801_v60  ;;  %v890_v29 = vclz %v3056_v25  ;;  %vm959_vm12 = vcmp.lt.s32.totalorder %v939_v21, 2  ;;  %v963_v14 = vsel %vm961_vm10, %v951_v28, 2102212464 }
 0x136   :  { %v966_v38 = vsel %vm958_vm9, %v945_v54, %v948_v39  ;;  %vm960_vm13 = vcmp.lt.s32.totalorder %v939_v21, 3  ;;  %v962_v47 = vsel %vm958_vm9, %v942_v16, %v945_v54  ;;  %v967_v62 = vsel %vm961_vm10, %v954_v19, 920167782 }
 0x137   :  { %v803_v9 = vsel %vm720_vm1, %v802_v26, %v801_v60  ;;  %v3057_v40 = vadd.s32 4294967294, %v890_v29  ;;  %v968_v35 = vsel %vm960_vm13, %v951_v28, %v967_v62  ;;  %v970_v41 = vsel %vm958_vm9, %v948_v39, %v951_v28 }
 0x138   :  { %v806_v22 = vsel %vm4004_vm8, %v3681_v15, %v803_v9  ;;  %v964_v46 = vsel %vm960_vm13, %v948_v39, %v963_v14  ;;  %v969_v42 = vsel %vm959_vm12, %v966_v38, %v968_v35  ;;  %v971_v27 = vsel %vm961_vm10, %v957_v8, 1326507024 }
 0x139   :  { %3263 = vcosq.f32 %v806_v22  ;;  %vm3058_vm14 = vcmp.lt.s32.totalorder %v3057_v40, 0  ;;  %v972_v60 = vsel %vm960_vm13, %v954_v19, %v971_v27  ;;  %v4052_v54 = vmul.f32 30.0, %v362_v2 }
 0x13a   :  { %3265 = vsinq.f32 %v806_v22  ;;  %v893_v31 = vsel %vm3058_vm14, 0, %v3057_v40  ;;  %v973_v44 = vsel %vm959_vm12, %v970_v41, %v972_v60  ;;  %v878_v28 = vadd.s32 %v3966_v3, %v3974_v7 }
 0x13b   :  { %v4055_v25 = vmul.u32.u64.low %v974_v10, %v969_v42  ;;  %v4056_v26 = vmul.u32.u64.high %v974_v10, %v969_v42, %v4055_v25  ;;  %v894_v39 = vsub.s32 32, %v893_v31  ;;  %v898_v16 = vsub.s32 4294967266, %v893_v31 }
 0x13c   :  { %v908_v29 = vsub.s32 4, %v4008_v34  ;;  %v4062_v8 = vmul.u32.u64.low %v974_v10, %v973_v44  ;;  %v4063_v14 = vmul.u32.u64.high %v974_v10, %v973_v44, %v4062_v8  ;;  %v1033_v2 = vand.u32 2139095040, %v4052_v54 }
 0x13d   :  { %v895_v19 = vshll.u32 %v4023_v59, %v893_v31  ;;  %v896_v38 = vshrl.u32 %v878_v28, %v894_v39  ;;  %v899_v9 = vadd.s32 127, %v898_v16  ;;  %v965_v62 = vsel %vm959_vm12, %v962_v47, %v964_v46 }
 0x13e   :  { %v811_v3 = vadd.s32 3, %v807_v4  ;;  %vm824_vm15 = vcmp.lt.s32.totalorder %v3771_v53, 0  ;;  %v984_v7 = vadd.s32 1, %v4056_v26  ;;  %v1034_v22 = vshrl.u32 %v1033_v2, 23 }
 0x13f   :  { %v897_v40 = vor.u32 %v896_v38, %v895_v19  ;;  %v900_v35 = vshll.u32 %v899_v9, 23  ;;  %v909_v59 = vsel %vm824_vm15, %v908_v29, %v4008_v34  ;;  %v363_v41 = vadd.f32 %v338_v55, %v3488_v45 }
 0x140   :  { %v981_v21 = vmul.u32 %v974_v10, %v965_v62  ;;  %vm983_vm0 = vc.u32 %v4063_v14, %v4055_v25  ;;  %v3063_v32 = vadd.s32 4294967169, %v1034_v22  ;;  %v5685_v33 = vand.u32 2147483647, %v3771_v53 }
 0x141   :  { %v901_v47 = vor.u32 4788187, %v900_v35  ;;  %v985_v46 = vsel %vm983_vm0, %v984_v7, %v4056_v26  ;;  %v1030_v45 = vand.u32 2147483647, %v4052_v54  ;;  %v812_v10 = vand.u32 3, %v811_v3 }
 0x142   :  { %vm4082_vm1 = vcmp.le.f32.partialorder %v5685_v33, 0.7853982  ;;  %v986_v34 = vadd.s32 %v985_v46, %v981_v21  ;;  %v1040_v55 = vadd.s32 1, %v3063_v32  ;;  %v904_v60 = vcvt.s32.f32 %v897_v40 }
 0x143   :  { %v911_v42 = vsel %vm4082_vm1, 0, %v909_v59  ;;  %v902_v27 = vand.u32 2147483647, %v901_v47  ;;  %v4090_v31 = vmul.f32 30.0, %v363_v41  ;;  %vm810_vm3 = vweird.f32 %v3681_v15 }
 0x144   :  { %v987_v44 = vadd.s32 536870912, %v986_v34  ;;  %vm1041_vm2 = vcmp.gt.s32.totalorder %v1040_v55, 0  ;;  %v915_v16 = vadd.s32 3, %v911_v42  ;;  %v1037_v19 = vand.u32 8388607, %v1030_v45 }
 0x145   :  { %v905_v39 = vmul.f32 %v904_v60, %v902_v27  ;;  %v1042_v26 = vsel %vm1041_vm2, %v1040_v55, 0  ;;  %vm817_vm4 = vcmp.eq.s32.totalorder %v812_v10, 2  ;;  %v1137_v3 = vand.u32 2139095040, %v4090_v31 }
 0x146   :  { %v3264_v28 = vpop.eup %3263  ;;  %v4093_v2 = vshrl.u32 %v987_v44, 30  ;;  %v1044_v38 = vand.u32 31, %v1042_v26  ;;  %vm814_vm5 = vcmp.eq.s32.totalorder %v812_v10, 0  ;;  %vm813_vm6 = vcmp.lt.s32.totalorder %v812_v10, 2 }
 0x147   :  { %v3266_v29 = vpop.eup %3265  ;;  %v818_v8 = vxor.u32 2147483648, %v3264_v28  ;;  %v906_v62 = vxor.u32 2147483648, %v905_v39  ;;  %v4101_v41 = vand.u32 3, %v915_v16  ;;  %v1038_v47 = vor.u32 8388608, %v1037_v19 }
 0x148   :  { %v815_v9 = vxor.u32 2147483648, %v3266_v29  ;;  %v989_v22 = vshll.u32 %v4093_v2, 30  ;;  %v1045_v40 = vsub.s32 32, %v1044_v38  ;;  %v4110_v42 = vshrl.u32 %v1042_v26, 5 }
 0x149   :  { %v819_v7 = vsel %vm817_vm4, %v818_v8, %v3266_v29  ;;  %v907_v59 = vsel %vm824_vm15, %v906_v62, %v905_v39  ;;  %v1138_v55 = vshrl.u32 %v1137_v3, 23  ;;  %v1047_v4 = vshll.u32 %v5680_v1, %v1044_v38 }
 0x14a   :  { %v816_v35 = vsel %vm814_vm5, %v3264_v28, %v815_v9  ;;  %v910_v32 = vsel %vm4082_vm1, %v3771_v53, %v907_v59  ;;  %v4106_v33 = vsub.s32 %v986_v34, %v989_v22  ;;  %v1048_v34 = vshrl.u32 %v5681_v61, %v1045_v40  ;;  %v261_v28 = vpop.permute.xlu0 %260 }
 0x14b   :  { %v820_v21 = vsel %vm813_vm6, %v816_v35, %v819_v7  ;;  %3267 = vcosq.f32 %v910_v32  ;;  %v1050_v27 = vshll.u32 %v5681_v61, %v1044_v38  ;;  %v1051_v15 = vshrl.u32 %v5674_v30, %v1045_v40 }
 0x14c   :  { %v821_v46 = vsel %vm810_vm3, nan, %v820_v21  ;;  %3269 = vsinq.f32 %v910_v32  ;;  %v992_v10 = vsub.s32 0, %v4106_v33  ;;  %v1053_v60 = vshll.u32 %v5674_v30, %v1044_v38 }
 0x14d   :  { %3010 = vst.msk [vmem:[%s5652_s3 + $0x18] sm:$0xff] %vm3006_vm11, %v821_v46  ;;  %v1054_v44 = vshrl.u32 %v5673_v13, %v1045_v40  ;;  %v1049_v16 = vor.u32 %v1048_v34, %v1047_v4  ;;  %v1056_v26 = vshll.u32 %v5673_v13, %v1044_v38  ;;  %v1057_v29 = vshrl.u32 %v3360_v56, %v1045_v40 }
 0x14e   :  { %v3060_v39 = vmin.u32 %v992_v10, %v4106_v33  ;;  %v1052_v8 = vor.u32 %v1051_v15, %v1050_v27  ;;  %v1059_v9 = vshll.u32 %v3360_v56, %v1044_v38  ;;  %v1060_v62 = vshrl.u32 %v5675_v43, %v1045_v40 }
 0x14f   :  { %v1055_v19 = vor.u32 %v1054_v44, %v1053_v60  ;;  %v982_v3 = vadd.s32 %v4055_v25, %v4063_v14  ;;  %v4130_v22 = vshll.u32 %v1038_v47, 8  ;;  %v339_v35 = vmul.f32 %v4035_v48, %v261_v28 }
 0x150   :  { %v994_v7 = vclz %v3060_v39  ;;  %v1046_v59 = vshrl.u32 %v5680_v1, %v1045_v40  ;;  %v1058_v21 = vor.u32 %v1057_v29, %v1056_v26  ;;  %v1061_v32 = vor.u32 %v1060_v62, %v1059_v9 }
 0x151   :  { %v3067_v46 = vadd.s32 4294967169, %v1138_v55  ;;  %vm921_vm7 = vcmp.eq.s32.totalorder %v4101_v41, 2  ;;  %vm1062_vm8 = vcmp.lt.s32.totalorder %v4110_v42, 1  ;;  %vm1064_vm9 = vcmp.lt.s32.totalorder %v4110_v42, 3 }
 0x152   :  { %v3061_v10 = vadd.s32 4294967294, %v994_v7  ;;  %vm1065_vm10 = vcmp.lt.s32.totalorder %v4110_v42, 4  ;;  %vm918_vm12 = vcmp.eq.s32.totalorder %v4101_v41, 0  ;;  %v1070_v14 = vsel %vm1062_vm8, %v1049_v16, %v1052_v8 }
 0x153   :  { %v1067_v25 = vsel %vm1065_vm10, %v1055_v19, 2102212464  ;;  %v1071_v38 = vsel %vm1065_vm10, %v1058_v21, 920167782  ;;  %v1074_v40 = vsel %vm1062_vm8, %v1052_v8, %v1055_v19  ;;  %vm917_vm13 = vcmp.lt.s32.totalorder %v4101_v41, 2 }
 0x154   :  { %vm928_vm14 = vcmp.lt.s32.totalorder %v3903_v50, 0  ;;  %vm3062_vm15 = vcmp.lt.s32.totalorder %v3061_v10, 0  ;;  %vm1063_vm0 = vcmp.lt.s32.totalorder %v4110_v42, 2  ;;  %v1072_v47 = vsel %vm1064_vm9, %v1055_v19, %v1071_v38 }
 0x155   :  { %v1075_v55 = vsel %vm1065_vm10, %v1061_v32, 1326507024  ;;  %vm914_vm1 = vweird.f32 %v3771_v53  ;;  %v997_v4 = vsel %vm3062_vm15, 0, %v3061_v10  ;;  %v1066_v34 = vsel %vm1062_vm8, %v1046_v59, %v1049_v16 }
 0x156   :  { %v1073_v27 = vsel %vm1063_vm0, %v1070_v14, %v1072_v47  ;;  %v1076_v15 = vsel %vm1064_vm9, %v1058_v21, %v1075_v55  ;;  %v998_v60 = vsub.s32 32, %v997_v4  ;;  %v1002_v44 = vsub.s32 4294967266, %v997_v4 }
 0x157   :  { %v1068_v28 = vsel %vm1064_vm9, %v1052_v8, %v1067_v25  ;;  %v1077_v39 = vsel %vm1063_vm0, %v1074_v40, %v1076_v15  ;;  %v4164_v16 = vmul.u32.u64.low %v4130_v22, %v1073_v27  ;;  %v4165_v19 = vmul.u32.u64.high %v4130_v22, %v1073_v27, %v4164_v16 }
 0x158   :  { %v4160_v26 = vmul.u32.u64.low %v4130_v22, %v1077_v39  ;;  %v4161_v29 = vmul.u32.u64.high %v4130_v22, %v1077_v39, %v4160_v26  ;;  %v3268_v9 = vpop.eup %3267  ;;  %v999_v62 = vshll.u32 %v4106_v33, %v997_v4  ;;  %v1000_v7 = vshrl.u32 %v982_v3, %v998_v60 }
 0x159   :  { %v1003_v59 = vadd.s32 127, %v1002_v44  ;;  %v1144_v21 = vadd.s32 1, %v3067_v46  ;;  %v3270_v32 = vpop.eup %3269  ;;  %v922_v8 = vxor.u32 2147483648, %v3268_v9  ;;  %v1012_v10 = vsub.s32 4, %v4093_v2 }
 0x15a   :  { %v1069_v25 = vsel %vm1063_vm0, %v1066_v34, %v1068_v28  ;;  %v364_v14 = vadd.f32 %v339_v35, %v3499_v52  ;;  %v919_v38 = vxor.u32 2147483648, %v3270_v32  ;;  %v1001_v40 = vor.u32 %v1000_v7, %v999_v62 }
 0x15b   :  { %v1004_v47 = vshll.u32 %v1003_v59, 23  ;;  %vm1145_vm2 = vcmp.gt.s32.totalorder %v1144_v21, 0  ;;  %v923_v55 = vsel %vm921_vm7, %v922_v8, %v3270_v32  ;;  %vm1087_vm3 = vc.u32 %v4161_v29, %v4164_v16 }
 0x15c   :  { %v1088_v33 = vadd.s32 1, %v4165_v19  ;;  %v1134_v3 = vand.u32 2147483647, %v4090_v31  ;;  %v920_v42 = vsel %vm918_vm12, %v3268_v9, %v919_v38  ;;  %v1085_v52 = vmul.u32 %v4130_v22, %v1069_v25 }
 0x15d   :  { %v1005_v46 = vor.u32 4788187, %v1004_v47  ;;  %v1146_v35 = vsel %vm1145_vm2, %v1144_v21, 0  ;;  %v924_v4 = vsel %vm917_vm13, %v920_v42, %v923_v55  ;;  %v1013_v34 = vsel %vm928_vm14, %v1012_v10, %v4093_v2 }
 0x15e   :  { %v1089_v27 = vsel %vm1087_vm3, %v1088_v33, %v4165_v19  ;;  %v1148_v15 = vand.u32 31, %v1146_v35  ;;  %v925_v60 = vsel %vm914_vm1, nan, %v924_v4  ;;  %v1008_v28 = vcvt.s32.f32 %v1001_v40 }
 0x15f   :  { %v1006_v44 = vand.u32 2147483647, %v1005_v46  ;;  %v1090_v39 = vadd.s32 %v1089_v27, %v1085_v52  ;;  %3011 = vst.msk [vmem:[%s5652_s3 + $0x20] sm:$0xff] %vm3006_vm11, %v925_v60  ;;  %vm4196_vm4 = vcmp.le.f32.partialorder %v926_v20, 0.7853982  ;;  %v4202_v53 = vmul.f32 30.0, %v364_v14 }
 0x160   :  { %v1141_v2 = vand.u32 8388607, %v1134_v3  ;;  %v1149_v22 = vsub.s32 32, %v1148_v15  ;;  %v1015_v19 = vsel %vm4196_vm4, 0, %v1013_v34  ;;  %v1151_v62 = vshll.u32 %v5680_v1, %v1148_v15 }
 0x161   :  { %v1009_v26 = vmul.f32 %v1008_v28, %v1006_v44  ;;  %v1091_v9 = vadd.s32 536870912, %v1090_v39  ;;  %v1154_v20 = vshll.u32 %v5681_v61, %v1148_v15  ;;  %v1147_v14 = vshrl.u32 %v1146_v35, 5 }
 0x162   :  { %v1152_v7 = vshrl.u32 %v5681_v61, %v1149_v22  ;;  %v1155_v59 = vshrl.u32 %v5674_v30, %v1149_v22  ;;  %v1158_v21 = vshrl.u32 %v5673_v13, %v1149_v22  ;;  %v1161_v10 = vshrl.u32 %v3360_v56, %v1149_v22 }
 0x163   :  { %v1010_v32 = vxor.u32 2147483648, %v1009_v26  ;;  %v1092_v8 = vshrl.u32 %v1091_v9, 30  ;;  %v1164_v25 = vshrl.u32 %v5675_v43, %v1149_v22  ;;  %v1157_v38 = vshll.u32 %v5674_v30, %v1148_v15 }
 0x164   :  { %v1160_v40 = vshll.u32 %v5673_v13, %v1148_v15  ;;  %v1163_v47 = vshll.u32 %v3360_v56, %v1148_v15  ;;  %v1153_v42 = vor.u32 %v1152_v7, %v1151_v62  ;;  %v1156_v46 = vor.u32 %v1155_v59, %v1154_v20 }
 0x165   :  { %v1011_v55 = vsel %vm928_vm14, %v1010_v32, %v1009_v26  ;;  %v1093_v33 = vshll.u32 %v1092_v8, 30  ;;  %v1159_v4 = vor.u32 %v1158_v21, %v1157_v38  ;;  %v1019_v35 = vadd.s32 3, %v1015_v19 }
 0x166   :  { %v1014_v52 = vsel %vm4196_vm4, %v3903_v50, %v1011_v55  ;;  %v1162_v34 = vor.u32 %v1161_v10, %v1160_v40  ;;  %v1165_v27 = vor.u32 %v1164_v25, %v1163_v47  ;;  %v1142_v44 = vor.u32 8388608, %v1141_v2  ;;  %v265_v10 = vpop.permute.xlu1 %264 }
 0x167   :  { %3271 = vcosq.f32 %v1014_v52  ;;  %v4221_v60 = vsub.s32 %v1090_v39, %v1093_v33  ;;  %v1150_v15 = vshrl.u32 %v5680_v1, %v1149_v22  ;;  %vm1166_vm5 = vcmp.lt.s32.totalorder %v1147_v14, 1 }
 0x168   :  { %3273 = vsinq.f32 %v1014_v52  ;;  %v1241_v28 = vand.u32 2139095040, %v4202_v53  ;;  %vm1168_vm6 = vcmp.lt.s32.totalorder %v1147_v14, 3  ;;  %vm1169_vm7 = vcmp.lt.s32.totalorder %v1147_v14, 4 }
 0x169   :  { %v1096_v26 = vsub.s32 0, %v4221_v60  ;;  %v1174_v41 = vsel %vm1166_vm5, %v1153_v42, %v1156_v46  ;;  %v1171_v9 = vsel %vm1169_vm7, %v1159_v4, 2102212464  ;;  %v1175_v62 = vsel %vm1169_vm7, %v1162_v34, 920167782 }
 0x16a   :  { %v1178_v7 = vsel %vm1166_vm5, %v1156_v46, %v1159_v4  ;;  %v1179_v19 = vsel %vm1169_vm7, %v1165_v27, 1326507024  ;;  %vm1167_vm8 = vcmp.lt.s32.totalorder %v1147_v14, 2  ;;  %v1176_v2 = vsel %vm1168_vm6, %v1159_v4, %v1175_v62 }
 0x16b   :  { %v3064_v39 = vmin.u32 %v1096_v26, %v4221_v60  ;;  %v1180_v22 = vsel %vm1168_vm6, %v1162_v34, %v1179_v19  ;;  %v1177_v20 = vsel %vm1167_vm8, %v1174_v41, %v1176_v2  ;;  %v1182_v21 = vshll.u32 %v1142_v44, 8 }
 0x16c   :  { %v1181_v59 = vsel %vm1167_vm8, %v1178_v7, %v1180_v22  ;;  %v1242_v32 = vshrl.u32 %v1241_v28, 23  ;;  %v1116_v38 = vsub.s32 4, %v1092_v8  ;;  %v1170_v40 = vsel %vm1166_vm5, %v1150_v15, %v1153_v42  ;;  %v269_v28 = vpop.permute.xlu0 %268 }
 0x16d   :  { %v1098_v25 = vclz %v3064_v39  ;;  %v1172_v47 = vsel %vm1168_vm6, %v1156_v46, %v1171_v9  ;;  %v4235_v55 = vmul.u32.u64.low %v1182_v21, %v1181_v59  ;;  %v4236_v33 = vmul.u32.u64.high %v1182_v21, %v1181_v59, %v4235_v55 }
 0x16e   :  { %v4238_v52 = vmul.u32.u64.low %v1182_v21, %v1177_v20  ;;  %v4239_v4 = vmul.u32.u64.high %v1182_v21, %v1177_v20, %v4238_v52  ;;  %v3071_v27 = vadd.s32 4294967169, %v1242_v32  ;;  %v340_v26 = vmul.f32 %v4035_v48, %v265_v10 }
 0x16f   :  { %v3065_v34 = vadd.s32 4294967294, %v1098_v25  ;;  %v1020_v44 = vand.u32 3, %v1019_v35  ;;  %vm4245_vm9 = vcmp.le.f32.partialorder %v1030_v45, 0.7853982  ;;  %vm1032_vm10 = vcmp.lt.s32.totalorder %v4052_v54, 0 }
 0x170   :  { %v1173_v42 = vsel %vm1167_vm8, %v1170_v40, %v1172_v47  ;;  %v1086_v46 = vadd.s32 %v4164_v16, %v4161_v29  ;;  %v1238_v15 = vand.u32 2147483647, %v4202_v53  ;;  %v1248_v41 = vadd.s32 1, %v3071_v27 }
 0x171   :  { %vm3066_vm12 = vcmp.lt.s32.totalorder %v3065_v34, 0  ;;  %v1117_v35 = vsel %vm1032_vm10, %v1116_v38, %v1092_v8  ;;  %vm1191_vm13 = vc.u32 %v4236_v33, %v4238_v52  ;;  %v1192_v45 = vadd.s32 1, %v4239_v4 }
 0x172   :  { %v1101_v9 = vsel %vm3066_vm12, 0, %v3065_v34  ;;  %v1189_v14 = vmul.u32 %v1182_v21, %v1173_v42  ;;  %vm1249_vm14 = vcmp.gt.s32.totalorder %v1248_v41, 0  ;;  %vm1022_vm15 = vcmp.eq.s32.totalorder %v1020_v44, 0 }
 0x173   :  { %v1102_v62 = vsub.s32 32, %v1101_v9  ;;  %v1106_v7 = vsub.s32 4294967266, %v1101_v9  ;;  %v1103_v29 = vshll.u32 %v4221_v60, %v1101_v9  ;;  %v1193_v16 = vsel %vm1191_vm13, %v1192_v45, %v4239_v4 }
 0x174   :  { %v3272_v19 = vpop.eup %3271  ;;  %v1250_v39 = vsel %vm1249_vm14, %v1248_v41, 0  ;;  %v1194_v59 = vadd.s32 %v1193_v16, %v1189_v14  ;;  %vm1025_vm0 = vcmp.eq.s32.totalorder %v1020_v44, 2  ;;  %v1119_v10 = vsel %vm4245_vm9, 0, %v1117_v35 }
 0x175   :  { %v3274_v2 = vpop.eup %3273  ;;  %v1026_v22 = vxor.u32 2147483648, %v3272_v19  ;;  %v1104_v20 = vshrl.u32 %v1086_v46, %v1102_v62  ;;  %v1107_v8 = vadd.s32 127, %v1106_v7  ;;  %v1252_v25 = vand.u32 31, %v1250_v39 }
 0x176   :  { %v1023_v32 = vxor.u32 2147483648, %v3274_v2  ;;  %v1195_v47 = vadd.s32 536870912, %v1194_v59  ;;  %vm1021_vm1 = vcmp.lt.s32.totalorder %v1020_v44, 2  ;;  %v1245_v55 = vand.u32 8388607, %v1238_v15 }
 0x177   :  { %v1027_v21 = vsel %vm1025_vm0, %v1026_v22, %v3274_v2  ;;  %v1105_v38 = vor.u32 %v1104_v20, %v1103_v29  ;;  %v1108_v40 = vshll.u32 %v1107_v8, 23  ;;  %v1253_v4 = vsub.s32 32, %v1252_v25 }
 0x178   :  { %v1024_v60 = vsel %vm1022_vm15, %v3272_v19, %v1023_v32  ;;  %vm1018_vm2 = vweird.f32 %v3903_v50  ;;  %v4267_v42 = vshrl.u32 %v1195_v47, 30  ;;  %v1123_v41 = vadd.s32 3, %v1119_v10 }
 0x179   :  { %v1028_v34 = vsel %vm1021_vm1, %v1024_v60, %v1027_v21  ;;  %v1109_v27 = vor.u32 4788187, %v1108_v40  ;;  %v1256_v9 = vshrl.u32 %v5681_v61, %v1253_v4  ;;  %v365_v35 = vadd.f32 %v340_v26, %v3496_v51 }
 0x17a   :  { %v1029_v46 = vsel %vm1018_vm2, nan, %v1028_v34  ;;  %v1112_v45 = vcvt.s32.f32 %v1105_v38  ;;  %v1197_v62 = vshll.u32 %v4267_v42, 30  ;;  %v1259_v50 = vshrl.u32 %v5674_v30, %v1253_v4 }
 0x17b   :  { %3012 = vst.msk [vmem:[%s5652_s3 + $0x28] sm:$0xff] %vm3006_vm11, %v1029_v46  ;;  %v1110_v44 = vand.u32 2147483647, %v1109_v27  ;;  %v1246_v7 = vor.u32 8388608, %v1245_v55  ;;  %v1255_v14 = vshll.u32 %v5680_v1, %v1252_v25  ;;  %v1258_v19 = vshll.u32 %v5681_v61, %v1252_v25 }
 0x17c   :  { %v1262_v29 = vshrl.u32 %v5673_v13, %v1253_v4  ;;  %v4280_v51 = vsub.s32 %v1194_v59, %v1197_v62  ;;  %v1261_v26 = vshll.u32 %v5674_v30, %v1252_v25  ;;  %v1265_v2 = vshrl.u32 %v3360_v56, %v1253_v4 }
 0x17d   :  { %v1113_v16 = vmul.f32 %v1112_v45, %v1110_v44  ;;  %v1251_v22 = vshrl.u32 %v1250_v39, 5  ;;  %v1257_v20 = vor.u32 %v1256_v9, %v1255_v14  ;;  %v1264_v8 = vshll.u32 %v5673_v13, %v1252_v25 }
 0x17e   :  { %v1268_v32 = vshrl.u32 %v5675_v43, %v1253_v4  ;;  %v1200_v21 = vsub.s32 0, %v4280_v51  ;;  %v1260_v38 = vor.u32 %v1259_v50, %v1258_v19  ;;  %v1263_v40 = vor.u32 %v1262_v29, %v1261_v26 }
 0x17f   :  { %v1114_v10 = vxor.u32 2147483648, %v1113_v16  ;;  %v4287_v47 = vand.u32 3, %v1123_v41  ;;  %v1266_v60 = vor.u32 %v1265_v2, %v1264_v8  ;;  %v1267_v59 = vshll.u32 %v3360_v56, %v1252_v25 }
 0x180   :  { %v3068_v39 = vmin.u32 %v1200_v21, %v4280_v51  ;;  %v1286_v34 = vshll.u32 %v1246_v7, 8  ;;  %v4293_v27 = vmul.f32 30.0, %v365_v35  ;;  %vm1270_vm3 = vcmp.lt.s32.totalorder %v1251_v22, 1 }
 0x181   :  { %v1115_v55 = vsel %vm1032_vm10, %v1114_v10, %v1113_v16  ;;  %v1269_v9 = vor.u32 %v1268_v32, %v1267_v59  ;;  %vm1273_vm4 = vcmp.lt.s32.totalorder %v1251_v22, 4  ;;  %v1278_v25 = vsel %vm1270_vm3, %v1257_v20, %v1260_v38 }
 0x182   :  { %v1118_v46 = vsel %vm4245_vm9, %v4052_v54, %v1115_v55  ;;  %v1202_v41 = vclz %v3068_v39  ;;  %v1275_v44 = vsel %vm1273_vm4, %v1263_v40, 2102212464  ;;  %v1254_v45 = vshrl.u32 %v5680_v1, %v1253_v4 }
 0x183   :  { %3275 = vcosq.f32 %v1118_v46  ;;  %vm1272_vm5 = vcmp.lt.s32.totalorder %v1251_v22, 3  ;;  %v1279_v62 = vsel %vm1273_vm4, %v1266_v60, 920167782  ;;  %vm1271_vm6 = vcmp.lt.s32.totalorder %v1251_v22, 2 }
 0x184   :  { %3277 = vsinq.f32 %v1118_v46  ;;  %v3069_v35 = vadd.s32 4294967294, %v1202_v41  ;;  %v1280_v50 = vsel %vm1272_vm5, %v1263_v40, %v1279_v62  ;;  %v1282_v7 = vsel %vm1270_vm3, %v1260_v38, %v1263_v40 }
 0x185   :  { %v1274_v14 = vsel %vm1270_vm3, %v1254_v45, %v1257_v20  ;;  %v1276_v19 = vsel %vm1272_vm5, %v1260_v38, %v1275_v44  ;;  %v1281_v29 = vsel %vm1271_vm6, %v1278_v25, %v1280_v50  ;;  %v1283_v16 = vsel %vm1273_vm4, %v1269_v9, 1326507024 }
 0x186   :  { %vm3070_vm7 = vcmp.lt.s32.totalorder %v3069_v35, 0  ;;  %v1284_v26 = vsel %vm1272_vm5, %v1266_v60, %v1283_v16  ;;  %v4303_v2 = vmul.u32.u64.low %v1286_v34, %v1281_v29  ;;  %v4304_v8 = vmul.u32.u64.high %v1286_v34, %v1281_v29, %v4303_v2 }
 0x187   :  { %v1205_v4 = vsel %vm3070_vm7, 0, %v3069_v35  ;;  %v1285_v32 = vsel %vm1271_vm6, %v1282_v7, %v1284_v26  ;;  %v1345_v10 = vand.u32 2139095040, %v4293_v27  ;;  %v341_v21 = vmul.f32 %v4035_v48, %v269_v28 }
 0x188   :  { %v1190_v20 = vadd.s32 %v4238_v52, %v4236_v33  ;;  %v1206_v38 = vsub.s32 32, %v1205_v4  ;;  %v1210_v40 = vsub.s32 4294967266, %v1205_v4  ;;  %v1220_v59 = vsub.s32 4, %v4267_v42 }
 0x189   :  { %v1277_v60 = vsel %vm1271_vm6, %v1274_v14, %v1276_v19  ;;  %v4314_v55 = vmul.u32.u64.low %v1286_v34, %v1285_v32  ;;  %v4315_v39 = vmul.u32.u64.high %v1286_v34, %v1285_v32, %v4314_v55  ;;  %v1346_v46 = vshrl.u32 %v1345_v10, 23 }
 0x18a   :  { %v1207_v9 = vshll.u32 %v4280_v51, %v1205_v4  ;;  %v1208_v41 = vshrl.u32 %v1190_v20, %v1206_v38  ;;  %v1211_v44 = vadd.s32 127, %v1210_v40  ;;  %v1296_v25 = vadd.s32 1, %v4304_v8 }
 0x18b   :  { %vm1136_vm8 = vcmp.lt.s32.totalorder %v4090_v31, 0  ;;  %v1342_v33 = vand.u32 2147483647, %v4293_v27  ;;  %v3075_v52 = vadd.s32 4294967169, %v1346_v46  ;;  %v1293_v35 = vmul.u32 %v1286_v34, %v1277_v60 }
 0x18c   :  { %v1209_v45 = vor.u32 %v1208_v41, %v1207_v9  ;;  %v1212_v62 = vshll.u32 %v1211_v44, 23  ;;  %v1221_v22 = vsel %vm1136_vm8, %v1220_v59, %v4267_v42  ;;  %vm1295_vm9 = vc.u32 %v4315_v39, %v4303_v2 }
 0x18d   :  { %v1352_v51 = vadd.s32 1, %v3075_v52  ;;  %v366_v50 = vadd.f32 %v341_v21, %v3507_v58  ;;  %vm1129_vm10 = vcmp.eq.s32.totalorder %v4287_v47, 2  ;;  %vm4330_vm12 = vcmp.le.f32.partialorder %v1134_v3, 0.7853982 }
 0x18e   :  { %v1213_v28 = vor.u32 4788187, %v1212_v62  ;;  %v1297_v14 = vsel %vm1295_vm9, %v1296_v25, %v4304_v8  ;;  %v1223_v42 = vsel %vm4330_vm12, 0, %v1221_v22  ;;  %v1349_v29 = vand.u32 8388607, %v1342_v33  ;;  %v273_v8 = vpop.permute.xlu1 %272 }
 0x18f   :  { %v1298_v34 = vadd.s32 %v1297_v14, %v1293_v35  ;;  %vm1353_vm13 = vcmp.gt.s32.totalorder %v1352_v51, 0  ;;  %v1216_v4 = vcvt.s32.f32 %v1209_v45  ;;  %v4339_v20 = vmul.f32 30.0, %v366_v50 }
 0x190   :  { %v3276_v19 = vpop.eup %3275  ;;  %v1214_v26 = vand.u32 2147483647, %v1213_v28  ;;  %v1354_v3 = vsel %vm1353_vm13, %v1352_v51, 0  ;;  %vm1122_vm14 = vweird.f32 %v4052_v54  ;;  %vm1126_vm15 = vcmp.eq.s32.totalorder %v4287_v47, 0 }
 0x191   :  { %v3278_v58 = vpop.eup %3277  ;;  %v1130_v16 = vxor.u32 2147483648, %v3276_v19  ;;  %v1299_v10 = vadd.s32 536870912, %v1298_v34  ;;  %v1356_v21 = vand.u32 31, %v1354_v3  ;;  %vm1125_vm0 = vcmp.lt.s32.totalorder %v4287_v47, 2 }
 0x192   :  { %v1127_v32 = vxor.u32 2147483648, %v3278_v58  ;;  %v1217_v40 = vmul.f32 %v1216_v4, %v1214_v26  ;;  %v1227_v41 = vadd.s32 3, %v1223_v42  ;;  %v4349_v44 = vmul.f32 %v4035_v48, %v273_v8 }
 0x193   :  { %v1131_v38 = vsel %vm1129_vm10, %v1130_v16, %v3278_v58  ;;  %v4346_v60 = vshrl.u32 %v1299_v10, 30  ;;  %v1357_v55 = vsub.s32 32, %v1356_v21  ;;  %v1350_v52 = vor.u32 8388608, %v1349_v29 }
 0x194   :  { %v1128_v59 = vsel %vm1126_vm15, %v3276_v19, %v1127_v32  ;;  %v1218_v9 = vxor.u32 2147483648, %v1217_v40  ;;  %v1449_v45 = vand.u32 2139095040, %v4339_v20  ;;  %v1359_v28 = vshll.u32 %v5680_v1, %v1356_v21 }
 0x195   :  { %v1132_v46 = vsel %vm1125_vm0, %v1128_v59, %v1131_v38  ;;  %v1301_v54 = vshll.u32 %v4346_v60, 30  ;;  %v1360_v62 = vshrl.u32 %v5681_v61, %v1357_v55  ;;  %v1363_v22 = vshrl.u32 %v5674_v30, %v1357_v55 }
 0x196   :  { %v1133_v25 = vsel %vm1122_vm14, nan, %v1132_v46  ;;  %v1219_v47 = vsel %vm1136_vm8, %v1218_v9, %v1217_v40  ;;  %v1366_v35 = vshrl.u32 %v5673_v13, %v1357_v55  ;;  %v1362_v14 = vshll.u32 %v5681_v61, %v1356_v21 }
 0x197   :  { %3013 = vst.msk [vmem:[%s5652_s3 + $0x30] sm:$0xff] %vm3006_vm11, %v1133_v25  ;;  %v1222_v51 = vsel %vm4330_vm12, %v4090_v31, %v1219_v47  ;;  %v4365_v50 = vsub.s32 %v1298_v34, %v1301_v54  ;;  %v1355_v19 = vshrl.u32 %v1354_v3, 5  ;;  %v1365_v42 = vshll.u32 %v5674_v30, %v1356_v21 }
 0x198   :  { %3279 = vcosq.f32 %v1222_v51  ;;  %v1368_v29 = vshll.u32 %v5673_v13, %v1356_v21  ;;  %v1361_v16 = vor.u32 %v1360_v62, %v1359_v28  ;;  %v1364_v26 = vor.u32 %v1363_v22, %v1362_v14 }
 0x199   :  { %3281 = vsinq.f32 %v1222_v51  ;;  %v1304_v58 = vsub.s32 0, %v4365_v50  ;;  %v1367_v4 = vor.u32 %v1366_v35, %v1365_v42  ;;  %v1369_v7 = vshrl.u32 %v3360_v56, %v1357_v55 }
 0x19a   :  { %v1371_v34 = vshll.u32 %v3360_v56, %v1356_v21  ;;  %v1372_v32 = vshrl.u32 %v5675_v43, %v1357_v55  ;;  %v4375_v10 = vand.u32 3, %v1227_v41  ;;  %v1390_v8 = vshll.u32 %v1350_v52, 8 }
 0x19b   :  { %v3072_v3 = vmin.u32 %v1304_v58, %v4365_v50  ;;  %v1450_v38 = vshrl.u32 %v1449_v45, 23  ;;  %v1358_v40 = vshrl.u32 %v5680_v1, %v1357_v55  ;;  %v1370_v59 = vor.u32 %v1369_v7, %v1368_v29 }
 0x19c   :  { %v1373_v46 = vor.u32 %v1372_v32, %v1371_v34  ;;  %vm1374_vm1 = vcmp.lt.s32.totalorder %v1355_v19, 1  ;;  %vm1375_vm2 = vcmp.lt.s32.totalorder %v1355_v19, 2  ;;  %vm1376_vm3 = vcmp.lt.s32.totalorder %v1355_v19, 3 }
 0x19d   :  { %v1306_v9 = vclz %v3072_v3  ;;  %vm1377_vm4 = vcmp.lt.s32.totalorder %v1355_v19, 4  ;;  %v1382_v54 = vsel %vm1374_vm1, %v1361_v16, %v1364_v26  ;;  %v1386_v47 = vsel %vm1374_vm1, %v1364_v26, %v1367_v4 }
 0x19e   :  { %v1379_v25 = vsel %vm1377_vm4, %v1367_v4, 2102212464  ;;  %v1383_v21 = vsel %vm1377_vm4, %v1370_v59, 920167782  ;;  %v1378_v41 = vsel %vm1374_vm1, %v1358_v40, %v1361_v16  ;;  %v1387_v35 = vsel %vm1377_vm4, %v1373_v46, 1326507024 }
 0x19f   :  { %v3073_v62 = vadd.s32 4294967294, %v1306_v9  ;;  %v1384_v22 = vsel %vm1376_vm3, %v1367_v4, %v1383_v21  ;;  %vm1240_vm5 = vcmp.lt.s32.totalorder %v4202_v53, 0  ;;  %v1380_v52 = vsel %vm1376_vm3, %v1364_v26, %v1379_v25 }
 0x1a0   :  { %v1385_v55 = vsel %vm1375_vm2, %v1382_v54, %v1384_v22  ;;  %v1388_v45 = vsel %vm1376_vm3, %v1370_v59, %v1387_v35  ;;  %v3079_v51 = vadd.s32 4294967169, %v1450_v38  ;;  %vm1229_vm6 = vcmp.lt.s32.totalorder %v4375_v10, 2 }
 0x1a1   :  { %vm3074_vm7 = vcmp.lt.s32.totalorder %v3073_v62, 0  ;;  %v1389_v28 = vsel %vm1375_vm2, %v1386_v47, %v1388_v45  ;;  %v4383_v14 = vmul.u32.u64.low %v1390_v8, %v1385_v55  ;;  %v4384_v42 = vmul.u32.u64.high %v1390_v8, %v1385_v55, %v4383_v14  ;;  %v281_v55 = vpop.permute.xlu1 %280 }
 0x1a2   :  { %vm1226_vm8 = vweird.f32 %v4090_v31  ;;  %vm1230_vm9 = vcmp.eq.s32.totalorder %v4375_v10, 0  ;;  %v1309_v29 = vsel %vm3074_vm7, 0, %v3073_v62  ;;  %vm4394_vm10 = vcmp.le.f32.partialorder %v1238_v15, 0.7853982 }
 0x1a3   :  { %v4389_v58 = vmul.u32.u64.low %v1390_v8, %v1389_v28  ;;  %v4390_v16 = vmul.u32.u64.high %v1390_v8, %v1389_v28, %v4389_v58  ;;  %v1294_v4 = vadd.s32 %v4303_v2, %v4315_v39  ;;  %v1310_v7 = vsub.s32 32, %v1309_v29 }
 0x1a4   :  { %v1314_v34 = vsub.s32 4294967266, %v1309_v29  ;;  %v1381_v32 = vsel %vm1375_vm2, %v1378_v41, %v1380_v52  ;;  %vm1233_vm12 = vcmp.eq.s32.totalorder %v4375_v10, 2  ;;  %v1324_v3 = vsub.s32 4, %v4346_v60  ;;  %v277_v41 = vpop.permute.xlu0 %276 }
 0x1a5   :  { %v1446_v38 = vand.u32 2147483647, %v4339_v20  ;;  %v1456_v40 = vadd.s32 1, %v3079_v51  ;;  %v3280_v59 = vpop.eup %3279  ;;  %v1311_v15 = vshll.u32 %v4365_v50, %v1309_v29  ;;  %v1312_v46 = vshrl.u32 %v1294_v4, %v1310_v7 }
 0x1a6   :  { %v1315_v9 = vadd.s32 127, %v1314_v34  ;;  %v1400_v25 = vadd.s32 1, %v4384_v42  ;;  %v3282_v54 = vpop.eup %3281  ;;  %v1234_v2 = vxor.u32 2147483648, %v3280_v59  ;;  %v1397_v39 = vmul.u32 %v1390_v8, %v1381_v32 }
 0x1a7   :  { %vm1399_vm13 = vc.u32 %v4390_v16, %v4383_v14  ;;  %vm1457_vm14 = vcmp.gt.s32.totalorder %v1456_v40, 0  ;;  %v1231_v19 = vxor.u32 2147483648, %v3282_v54  ;;  %v1313_v21 = vor.u32 %v1312_v46, %v1311_v15 }
 0x1a8   :  { %v1316_v47 = vshll.u32 %v1315_v9, 23  ;;  %v1401_v62 = vsel %vm1399_vm13, %v1400_v25, %v4384_v42  ;;  %v1235_v50 = vsel %vm1233_vm12, %v1234_v2, %v3282_v54  ;;  %v1458_v35 = vsel %vm1457_vm14, %v1456_v40, 0 }
 0x1a9   :  { %v1402_v22 = vadd.s32 %v1401_v62, %v1397_v39  ;;  %v367_v52 = vadd.f32 %v4349_v44, %v3504_v57  ;;  %v1232_v8 = vsel %vm1230_vm9, %v3280_v59, %v1231_v19  ;;  %v1325_v51 = vsel %vm1240_vm5, %v1324_v3, %v4346_v60 }
 0x1aa   :  { %v1317_v45 = vor.u32 4788187, %v1316_v47  ;;  %v1453_v28 = vand.u32 8388607, %v1446_v38  ;;  %v1236_v42 = vsel %vm1229_vm6, %v1232_v8, %v1235_v50  ;;  %v1460_v58 = vand.u32 31, %v1458_v35 }
 0x1ab   :  { %v1403_v29 = vadd.s32 536870912, %v1402_v22  ;;  %v4423_v4 = vmul.f32 %v4035_v48, %v277_v41  ;;  %v1237_v57 = vsel %vm1226_vm8, nan, %v1236_v42  ;;  %v1320_v7 = vcvt.s32.f32 %v1313_v21 }
 0x1ac   :  { %v1318_v44 = vand.u32 2147483647, %v1317_v45  ;;  %v4428_v34 = vmul.f32 %v4035_v48, %v281_v55  ;;  %3014 = vst.msk [vmem:[%s5652_s3 + $0x38] sm:$0xff] %vm3006_vm11, %v1237_v57  ;;  %v1327_v60 = vsel %vm4394_vm10, 0, %v1325_v51  ;;  %v1461_v32 = vsub.s32 32, %v1460_v58 }
 0x1ad   :  { %v4436_v10 = vshrl.u32 %v1403_v29, 30  ;;  %v4438_v3 = vmul.f32 30.0, %v367_v52  ;;  %v1454_v40 = vor.u32 8388608, %v1453_v28  ;;  %v1459_v59 = vshrl.u32 %v1458_v35, 5 }
 0x1ae   :  { %v1321_v31 = vmul.f32 %v1320_v7, %v1318_v44  ;;  %v1463_v15 = vshll.u32 %v5680_v1, %v1460_v58  ;;  %v1464_v46 = vshrl.u32 %v5681_v61, %v1461_v32  ;;  %v1466_v9 = vshll.u32 %v5681_v61, %v1460_v58 }
 0x1af   :  { %v1405_v48 = vshll.u32 %v4436_v10, 30  ;;  %v1469_v25 = vshll.u32 %v5674_v30, %v1460_v58  ;;  %v1467_v2 = vshrl.u32 %v5674_v30, %v1461_v32  ;;  %v1470_v39 = vshrl.u32 %v5673_v13, %v1461_v32 }
 0x1b0   :  { %v1322_v54 = vxor.u32 2147483648, %v1321_v31  ;;  %v1473_v19 = vshrl.u32 %v3360_v56, %v1461_v32  ;;  %v1472_v47 = vshll.u32 %v5673_v13, %v1460_v58  ;;  %v1475_v62 = vshll.u32 %v3360_v56, %v1460_v58 }
 0x1b1   :  { %v4448_v21 = vsub.s32 %v1402_v22, %v1405_v48  ;;  %v1476_v41 = vshrl.u32 %v5675_v43, %v1461_v32  ;;  %v1465_v35 = vor.u32 %v1464_v46, %v1463_v15  ;;  %v1468_v52 = vor.u32 %v1467_v2, %v1466_v9 }
 0x1b2   :  { %v1323_v50 = vsel %vm1240_vm5, %v1322_v54, %v1321_v31  ;;  %v1471_v55 = vor.u32 %v1470_v39, %v1469_v25  ;;  %v1331_v45 = vadd.s32 3, %v1327_v60  ;;  %v1474_v51 = vor.u32 %v1473_v19, %v1472_v47 }
 0x1b3   :  { %v1326_v8 = vsel %vm4394_vm10, %v4202_v53, %v1323_v50  ;;  %v1408_v22 = vsub.s32 0, %v4448_v21  ;;  %vm1344_vm15 = vcmp.lt.s32.totalorder %v4293_v27, 0  ;;  %v1477_v28 = vor.u32 %v1476_v41, %v1475_v62 }
 0x1b4   :  { %3283 = vcosq.f32 %v1326_v8  ;;  %vm1478_vm0 = vcmp.lt.s32.totalorder %v1459_v59, 1  ;;  %v1494_v42 = vshll.u32 %v1454_v40, 8  ;;  %v1462_v58 = vshrl.u32 %v5680_v1, %v1461_v32 }
 0x1b5   :  { %3285 = vsinq.f32 %v1326_v8  ;;  %v3076_v29 = vmin.u32 %v1408_v22, %v4448_v21  ;;  %vm1481_vm1 = vcmp.lt.s32.totalorder %v1459_v59, 4  ;;  %vm1479_vm2 = vcmp.lt.s32.totalorder %v1459_v59, 2 }
 0x1b6   :  { %v1483_v57 = vsel %vm1481_vm1, %v1471_v55, 2102212464  ;;  %v1486_v26 = vsel %vm1478_vm0, %v1465_v35, %v1468_v52  ;;  %v1487_v44 = vsel %vm1481_vm1, %v1474_v51, 920167782  ;;  %vm1480_vm3 = vcmp.lt.s32.totalorder %v1459_v59, 3 }
 0x1b7   :  { %v1410_v7 = vclz %v3076_v29  ;;  %v1482_v60 = vsel %vm1478_vm0, %v1462_v58, %v1465_v35  ;;  %v1490_v31 = vsel %vm1478_vm0, %v1468_v52, %v1471_v55  ;;  %v1484_v15 = vsel %vm1480_vm3, %v1468_v52, %v1483_v57 }
 0x1b8   :  { %v1488_v48 = vsel %vm1480_vm3, %v1471_v55, %v1487_v44  ;;  %v1491_v46 = vsel %vm1481_vm1, %v1477_v28, 1326507024  ;;  %v1553_v9 = vand.u32 2139095040, %v4438_v3  ;;  %v1428_v25 = vsub.s32 4, %v4436_v10 }
 0x1b9   :  { %v3077_v40 = vadd.s32 4294967294, %v1410_v7  ;;  %v1489_v54 = vsel %vm1479_vm2, %v1486_v26, %v1488_v48  ;;  %v1492_v32 = vsel %vm1480_vm3, %v1474_v51, %v1491_v46  ;;  %v1485_v2 = vsel %vm1479_vm2, %v1482_v60, %v1484_v15 }
 0x1ba   :  { %v1493_v39 = vsel %vm1479_vm2, %v1490_v31, %v1492_v32  ;;  %v4467_v19 = vmul.u32.u64.low %v1494_v42, %v1489_v54  ;;  %v4468_v47 = vmul.u32.u64.high %v1494_v42, %v1489_v54, %v4467_v19  ;;  %v1554_v50 = vshrl.u32 %v1553_v9, 23 }
 0x1bb   :  { %vm3078_vm4 = vcmp.lt.s32.totalorder %v3077_v40, 0  ;;  %v4471_v62 = vmul.u32.u64.low %v1494_v42, %v1493_v39  ;;  %v4472_v41 = vmul.u32.u64.high %v1494_v42, %v1493_v39, %v4471_v62  ;;  %v1332_v35 = vand.u32 3, %v1331_v45 }
 0x1bc   :  { %v1398_v52 = vadd.s32 %v4383_v14, %v4390_v16  ;;  %v1413_v55 = vsel %vm3078_vm4, 0, %v3077_v40  ;;  %v368_v8 = vadd.f32 %v4423_v4, %v3515_v0  ;;  %v1429_v51 = vsel %vm1344_vm15, %v1428_v25, %v4436_v10 }
 0x1bd   :  { %v1414_v22 = vsub.s32 32, %v1413_v55  ;;  %v1418_v59 = vsub.s32 4294967266, %v1413_v55  ;;  %v3083_v28 = vadd.s32 4294967169, %v1554_v50  ;;  %vm4483_vm5 = vcmp.le.f32.partialorder %v1342_v33, 0.7853982 }
 0x1be   :  { %v1501_v45 = vmul.u32 %v1494_v42, %v1485_v2  ;;  %v1504_v14 = vadd.s32 1, %v4468_v47  ;;  %v1550_v16 = vand.u32 2147483647, %v4438_v3  ;;  %v1415_v0 = vshll.u32 %v4448_v21, %v1413_v55 }
 0x1bf   :  { %v1416_v4 = vshrl.u32 %v1398_v52, %v1414_v22  ;;  %v1419_v58 = vadd.s32 127, %v1418_v59  ;;  %vm1503_vm6 = vc.u32 %v4472_v41, %v4467_v19  ;;  %v1431_v10 = vsel %vm4483_vm5, 0, %v1429_v51 }
 0x1c0   :  { %v1505_v33 = vsel %vm1503_vm6, %v1504_v14, %v4468_v47  ;;  %v1560_v57 = vadd.s32 1, %v3083_v28  ;;  %v4495_v26 = vmul.f32 30.0, %v368_v8  ;;  %vm1333_vm7 = vcmp.lt.s32.totalorder %v1332_v35, 2 }
 0x1c1   :  { %v3284_v42 = vpop.eup %3283  ;;  %v1417_v44 = vor.u32 %v1416_v4, %v1415_v0  ;;  %v1420_v7 = vshll.u32 %v1419_v58, 23  ;;  %v1506_v60 = vadd.s32 %v1505_v33, %v1501_v45  ;;  %vm1334_vm8 = vcmp.eq.s32.totalorder %v1332_v35, 0 }
 0x1c2   :  { %v3286_v31 = vpop.eup %3285  ;;  %vm1337_vm9 = vcmp.eq.s32.totalorder %v1332_v35, 2  ;;  %v1338_v21 = vxor.u32 2147483648, %v3284_v42  ;;  %vm1561_vm10 = vcmp.gt.s32.totalorder %v1560_v57, 0  ;;  %v1435_v46 = vadd.s32 3, %v1431_v10 }
 0x1c3   :  { %v1335_v15 = vxor.u32 2147483648, %v3286_v31  ;;  %v1421_v48 = vor.u32 4788187, %v1420_v7  ;;  %v1507_v9 = vadd.s32 536870912, %v1506_v60  ;;  %v1557_v25 = vand.u32 8388607, %v1550_v16 }
 0x1c4   :  { %v1339_v40 = vsel %vm1337_vm9, %v1338_v21, %v3286_v31  ;;  %v1562_v54 = vsel %vm1561_vm10, %v1560_v57, 0  ;;  %v1657_v32 = vand.u32 2139095040, %v4495_v26  ;;  %v1424_v47 = vcvt.s32.f32 %v1417_v44 }
 0x1c5   :  { %v1336_v2 = vsel %vm1334_vm8, %v3284_v42, %v1335_v15  ;;  %v1422_v39 = vand.u32 2147483647, %v1421_v48  ;;  %v4500_v62 = vshrl.u32 %v1507_v9, 30  ;;  %vm1330_vm12 = vweird.f32 %v4202_v53 }
 0x1c6   :  { %v1340_v50 = vsel %vm1333_vm7, %v1336_v2, %v1339_v40  ;;  %v1564_v52 = vand.u32 31, %v1562_v54  ;;  %v4509_v59 = vand.u32 3, %v1435_v46  ;;  %v1558_v51 = vor.u32 8388608, %v1557_v25 }
 0x1c7   :  { %v1341_v55 = vsel %vm1330_vm12, nan, %v1340_v50  ;;  %v1425_v8 = vmul.f32 %v1424_v47, %v1422_v39  ;;  %v1509_v22 = vshll.u32 %v4500_v62, 30  ;;  %v4513_v45 = vadd.f32 %v4428_v34, %v3512_v63 }
 0x1c8   :  { %3015 = vst.msk [vmem:[%s5652_s3 + $0x40] sm:$0xff] %vm3006_vm11, %v1341_v55  ;;  %v1565_v28 = vsub.s32 32, %v1564_v52  ;;  %v4517_v14 = vshrl.u32 %v1562_v54, 5  ;;  %v1658_v0 = vshrl.u32 %v1657_v32, 23  ;;  %v1567_v4 = vshll.u32 %v5680_v1, %v1564_v52 }
 0x1c9   :  { %v1426_v53 = vxor.u32 2147483648, %v1425_v8  ;;  %v4515_v35 = vsub.s32 %v1506_v60, %v1509_v22  ;;  %v1570_v10 = vshll.u32 %v5681_v61, %v1564_v52  ;;  %v1573_v34 = vshll.u32 %v5674_v30, %v1564_v52 }
 0x1ca   :  { %v1568_v58 = vshrl.u32 %v5681_v61, %v1565_v28  ;;  %v1571_v33 = vshrl.u32 %v5674_v30, %v1565_v28  ;;  %v1574_v42 = vshrl.u32 %v5673_v13, %v1565_v28  ;;  %v1576_v60 = vshll.u32 %v5673_v13, %v1564_v52 }
 0x1cb   :  { %v1427_v57 = vsel %vm1344_vm15, %v1426_v53, %v1425_v8  ;;  %v1512_v63 = vsub.s32 0, %v4515_v35  ;;  %v1577_v31 = vshrl.u32 %v3360_v56, %v1565_v28  ;;  %v1579_v9 = vshll.u32 %v3360_v56, %v1564_v52 }
 0x1cc   :  { %v1430_v44 = vsel %vm4483_vm5, %v4293_v27, %v1427_v57  ;;  %v1569_v7 = vor.u32 %v1568_v58, %v1567_v4  ;;  %v1572_v15 = vor.u32 %v1571_v33, %v1570_v10  ;;  %v1575_v48 = vor.u32 %v1574_v42, %v1573_v34 }
 0x1cd   :  { %3287 = vcosq.f32 %v1430_v44  ;;  %v3080_v21 = vmin.u32 %v1512_v63, %v4515_v35  ;;  %v1578_v46 = vor.u32 %v1577_v31, %v1576_v60  ;;  %v1580_v40 = vshrl.u32 %v5675_v43, %v1565_v28 }
 0x1ce   :  { %3289 = vsinq.f32 %v1430_v44  ;;  %vm1448_vm13 = vcmp.lt.s32.totalorder %v4339_v20, 0  ;;  %v1502_v29 = vadd.s32 %v4467_v19, %v4472_v41  ;;  %v1598_v54 = vshll.u32 %v1558_v51, 8 }
 0x1cf   :  { %v1514_v25 = vclz %v3080_v21  ;;  %v1654_v32 = vand.u32 2147483647, %v4495_v26  ;;  %v1566_v2 = vshrl.u32 %v5680_v1, %v1565_v28  ;;  %v1581_v39 = vor.u32 %v1580_v40, %v1579_v9 }
 0x1d0   :  { %vm1582_vm14 = vcmp.lt.s32.totalorder %v4517_v14, 1  ;;  %v3087_v47 = vadd.s32 4294967169, %v1658_v0  ;;  %vm1584_vm15 = vcmp.lt.s32.totalorder %v4517_v14, 3  ;;  %vm1585_vm0 = vcmp.lt.s32.totalorder %v4517_v14, 4 }
 0x1d1   :  { %v3081_v50 = vadd.s32 4294967294, %v1514_v25  ;;  %v1590_v52 = vsel %vm1582_vm14, %v1569_v7, %v1572_v15  ;;  %v1587_v55 = vsel %vm1585_vm0, %v1575_v48, 2102212464  ;;  %v1591_v19 = vsel %vm1585_vm0, %v1578_v46, 920167782 }
 0x1d2   :  { %v1594_v41 = vsel %vm1582_vm14, %v1572_v15, %v1575_v48  ;;  %v1595_v8 = vsel %vm1585_vm0, %v1581_v39, 1326507024  ;;  %vm1583_vm2 = vcmp.lt.s32.totalorder %v4517_v14, 2  ;;  %v1592_v22 = vsel %vm1584_vm15, %v1575_v48, %v1591_v19 }
 0x1d3   :  { %vm3082_vm1 = vcmp.lt.s32.totalorder %v3081_v50, 0  ;;  %v1596_v51 = vsel %vm1584_vm15, %v1578_v46, %v1595_v8  ;;  %v1532_v53 = vsub.s32 4, %v4500_v62  ;;  %v1593_v0 = vsel %vm1583_vm2, %v1590_v52, %v1592_v22 }
 0x1d4   :  { %v1517_v28 = vsel %vm3082_vm1, 0, %v3081_v50  ;;  %v1597_v4 = vsel %vm1583_vm2, %v1594_v41, %v1596_v51  ;;  %v1586_v33 = vsel %vm1582_vm14, %v1566_v2, %v1569_v7  ;;  %v1588_v57 = vsel %vm1584_vm15, %v1572_v15, %v1587_v55 }
 0x1d5   :  { %v1518_v58 = vsub.s32 32, %v1517_v28  ;;  %v1522_v10 = vsub.s32 4294967266, %v1517_v28  ;;  %v4562_v63 = vmul.u32.u64.low %v1598_v54, %v1597_v4  ;;  %v4563_v34 = vmul.u32.u64.high %v1598_v54, %v1597_v4, %v4562_v63 }
 0x1d6   :  { %v4565_v42 = vmul.u32.u64.low %v1598_v54, %v1593_v0  ;;  %v4566_v44 = vmul.u32.u64.high %v1598_v54, %v1593_v0, %v4565_v42  ;;  %vm1434_vm3 = vweird.f32 %v4293_v27  ;;  %v1519_v60 = vshll.u32 %v4515_v35, %v1517_v28 }
 0x1d7   :  { %v1520_v31 = vshrl.u32 %v1502_v29, %v1518_v58  ;;  %v1523_v21 = vadd.s32 127, %v1522_v10  ;;  %v1664_v48 = vadd.s32 1, %v3087_v47  ;;  %vm1437_vm4 = vcmp.lt.s32.totalorder %v4509_v59, 2 }
 0x1d8   :  { %vm4574_vm5 = vcmp.le.f32.partialorder %v1446_v38, 0.7853982  ;;  %v1533_v15 = vsel %vm1448_vm13, %v1532_v53, %v4500_v62  ;;  %v1589_v46 = vsel %vm1583_vm2, %v1586_v33, %v1588_v57  ;;  %vm1438_vm6 = vcmp.eq.s32.totalorder %v4509_v59, 0 }
 0x1d9   :  { %v1521_v35 = vor.u32 %v1520_v31, %v1519_v60  ;;  %v1524_v9 = vshll.u32 %v1523_v21, 23  ;;  %vm1665_vm7 = vcmp.gt.s32.totalorder %v1664_v48, 0  ;;  %vm1607_vm8 = vc.u32 %v4563_v34, %v4565_v42 }
 0x1da   :  { %v3288_v40 = vpop.eup %3287  ;;  %v1608_v38 = vadd.s32 1, %v4566_v44  ;;  %v1661_v29 = vand.u32 8388607, %v1654_v32  ;;  %v1666_v25 = vsel %vm1665_vm7, %v1664_v48, 0  ;;  %v1535_v14 = vsel %vm4574_vm5, 0, %v1533_v15 }
 0x1db   :  { %v3290_v2 = vpop.eup %3289  ;;  %v1442_v62 = vxor.u32 2147483648, %v3288_v40  ;;  %v1525_v39 = vor.u32 4788187, %v1524_v9  ;;  %v1605_v47 = vmul.u32 %v1598_v54, %v1589_v46  ;;  %vm1441_vm9 = vcmp.eq.s32.totalorder %v4509_v59, 2 }
 0x1dc   :  { %v1439_v50 = vxor.u32 2147483648, %v3290_v2  ;;  %v1609_v52 = vsel %vm1607_vm8, %v1608_v38, %v4566_v44  ;;  %v1668_v55 = vand.u32 31, %v1666_v25  ;;  %v1528_v8 = vcvt.s32.f32 %v1521_v35 }
 0x1dd   :  { %v1443_v19 = vsel %vm1441_vm9, %v1442_v62, %v3290_v2  ;;  %v1526_v41 = vand.u32 2147483647, %v1525_v39  ;;  %v1610_v22 = vadd.s32 %v1609_v52, %v1605_v47  ;;  %v1539_v28 = vadd.s32 3, %v1535_v14 }
 0x1de   :  { %v1440_v51 = vsel %vm1438_vm6, %v3288_v40, %v1439_v50  ;;  %v1662_v53 = vor.u32 8388608, %v1661_v29  ;;  %v1669_v0 = vsub.s32 32, %v1668_v55  ;;  %v4597_v10 = vshrl.u32 %v1666_v25, 5 }
 0x1df   :  { %v1444_v4 = vsel %vm1437_vm4, %v1440_v51, %v1443_v19  ;;  %v1529_v54 = vmul.f32 %v1528_v8, %v1526_v41  ;;  %v1611_v58 = vadd.s32 536870912, %v1610_v22  ;;  %v1671_v57 = vshll.u32 %v5680_v1, %v1668_v55 }
 0x1e0   :  { %v1445_v33 = vsel %vm1434_vm3, nan, %v1444_v4  ;;  %v1672_v63 = vshrl.u32 %v5681_v61, %v1669_v0  ;;  %v1675_v44 = vshrl.u32 %v5674_v30, %v1669_v0  ;;  %v1674_v31 = vshll.u32 %v5681_v61, %v1668_v55 }
 0x1e1   :  { %3016 = vst.msk [vmem:[%s5652_s3 + $0x48] sm:$0xff] %vm3006_vm11, %v1445_v33  ;;  %v1530_v59 = vxor.u32 2147483648, %v1529_v54  ;;  %v1612_v60 = vshrl.u32 %v1611_v58, 30  ;;  %v1678_v21 = vshrl.u32 %v5673_v13, %v1669_v0  ;;  %v1677_v27 = vshll.u32 %v5674_v30, %v1668_v55 }
 0x1e2   :  { %v1673_v48 = vor.u32 %v1672_v63, %v1671_v57  ;;  %v1680_v15 = vshll.u32 %v5673_v13, %v1668_v55  ;;  %v1681_v46 = vshrl.u32 %v3360_v56, %v1669_v0  ;;  %v1676_v40 = vor.u32 %v1675_v44, %v1674_v31 }
 0x1e3   :  { %v1531_v35 = vsel %vm1448_vm13, %v1530_v59, %v1529_v54  ;;  %v1613_v9 = vshll.u32 %v1612_v60, 30  ;;  %v1683_v38 = vshll.u32 %v3360_v56, %v1668_v55  ;;  %v1679_v25 = vor.u32 %v1678_v21, %v1677_v27  ;;  %v285_v59 = vpop.permute.xlu0 %284 }
 0x1e4   :  { %v1534_v29 = vsel %vm4574_vm5, %v4339_v20, %v1531_v35  ;;  %v1682_v2 = vor.u32 %v1681_v46, %v1680_v15  ;;  %v1684_v62 = vshrl.u32 %v5675_v43, %v1669_v0  ;;  %v4622_v14 = vand.u32 3, %v1539_v28 }
 0x1e5   :  { %3291 = vcosq.f32 %v1534_v29  ;;  %v4620_v39 = vsub.s32 %v1610_v22, %v1613_v9  ;;  %v1702_v50 = vshll.u32 %v1662_v53, 8  ;;  %vm1686_vm10 = vcmp.lt.s32.totalorder %v4597_v10, 1  ;;  %v4675_v9 = vld [vmem:[%s5650_s1 + $0x1] ss:$0 sm:$0xff] }
 0x1e6   :  { %3293 = vsinq.f32 %v1534_v29  ;;  %v1685_v47 = vor.u32 %v1684_v62, %v1683_v38  ;;  %vm1689_vm12 = vcmp.lt.s32.totalorder %v4597_v10, 4  ;;  %v4628_v7 = vmul.f32 30.0, %v4513_v45 }
 0x1e7   :  { %v1616_v52 = vsub.s32 0, %v4620_v39  ;;  %vm1688_vm13 = vcmp.lt.s32.totalorder %v4597_v10, 3  ;;  %v1691_v55 = vsel %vm1689_vm12, %v1679_v25, 2102212464  ;;  %v1694_v19 = vsel %vm1686_vm10, %v1673_v48, %v1676_v40 }
 0x1e8   :  { %v1695_v41 = vsel %vm1689_vm12, %v1682_v2, 920167782  ;;  %v1670_v22 = vshrl.u32 %v5680_v1, %v1669_v0  ;;  %vm1687_vm14 = vcmp.lt.s32.totalorder %v4597_v10, 2  ;;  %v1636_v28 = vsub.s32 4, %v1612_v60 }
 0x1e9   :  { %v3084_v8 = vmin.u32 %v1616_v52, %v4620_v39  ;;  %v1696_v51 = vsel %vm1688_vm13, %v1679_v25, %v1695_v41  ;;  %v1698_v53 = vsel %vm1686_vm10, %v1676_v40, %v1679_v25  ;;  %v1699_v4 = vsel %vm1689_vm12, %v1685_v47, 1326507024 }
 0x1ea   :  { %v1697_v45 = vsel %vm1687_vm14, %v1694_v19, %v1696_v51  ;;  %vm1552_vm15 = vcmp.lt.s32.totalorder %v4438_v3, 0  ;;  %v1690_v58 = vsel %vm1686_vm10, %v1670_v22, %v1673_v48  ;;  %v1692_v0 = vsel %vm1688_vm13, %v1676_v40, %v1691_v55 }
 0x1eb   :  { %v1618_v54 = vclz %v3084_v8  ;;  %v1700_v33 = vsel %vm1688_vm13, %v1682_v2, %v1699_v4  ;;  %v4649_v57 = vmul.u32.u64.low %v1702_v50, %v1697_v45  ;;  %v4650_v63 = vmul.u32.u64.high %v1702_v50, %v1697_v45, %v4649_v57 }
 0x1ec   :  { %v1761_v44 = vand.u32 2139095040, %v4628_v7  ;;  %vm1542_vm0 = vcmp.eq.s32.totalorder %v4622_v14, 0  ;;  %vm4657_vm1 = vcmp.le.f32.partialorder %v1550_v16, 0.7853982  ;;  %v1701_v48 = vsel %vm1687_vm14, %v1698_v53, %v1700_v33 }
 0x1ed   :  { %v3085_v21 = vadd.s32 4294967294, %v1618_v54  ;;  %vm1541_vm2 = vcmp.lt.s32.totalorder %v4622_v14, 2  ;;  %v1637_v27 = vsel %vm1552_vm15, %v1636_v28, %v1612_v60  ;;  %vm1545_vm3 = vcmp.eq.s32.totalorder %v4622_v14, 2 }
 0x1ee   :  { %v4666_v15 = vmul.u32.u64.low %v1702_v50, %v1701_v48  ;;  %v4667_v46 = vmul.u32.u64.high %v1702_v50, %v1701_v48, %v4666_v15  ;;  %v1762_v35 = vshrl.u32 %v1761_v44, 23  ;;  %v1693_v16 = vsel %vm1687_vm14, %v1690_v58, %v1692_v0 }
 0x1ef   :  { %vm3086_vm4 = vcmp.lt.s32.totalorder %v3085_v21, 0  ;;  %v345_v40 = vmul.f32 %v4675_v9, %v285_v59  ;;  %v1712_v60 = vadd.s32 1, %v4650_v63  ;;  %v1758_v29 = vand.u32 2147483647, %v4628_v7 }
 0x1f0   :  { %v1621_v38 = vsel %vm3086_vm4, 0, %v3085_v21  ;;  %v3091_v25 = vadd.s32 4294967169, %v1762_v35  ;;  %v1606_v2 = vadd.s32 %v4565_v42, %v4563_v34  ;;  %v1639_v10 = vsel %vm4657_vm1, 0, %v1637_v27 }
 0x1f1   :  { %v1622_v62 = vsub.s32 32, %v1621_v38  ;;  %v1626_v47 = vsub.s32 4294967266, %v1621_v38  ;;  %v1623_v55 = vshll.u32 %v4620_v39, %v1621_v38  ;;  %v1709_v19 = vmul.u32 %v1702_v50, %v1693_v16 }
 0x1f2   :  { %v3292_v52 = vpop.eup %3291  ;;  %vm1711_vm5 = vc.u32 %v4667_v46, %v4649_v57  ;;  %v1768_v41 = vadd.s32 1, %v3091_v25  ;;  %v1765_v53 = vand.u32 8388607, %v1758_v29  ;;  %v370_v44 = vadd.f32 %v345_v40, %v3523_v6 }
 0x1f3   :  { %v3294_v8 = vpop.eup %3293  ;;  %v1546_v22 = vxor.u32 2147483648, %v3292_v52  ;;  %v1624_v51 = vshrl.u32 %v1606_v2, %v1622_v62  ;;  %v1627_v28 = vadd.s32 127, %v1626_v47  ;;  %v1713_v45 = vsel %vm1711_vm5, %v1712_v60, %v4650_v63 }
 0x1f4   :  { %v1543_v34 = vxor.u32 2147483648, %v3294_v8  ;;  %v1714_v42 = vadd.s32 %v1713_v45, %v1709_v19  ;;  %vm1769_vm6 = vcmp.gt.s32.totalorder %v1768_v41, 0  ;;  %vm1538_vm7 = vweird.f32 %v4339_v20 }
 0x1f5   :  { %v1547_v39 = vsel %vm1545_vm3, %v1546_v22, %v3294_v8  ;;  %v1625_v50 = vor.u32 %v1624_v51, %v1623_v55  ;;  %v1628_v4 = vshll.u32 %v1627_v28, 23  ;;  %v1770_v54 = vsel %vm1769_vm6, %v1768_v41, 0 }
 0x1f6   :  { %v1544_v58 = vsel %vm1542_vm0, %v3292_v52, %v1543_v34  ;;  %v1715_v0 = vadd.s32 536870912, %v1714_v42  ;;  %v1772_v33 = vand.u32 31, %v1770_v54  ;;  %v1766_v27 = vor.u32 8388608, %v1765_v53 }
 0x1f7   :  { %v1548_v63 = vsel %vm1541_vm2, %v1544_v58, %v1547_v39  ;;  %v1629_v59 = vor.u32 4788187, %v1628_v4  ;;  %v1632_v16 = vcvt.s32.f32 %v1625_v50  ;;  %v4704_v38 = vadd.s32 3, %v1639_v10 }
 0x1f8   :  { %v1549_v21 = vsel %vm1538_vm7, nan, %v1548_v63  ;;  %v4698_v48 = vshrl.u32 %v1715_v0, 30  ;;  %v1773_v15 = vsub.s32 32, %v1772_v33  ;;  %v1775_v20 = vshll.u32 %v5680_v1, %v1772_v33 }
 0x1f9   :  { %3017 = vst.msk [vmem:[%s5652_s3 + $0x50] sm:$0xff] %vm3006_vm11, %v1549_v21  ;;  %v1630_v35 = vand.u32 2147483647, %v1629_v59  ;;  %v4709_v40 = vmul.f32 30.0, %v370_v44  ;;  %v1771_v52 = vshrl.u32 %v1770_v54, 5  ;;  %v1778_v10 = vshll.u32 %v5681_v61, %v1772_v33 }
 0x1fa   :  { %v1717_v6 = vshll.u32 %v4698_v48, 30  ;;  %v1776_v14 = vshrl.u32 %v5681_v61, %v1773_v15  ;;  %v1779_v25 = vshrl.u32 %v5674_v30, %v1773_v15  ;;  %v1782_v2 = vshrl.u32 %v5673_v13, %v1773_v15 }
 0x1fb   :  { %v1633_v60 = vmul.f32 %v1632_v16, %v1630_v35  ;;  %v1785_v62 = vshrl.u32 %v3360_v56, %v1773_v15  ;;  %v4717_v55 = vshll.u32 %v1766_v27, 8  ;;  %v1781_v8 = vshll.u32 %v5674_v30, %v1772_v33 }
 0x1fc   :  { %v4714_v47 = vsub.s32 %v1714_v42, %v1717_v6  ;;  %v1777_v41 = vor.u32 %v1776_v14, %v1775_v20  ;;  %v1784_v22 = vshll.u32 %v5673_v13, %v1772_v33  ;;  %vm1656_vm8 = vcmp.lt.s32.totalorder %v4495_v26, 0 }
 0x1fd   :  { %v1634_v19 = vxor.u32 2147483648, %v1633_v60  ;;  %v1780_v28 = vor.u32 %v1779_v25, %v1778_v10  ;;  %v1787_v45 = vshll.u32 %v3360_v56, %v1772_v33  ;;  %v1788_v34 = vshrl.u32 %v5675_v43, %v1773_v15 }
 0x1fe   :  { %v1720_v51 = vsub.s32 0, %v4714_v47  ;;  %v1710_v53 = vadd.s32 %v4649_v57, %v4667_v46  ;;  %v1783_v39 = vor.u32 %v1782_v2, %v1781_v8  ;;  %v1786_v50 = vor.u32 %v1785_v62, %v1784_v22  ;;  %v289_v2 = vpop.permute.xlu1 %288 }
 0x1ff   :  { %v1635_v42 = vsel %vm1552_vm15, %v1634_v19, %v1633_v60  ;;  %v1740_v58 = vsub.s32 4, %v4698_v48  ;;  %v1789_v0 = vor.u32 %v1788_v34, %v1787_v45  ;;  %v1774_v33 = vshrl.u32 %v5680_v1, %v1773_v15 }
 0x200   :  { %v1638_v4 = vsel %vm4657_vm1, %v4438_v3, %v1635_v42  ;;  %v3088_v54 = vmin.u32 %v1720_v51, %v4714_v47  ;;  %vm1790_vm9 = vcmp.lt.s32.totalorder %v1771_v52, 1  ;;  %vm1791_vm10 = vcmp.lt.s32.totalorder %v1771_v52, 2 }
 0x201   :  { %3295 = vcosq.f32 %v1638_v4  ;;  %vm4737_vm12 = vcmp.le.f32.partialorder %v1654_v32, 0.7853982  ;;  %vm1793_vm13 = vcmp.lt.s32.totalorder %v1771_v52, 4  ;;  %v1798_v31 = vsel %vm1790_vm9, %v1777_v41, %v1780_v28 }
 0x202   :  { %3297 = vsinq.f32 %v1638_v4  ;;  %v1722_v46 = vclz %v3088_v54  ;;  %vm1792_vm14 = vcmp.lt.s32.totalorder %v1771_v52, 3  ;;  %v1795_v44 = vsel %vm1793_vm13, %v1783_v39, 2102212464 }
 0x203   :  { %v1799_v63 = vsel %vm1793_vm13, %v1786_v50, 920167782  ;;  %v1802_v59 = vsel %vm1790_vm9, %v1780_v28, %v1783_v39  ;;  %v1794_v27 = vsel %vm1790_vm9, %v1774_v33, %v1777_v41  ;;  %v1803_v15 = vsel %vm1793_vm13, %v1789_v0, 1326507024 }
 0x204   :  { %v3089_v21 = vadd.s32 4294967294, %v1722_v46  ;;  %v1800_v35 = vsel %vm1792_vm14, %v1783_v39, %v1799_v63  ;;  %v1796_v16 = vsel %vm1792_vm14, %v1780_v28, %v1795_v44  ;;  %v1804_v20 = vsel %vm1792_vm14, %v1786_v50, %v1803_v15 }
 0x205   :  { %v1801_v6 = vsel %vm1791_vm10, %v1798_v31, %v1800_v35  ;;  %v1865_v32 = vand.u32 2139095040, %v4709_v40  ;;  %v1805_v14 = vsel %vm1791_vm10, %v1802_v59, %v1804_v20  ;;  %v1741_v10 = vsel %vm1656_vm8, %v1740_v58, %v4698_v48  ;;  %v293_v58 = vpop.permute.xlu0 %292 }
 0x206   :  { %vm3090_vm15 = vcmp.lt.s32.totalorder %v3089_v21, 0  ;;  %v4745_v60 = vmul.u32.u64.low %v4717_v55, %v1801_v6  ;;  %v4746_v25 = vmul.u32.u64.high %v4717_v55, %v1801_v6, %v4745_v60  ;;  %v1797_v51 = vsel %vm1791_vm10, %v1794_v27, %v1796_v16 }
 0x207   :  { %v1725_v62 = vsel %vm3090_vm15, 0, %v3089_v21  ;;  %v4753_v19 = vmul.u32.u64.low %v4717_v55, %v1805_v14  ;;  %v4754_v41 = vmul.u32.u64.high %v4717_v55, %v1805_v14, %v4753_v19  ;;  %v1866_v28 = vshrl.u32 %v1865_v32, 23 }
 0x208   :  { %v1726_v8 = vsub.s32 32, %v1725_v62  ;;  %v1730_v22 = vsub.s32 4294967266, %v1725_v62  ;;  %v1644_v45 = vand.u32 3, %v4704_v38  ;;  %v1727_v34 = vshll.u32 %v4714_v47, %v1725_v62 }
 0x209   :  { %v1862_v42 = vand.u32 2147483647, %v4709_v40  ;;  %v346_v39 = vmul.f32 %v4675_v9, %v289_v2  ;;  %v1816_v48 = vadd.s32 1, %v4746_v25  ;;  %v3095_v54 = vadd.s32 4294967169, %v1866_v28 }
 0x20a   :  { %v1728_v50 = vshrl.u32 %v1710_v53, %v1726_v8  ;;  %v1731_v4 = vadd.s32 127, %v1730_v22  ;;  %v1743_v0 = vsel %vm4737_vm12, 0, %v1741_v10  ;;  %v1813_v52 = vmul.u32 %v4717_v55, %v1797_v51 }
 0x20b   :  { %vm1815_vm0 = vc.u32 %v4754_v41, %v4745_v60  ;;  %v1872_v46 = vadd.s32 1, %v3095_v54  ;;  %v1869_v53 = vand.u32 8388607, %v1862_v42  ;;  %v371_v44 = vadd.f32 %v346_v39, %v3520_v5 }
 0x20c   :  { %v1729_v38 = vor.u32 %v1728_v50, %v1727_v34  ;;  %v1732_v47 = vshll.u32 %v1731_v4, 23  ;;  %v1817_v33 = vsel %vm1815_vm0, %v1816_v48, %v4746_v25  ;;  %v347_v63 = vmul.f32 %v4675_v9, %v293_v58 }
 0x20d   :  { %v1818_v31 = vadd.s32 %v1817_v33, %v1813_v52  ;;  %vm1646_vm1 = vcmp.eq.s32.totalorder %v1644_v45, 0  ;;  %vm1649_vm2 = vcmp.eq.s32.totalorder %v1644_v45, 2  ;;  %vm1873_vm3 = vcmp.gt.s32.totalorder %v1872_v46, 0 }
 0x20e   :  { %v3296_v59 = vpop.eup %3295  ;;  %v1733_v55 = vor.u32 4788187, %v1732_v47  ;;  %v1747_v35 = vadd.s32 3, %v1743_v0  ;;  %v1874_v16 = vsel %vm1873_vm3, %v1872_v46, 0  ;;  %v1736_v32 = vcvt.s32.f32 %v1729_v38 }
 0x20f   :  { %v3298_v21 = vpop.eup %3297  ;;  %v1650_v27 = vxor.u32 2147483648, %v3296_v59  ;;  %v1819_v15 = vadd.s32 536870912, %v1818_v31  ;;  %v1876_v14 = vand.u32 31, %v1874_v16  ;;  %v1870_v5 = vor.u32 8388608, %v1869_v53 }
 0x210   :  { %v1647_v6 = vxor.u32 2147483648, %v3298_v21  ;;  %v1734_v20 = vand.u32 2147483647, %v1733_v55  ;;  %v4774_v62 = vmul.f32 30.0, %v371_v44  ;;  %vm1645_vm4 = vcmp.lt.s32.totalorder %v1644_v45, 2 }
 0x211   :  { %v1651_v25 = vsel %vm1649_vm2, %v1650_v27, %v3298_v21  ;;  %v4772_v2 = vshrl.u32 %v1819_v15, 30  ;;  %v1877_v8 = vsub.s32 32, %v1876_v14  ;;  %vm1642_vm5 = vweird.f32 %v4438_v3 }
 0x212   :  { %v1648_v10 = vsel %vm1646_vm1, %v3296_v59, %v1647_v6  ;;  %v1737_v19 = vmul.f32 %v1736_v32, %v1734_v20  ;;  %v4780_v28 = vadd.f32 %v347_v63, %v3531_v12  ;;  %v4782_v50 = vand.u32 3, %v1747_v35 }
 0x213   :  { %v1652_v22 = vsel %vm1645_vm4, %v1648_v10, %v1651_v25  ;;  %v1821_v51 = vshll.u32 %v4772_v2, 30  ;;  %v1880_v4 = vshrl.u32 %v5681_v61, %v1877_v8  ;;  %v1883_v3 = vshrl.u32 %v5674_v30, %v1877_v8 }
 0x214   :  { %v1653_v34 = vsel %vm1642_vm5, nan, %v1652_v22  ;;  %v1738_v39 = vxor.u32 2147483648, %v1737_v19  ;;  %v4792_v48 = vshll.u32 %v1870_v5, 8  ;;  %v1969_v12 = vand.u32 2139095040, %v4774_v62 }
 0x215   :  { %3018 = vst.msk [vmem:[%s5652_s3 + $0x58] sm:$0xff] %vm3006_vm11, %v1653_v34  ;;  %v4789_v45 = vsub.s32 %v1818_v31, %v1821_v51  ;;  %v1875_v58 = vshrl.u32 %v1874_v16, 5  ;;  %v1879_v0 = vshll.u32 %v5680_v1, %v1876_v14  ;;  %v1886_v52 = vshrl.u32 %v5673_v13, %v1877_v8 }
 0x216   :  { %v1739_v54 = vsel %vm1656_vm8, %v1738_v39, %v1737_v19  ;;  %v1882_v33 = vshll.u32 %v5681_v61, %v1876_v14  ;;  %v1885_v46 = vshll.u32 %v5674_v30, %v1876_v14  ;;  %v1888_v53 = vshll.u32 %v5673_v13, %v1876_v14 }
 0x217   :  { %v1742_v38 = vsel %vm4737_vm12, %v4495_v26, %v1739_v54  ;;  %v1824_v47 = vsub.s32 0, %v4789_v45  ;;  %v1881_v31 = vor.u32 %v1880_v4, %v1879_v0  ;;  %v1889_v44 = vshrl.u32 %v3360_v56, %v1877_v8 }
 0x218   :  { %3299 = vcosq.f32 %v1742_v38  ;;  %v1884_v59 = vor.u32 %v1883_v3, %v1882_v33  ;;  %v1887_v55 = vor.u32 %v1886_v52, %v1885_v46  ;;  %v1891_v57 = vshll.u32 %v3360_v56, %v1876_v14 }
 0x219   :  { %3301 = vsinq.f32 %v1742_v38  ;;  %v3092_v63 = vmin.u32 %v1824_v47, %v4789_v45  ;;  %v1890_v21 = vor.u32 %v1889_v44, %v1888_v53  ;;  %v1892_v27 = vshrl.u32 %v5675_v43, %v1877_v8 }
 0x21a   :  { %v1970_v35 = vshrl.u32 %v1969_v12, 23  ;;  %vm1760_vm6 = vcmp.lt.s32.totalorder %v4628_v7, 0  ;;  %v1844_v16 = vsub.s32 4, %v4772_v2  ;;  %v1878_v6 = vshrl.u32 %v5680_v1, %v1877_v8 }
 0x21b   :  { %v1826_v15 = vclz %v3092_v63  ;;  %vm1894_vm7 = vcmp.lt.s32.totalorder %v1875_v58, 1  ;;  %v1893_v20 = vor.u32 %v1892_v27, %v1891_v57  ;;  %vm1895_vm8 = vcmp.lt.s32.totalorder %v1875_v58, 2 }
 0x21c   :  { %vm1896_vm9 = vcmp.lt.s32.totalorder %v1875_v58, 3  ;;  %vm1897_vm10 = vcmp.lt.s32.totalorder %v1875_v58, 4  ;;  %v1902_v5 = vsel %vm1894_vm7, %v1881_v31, %v1884_v59  ;;  %vm4815_vm12 = vcmp.le.f32.partialorder %v1758_v29, 0.7853982 }
 0x21d   :  { %v3093_v32 = vadd.s32 4294967294, %v1826_v15  ;;  %v1899_v25 = vsel %vm1897_vm10, %v1887_v55, 2102212464  ;;  %v1903_v10 = vsel %vm1897_vm10, %v1890_v21, 920167782  ;;  %v1898_v19 = vsel %vm1894_vm7, %v1878_v6, %v1881_v31 }
 0x21e   :  { %v1904_v22 = vsel %vm1896_vm9, %v1887_v55, %v1903_v10  ;;  %v1906_v51 = vsel %vm1894_vm7, %v1884_v59, %v1887_v55  ;;  %v1907_v34 = vsel %vm1897_vm10, %v1893_v20, 1326507024  ;;  %v1900_v8 = vsel %vm1896_vm9, %v1884_v59, %v1899_v25 }
 0x21f   :  { %vm3094_vm13 = vcmp.lt.s32.totalorder %v3093_v32, 0  ;;  %v1905_v39 = vsel %vm1895_vm8, %v1902_v5, %v1904_v22  ;;  %v1908_v4 = vsel %vm1896_vm9, %v1890_v21, %v1907_v34  ;;  %vm1749_vm14 = vcmp.lt.s32.totalorder %v4782_v50, 2 }
 0x220   :  { %v1829_v3 = vsel %vm3094_vm13, 0, %v3093_v32  ;;  %v1909_v12 = vsel %vm1895_vm8, %v1906_v51, %v1908_v4  ;;  %v4822_v54 = vmul.u32.u64.low %v4792_v48, %v1905_v39  ;;  %v4823_v0 = vmul.u32.u64.high %v4792_v48, %v1905_v39, %v4822_v54 }
 0x221   :  { %v1814_v29 = vadd.s32 %v4745_v60, %v4754_v41  ;;  %v1830_v52 = vsub.s32 32, %v1829_v3  ;;  %v1834_v38 = vsub.s32 4294967266, %v1829_v3  ;;  %v1966_v47 = vand.u32 2147483647, %v4774_v62 }
 0x222   :  { %vm1750_vm15 = vcmp.eq.s32.totalorder %v4782_v50, 0  ;;  %v4832_v33 = vmul.u32.u64.low %v4792_v48, %v1909_v12  ;;  %v4833_v46 = vmul.u32.u64.high %v4792_v48, %v1909_v12, %v4832_v33  ;;  %v3099_v31 = vadd.s32 4294967169, %v1970_v35 }
 0x223   :  { %v1831_v53 = vshll.u32 %v4789_v45, %v1829_v3  ;;  %v1832_v44 = vshrl.u32 %v1814_v29, %v1830_v52  ;;  %v1835_v63 = vadd.s32 127, %v1834_v38  ;;  %v1901_v59 = vsel %vm1895_vm8, %v1898_v19, %v1900_v8 }
 0x224   :  { %v1845_v60 = vsel %vm1760_vm6, %v1844_v16, %v4772_v2  ;;  %v1920_v41 = vadd.s32 1, %v4823_v0  ;;  %v1976_v55 = vadd.s32 1, %v3099_v31  ;;  %v4842_v21 = vmul.f32 30.0, %v4780_v28 }
 0x225   :  { %v3300_v57 = vpop.eup %3299  ;;  %vm1753_vm0 = vcmp.eq.s32.totalorder %v4782_v50, 2  ;;  %v1833_v27 = vor.u32 %v1832_v44, %v1831_v53  ;;  %v1836_v35 = vshll.u32 %v1835_v63, 23  ;;  %v4847_v45 = vand.u32 8388607, %v1966_v47 }
 0x226   :  { %v3302_v58 = vpop.eup %3301  ;;  %v1754_v15 = vxor.u32 2147483648, %v3300_v57  ;;  %v1917_v6 = vmul.u32 %v4792_v48, %v1901_v59  ;;  %vm1919_vm1 = vc.u32 %v4833_v46, %v4822_v54  ;;  %vm1977_vm2 = vcmp.gt.s32.totalorder %v1976_v55, 0 }
 0x227   :  { %v1751_v2 = vxor.u32 2147483648, %v3302_v58  ;;  %v1837_v28 = vor.u32 4788187, %v1836_v35  ;;  %v1847_v16 = vsel %vm4815_vm12, 0, %v1845_v60  ;;  %v1921_v20 = vsel %vm1919_vm1, %v1920_v41, %v4823_v0 }
 0x228   :  { %v1755_v32 = vsel %vm1753_vm0, %v1754_v15, %v3302_v58  ;;  %v1922_v25 = vadd.s32 %v1921_v20, %v1917_v6  ;;  %v1978_v5 = vsel %vm1977_vm2, %v1976_v55, 0  ;;  %v2073_v10 = vand.u32 2139095040, %v4842_v21 }
 0x229   :  { %v1752_v19 = vsel %vm1750_vm15, %v3300_v57, %v1751_v2  ;;  %v1838_v48 = vand.u32 2147483647, %v1837_v28  ;;  %v1840_v22 = vcvt.s32.f32 %v1833_v27  ;;  %v1980_v51 = vand.u32 31, %v1978_v5 }
 0x22a   :  { %vm1746_vm3 = vweird.f32 %v4495_v26  ;;  %v1756_v34 = vsel %vm1749_vm14, %v1752_v19, %v1755_v32  ;;  %v1923_v8 = vadd.s32 536870912, %v1922_v25  ;;  %v1974_v3 = vor.u32 8388608, %v4847_v45 }
 0x22b   :  { %v1757_v39 = vsel %vm1746_vm3, nan, %v1756_v34  ;;  %v1841_v4 = vmul.f32 %v1840_v22, %v1838_v48  ;;  %v1981_v12 = vsub.s32 32, %v1980_v51  ;;  %v1851_v0 = vadd.s32 3, %v1847_v16 }
 0x22c   :  { %3019 = vst.msk [vmem:[%s5652_s3 + $0x60] sm:$0xff] %vm3006_vm11, %v1757_v39  ;;  %v4866_v29 = vshrl.u32 %v1923_v8, 30  ;;  %v1983_v52 = vshll.u32 %v5680_v1, %v1980_v51  ;;  %v2074_v26 = vshrl.u32 %v2073_v10, 23  ;;  %v1986_v33 = vshll.u32 %v5681_v61, %v1980_v51 }
 0x22d   :  { %v1842_v38 = vxor.u32 2147483648, %v1841_v4  ;;  %v1984_v50 = vshrl.u32 %v5681_v61, %v1981_v12  ;;  %v1987_v31 = vshrl.u32 %v5674_v30, %v1981_v12  ;;  %v1989_v44 = vshll.u32 %v5674_v30, %v1980_v51 }
 0x22e   :  { %v1925_v53 = vshll.u32 %v4866_v29, 30  ;;  %v1990_v63 = vshrl.u32 %v5673_v13, %v1981_v12  ;;  %v1993_v59 = vshrl.u32 %v3360_v56, %v1981_v12  ;;  %v1979_v41 = vshrl.u32 %v1978_v5, 5 }
 0x22f   :  { %v1843_v60 = vsel %vm1760_vm6, %v1842_v38, %v1841_v4  ;;  %v1985_v55 = vor.u32 %v1984_v50, %v1983_v52  ;;  %v1992_v57 = vshll.u32 %v5673_v13, %v1980_v51  ;;  %v1988_v45 = vor.u32 %v1987_v31, %v1986_v33 }
 0x230   :  { %v1846_v27 = vsel %vm4815_vm12, %v4628_v7, %v1843_v60  ;;  %v4882_v35 = vsub.s32 %v1922_v25, %v1925_v53  ;;  %v1991_v58 = vor.u32 %v1990_v63, %v1989_v44  ;;  %v1995_v6 = vshll.u32 %v3360_v56, %v1980_v51 }
 0x231   :  { %3303 = vcosq.f32 %v1846_v27  ;;  %v1994_v15 = vor.u32 %v1993_v59, %v1992_v57  ;;  %v1996_v2 = vshrl.u32 %v5675_v43, %v1981_v12  ;;  %v4886_v28 = vand.u32 3, %v1851_v0 }
 0x232   :  { %3305 = vsinq.f32 %v1846_v27  ;;  %v1928_v16 = vsub.s32 0, %v4882_v35  ;;  %v2070_v20 = vand.u32 2147483647, %v4842_v21  ;;  %v1982_v14 = vshrl.u32 %v5680_v1, %v1981_v12 }
 0x233   :  { %v1997_v32 = vor.u32 %v1996_v2, %v1995_v6  ;;  %vm2001_vm4 = vcmp.lt.s32.totalorder %v1979_v41, 4  ;;  %v3103_v25 = vadd.s32 4294967169, %v2074_v26  ;;  %vm1998_vm5 = vcmp.lt.s32.totalorder %v1979_v41, 1 }
 0x234   :  { %v3096_v5 = vmin.u32 %v1928_v16, %v4882_v35  ;;  %vm2000_vm6 = vcmp.lt.s32.totalorder %v1979_v41, 3  ;;  %v2003_v10 = vsel %vm2001_vm4, %v1991_v58, 2102212464  ;;  %v2002_v19 = vsel %vm1998_vm5, %v1982_v14, %v1985_v55 }
 0x235   :  { %v2004_v48 = vsel %vm2000_vm6, %v1988_v45, %v2003_v10  ;;  %v2006_v22 = vsel %vm1998_vm5, %v1985_v55, %v1988_v45  ;;  %v2007_v51 = vsel %vm2001_vm4, %v1994_v15, 920167782  ;;  %vm1864_vm7 = vcmp.lt.s32.totalorder %v4709_v40, 0 }
 0x236   :  { %v1930_v34 = vclz %v3096_v5  ;;  %v2010_v8 = vsel %vm1998_vm5, %v1988_v45, %v1991_v58  ;;  %v2014_v39 = vshll.u32 %v1974_v3, 8  ;;  %v4898_v4 = vand.u32 8388607, %v2070_v20 }
 0x237   :  { %vm1999_vm8 = vcmp.lt.s32.totalorder %v1979_v41, 2  ;;  %v2008_v12 = vsel %vm2000_vm6, %v1991_v58, %v2007_v51  ;;  %v2011_v0 = vsel %vm2001_vm4, %v1997_v32, 1326507024  ;;  %v2080_v52 = vadd.s32 1, %v3103_v25 }
 0x238   :  { %v3097_v26 = vadd.s32 4294967294, %v1930_v34  ;;  %v2005_v38 = vsel %vm1999_vm8, %v2002_v19, %v2004_v48  ;;  %v2009_v50 = vsel %vm1999_vm8, %v2006_v22, %v2008_v12  ;;  %v2012_v33 = vsel %vm2000_vm6, %v1994_v15, %v2011_v0 }
 0x239   :  { %v2013_v31 = vsel %vm1999_vm8, %v2010_v8, %v2012_v33  ;;  %v4903_v53 = vmul.u32.u64.low %v2014_v39, %v2009_v50  ;;  %v4904_v44 = vmul.u32.u64.high %v2014_v39, %v2009_v50, %v4903_v53  ;;  %vm2081_vm9 = vcmp.gt.s32.totalorder %v2080_v52, 0 }
 0x23a   :  { %vm1853_vm10 = vcmp.lt.s32.totalorder %v4886_v28, 2  ;;  %vm3098_vm12 = vcmp.lt.s32.totalorder %v3097_v26, 0  ;;  %v4908_v3 = vmul.u32.u64.low %v2014_v39, %v2013_v31  ;;  %v4909_v63 = vmul.u32.u64.high %v2014_v39, %v2013_v31, %v4908_v3 }
 0x23b   :  { %v2082_v59 = vsel %vm2081_vm9, %v2080_v52, 0  ;;  %vm1850_vm13 = vweird.f32 %v4628_v7  ;;  %vm1854_vm14 = vcmp.eq.s32.totalorder %v4886_v28, 0  ;;  %v1933_v60 = vsel %vm3098_vm12, 0, %v3097_v26 }
 0x23c   :  { %v1948_v41 = vsub.s32 4, %v4866_v29  ;;  %v2084_v55 = vand.u32 31, %v2082_v59  ;;  %vm1857_vm15 = vcmp.eq.s32.totalorder %v4886_v28, 2  ;;  %v1918_v57 = vadd.s32 %v4822_v54, %v4833_v46 }
 0x23d   :  { %v1934_v27 = vsub.s32 32, %v1933_v60  ;;  %v1938_v45 = vsub.s32 4294967266, %v1933_v60  ;;  %v2021_v58 = vmul.u32 %v2014_v39, %v2005_v38  ;;  %v2024_v15 = vadd.s32 1, %v4904_v44 }
 0x23e   :  { %v2078_v6 = vor.u32 8388608, %v4898_v4  ;;  %v2085_v2 = vsub.s32 32, %v2084_v55  ;;  %v3304_v16 = vpop.eup %3303  ;;  %v1935_v14 = vshll.u32 %v4882_v35, %v1933_v60  ;;  %vm2023_vm0 = vc.u32 %v4909_v63, %v4903_v53  ;;  %v297_v60 = vpop.permute.xlu1 %296 }
 0x23f   :  { %v1936_v32 = vshrl.u32 %v1918_v57, %v1934_v27  ;;  %v1939_v25 = vadd.s32 127, %v1938_v45  ;;  %v3306_v5 = vpop.eup %3305  ;;  %v1858_v10 = vxor.u32 2147483648, %v3304_v16  ;;  %v1949_v54 = vsel %vm1864_vm7, %v1948_v41, %v4866_v29 }
 0x240   :  { %v2025_v46 = vsel %vm2023_vm0, %v2024_v15, %v4904_v44  ;;  %v4926_v19 = vshrl.u32 %v2082_v59, 5  ;;  %v1855_v48 = vxor.u32 2147483648, %v3306_v5  ;;  %v2087_v8 = vshll.u32 %v5680_v1, %v2084_v55 }
 0x241   :  { %v1937_v22 = vor.u32 %v1936_v32, %v1935_v14  ;;  %v1940_v51 = vshll.u32 %v1939_v25, 23  ;;  %v2026_v34 = vadd.s32 %v2025_v46, %v2021_v58  ;;  %v1859_v35 = vsel %vm1857_vm15, %v1858_v10, %v3306_v5 }
 0x242   :  { %v2088_v39 = vshrl.u32 %v5681_v61, %v2085_v2  ;;  %v2091_v4 = vshrl.u32 %v5674_v30, %v2085_v2  ;;  %v1856_v29 = vsel %vm1854_vm14, %v3304_v16, %v1855_v48  ;;  %v2090_v52 = vshll.u32 %v5681_v61, %v2084_v55 }
 0x243   :  { %v1941_v12 = vor.u32 4788187, %v1940_v51  ;;  %v2027_v0 = vadd.s32 536870912, %v2026_v34  ;;  %v1860_v26 = vsel %vm1853_vm10, %v1856_v29, %v1859_v35  ;;  %v1944_v38 = vcvt.s32.f32 %v1937_v22 }
 0x244   :  { %v2094_v50 = vshrl.u32 %v5673_v13, %v2085_v2  ;;  %v2096_v33 = vshll.u32 %v5673_v13, %v2084_v55  ;;  %v1861_v31 = vsel %vm1850_vm13, nan, %v1860_v26  ;;  %v2097_v59 = vshrl.u32 %v3360_v56, %v2085_v2 }
 0x245   :  { %v1942_v44 = vand.u32 2147483647, %v1941_v12  ;;  %v4942_v3 = vshrl.u32 %v2027_v0, 30  ;;  %3020 = vst.msk [vmem:[%s5652_s3 + $0x68] sm:$0xff] %vm3006_vm11, %v1861_v31  ;;  %v2089_v28 = vor.u32 %v2088_v39, %v2087_v8  ;;  %v2092_v41 = vor.u32 %v2091_v4, %v2090_v52 }
 0x246   :  { %v2093_v57 = vshll.u32 %v5674_v30, %v2084_v55  ;;  %v2100_v27 = vshrl.u32 %v5675_v43, %v2085_v2  ;;  %vm4953_vm1 = vcmp.le.f32.partialorder %v1862_v42, 0.7853982  ;;  %v2098_v15 = vor.u32 %v2097_v59, %v2096_v33 }
 0x247   :  { %v1945_v45 = vmul.f32 %v1944_v38, %v1942_v44  ;;  %v2029_v58 = vshll.u32 %v4942_v3, 30  ;;  %v1951_v16 = vsel %vm4953_vm1, 0, %v1949_v54  ;;  %v2099_v32 = vshll.u32 %v3360_v56, %v2084_v55 }
 0x248   :  { %v2095_v14 = vor.u32 %v2094_v50, %v2093_v57  ;;  %v348_v25 = vmul.f32 %v4675_v9, %v297_v60  ;;  %vm2102_vm2 = vcmp.lt.s32.totalorder %v4926_v19, 1  ;;  %vm2105_vm3 = vcmp.lt.s32.totalorder %v4926_v19, 4  ;;  %v301_v60 = vpop.permute.xlu0 %300 }
 0x249   :  { %v1946_v5 = vxor.u32 2147483648, %v1945_v45  ;;  %v4962_v10 = vsub.s32 %v2026_v34, %v2029_v58  ;;  %v2101_v42 = vor.u32 %v2100_v27, %v2099_v32  ;;  %v2110_v46 = vsel %vm2102_vm2, %v2089_v28, %v2092_v41 }
 0x24a   :  { %v2111_v48 = vsel %vm2105_vm3, %v2098_v15, 920167782  ;;  %v2118_v54 = vshll.u32 %v2078_v6, 8  ;;  %v2086_v51 = vshrl.u32 %v5680_v1, %v2085_v2  ;;  %vm2104_vm4 = vcmp.lt.s32.totalorder %v4926_v19, 3 }
 0x24b   :  { %v1947_v55 = vsel %vm1864_vm7, %v1946_v5, %v1945_v45  ;;  %v2032_v22 = vsub.s32 0, %v4962_v10  ;;  %vm2103_vm5 = vcmp.lt.s32.totalorder %v4926_v19, 2  ;;  %v2107_v35 = vsel %vm2105_vm3, %v2095_v14, 2102212464 }
 0x24c   :  { %v1950_v34 = vsel %vm4953_vm1, %v4709_v40, %v1947_v55  ;;  %v2112_v6 = vsel %vm2104_vm4, %v2095_v14, %v2111_v48  ;;  %v2114_v39 = vsel %vm2102_vm2, %v2092_v41, %v2095_v14  ;;  %v2115_v4 = vsel %vm2105_vm3, %v2101_v42, 1326507024 }
 0x24d   :  { %3307 = vcosq.f32 %v1950_v34  ;;  %v3100_v8 = vmin.u32 %v2032_v22, %v4962_v10  ;;  %v2113_v2 = vsel %vm2103_vm5, %v2110_v46, %v2112_v6  ;;  %v1955_v0 = vadd.s32 3, %v1951_v16 }
 0x24e   :  { %3309 = vsinq.f32 %v1950_v34  ;;  %v4990_v29 = vmul.u32.u64.low %v2118_v54, %v2113_v2  ;;  %v4991_v12 = vmul.u32.u64.high %v2118_v54, %v2113_v2, %v4990_v29  ;;  %v2106_v26 = vsel %vm2102_vm2, %v2086_v51, %v2089_v28 }
 0x24f   :  { %v2034_v52 = vclz %v3100_v8  ;;  %v2108_v38 = vsel %vm2104_vm4, %v2092_v41, %v2107_v35  ;;  %v2116_v50 = vsel %vm2104_vm4, %v2098_v15, %v2115_v4  ;;  %v373_v33 = vadd.f32 %v348_v25, %v3528_v11 }
 0x250   :  { %v2052_v44 = vsub.s32 4, %v4942_v3  ;;  %v2117_v59 = vsel %vm2103_vm5, %v2114_v39, %v2116_v50  ;;  %vm5006_vm6 = vcmp.le.f32.partialorder %v1966_v47, 0.7853982  ;;  %vm1968_vm7 = vcmp.lt.s32.totalorder %v4774_v62, 0 }
 0x251   :  { %v3101_v31 = vadd.s32 4294967294, %v2034_v52  ;;  %v5010_v28 = vmul.u32.u64.low %v2118_v54, %v2117_v59  ;;  %v5011_v41 = vmul.u32.u64.high %v2118_v54, %v2117_v59, %v5010_v28  ;;  %v5013_v27 = vmul.f32 30.0, %v373_v33 }
 0x252   :  { %v2109_v11 = vsel %vm2103_vm5, %v2106_v26, %v2108_v38  ;;  %v2128_v7 = vadd.s32 1, %v4991_v12  ;;  %v1956_v45 = vand.u32 3, %v1955_v0  ;;  %v349_v15 = vmul.f32 %v4675_v9, %v301_v60 }
 0x253   :  { %vm3102_vm8 = vcmp.lt.s32.totalorder %v3101_v31, 0  ;;  %v2177_v47 = vand.u32 2139095040, %v5013_v27  ;;  %v2022_v16 = vadd.s32 %v4903_v53, %v4909_v63  ;;  %v2053_v25 = vsel %vm1968_vm7, %v2052_v44, %v4942_v3 }
 0x254   :  { %v2037_v58 = vsel %vm3102_vm8, 0, %v3101_v31  ;;  %v2125_v5 = vmul.u32 %v2118_v54, %v2109_v11  ;;  %vm2127_vm9 = vc.u32 %v5011_v41, %v4990_v29  ;;  %v2174_v19 = vand.u32 2147483647, %v5013_v27  ;;  %v305_v54 = vpop.permute.xlu1 %304 }
 0x255   :  { %v2038_v14 = vsub.s32 32, %v2037_v58  ;;  %v2042_v32 = vsub.s32 4294967266, %v2037_v58  ;;  %v2178_v42 = vshrl.u32 %v2177_v47, 23  ;;  %v2039_v46 = vshll.u32 %v4962_v10, %v2037_v58 }
 0x256   :  { %v2129_v22 = vsel %vm2127_vm9, %v2128_v7, %v4991_v12  ;;  %v2055_v53 = vsel %vm5006_vm6, 0, %v2053_v25  ;;  %v374_v3 = vadd.f32 %v349_v15, %v3539_v18  ;;  %vm1958_vm10 = vcmp.eq.s32.totalorder %v1956_v45, 0 }
 0x257   :  { %v2040_v48 = vshrl.u32 %v2022_v16, %v2038_v14  ;;  %v2043_v55 = vadd.s32 127, %v2042_v32  ;;  %v2130_v63 = vadd.s32 %v2129_v22, %v2125_v5  ;;  %v3107_v51 = vadd.s32 4294967169, %v2178_v42 }
 0x258   :  { %vm1961_vm12 = vcmp.eq.s32.totalorder %v1956_v45, 2  ;;  %v2181_v10 = vand.u32 8388607, %v2174_v19  ;;  %v2059_v0 = vadd.s32 3, %v2055_v53  ;;  %v350_v52 = vmul.f32 %v4675_v9, %v305_v54 }
 0x259   :  { %v2041_v34 = vor.u32 %v2040_v48, %v2039_v46  ;;  %v2044_v35 = vshll.u32 %v2043_v55, 23  ;;  %v2131_v8 = vadd.s32 536870912, %v2130_v63  ;;  %v2184_v2 = vadd.s32 1, %v3107_v51 }
 0x25a   :  { %v3308_v6 = vpop.eup %3307  ;;  %v5037_v18 = vmul.f32 30.0, %v374_v3  ;;  %vm1957_vm14 = vcmp.lt.s32.totalorder %v1956_v45, 2  ;;  %v2182_v28 = vor.u32 8388608, %v2181_v10  ;;  %vm1954_vm15 = vweird.f32 %v4709_v40 }
 0x25b   :  { %v3310_v39 = vpop.eup %3309  ;;  %v1962_v4 = vxor.u32 2147483648, %v3308_v6  ;;  %v2045_v12 = vor.u32 4788187, %v2044_v35  ;;  %v2132_v38 = vshrl.u32 %v2131_v8, 30  ;;  %vm2185_vm13 = vcmp.gt.s32.totalorder %v2184_v2, 0 }
 0x25c   :  { %v1959_v26 = vxor.u32 2147483648, %v3310_v39  ;;  %v2048_v31 = vcvt.s32.f32 %v2041_v34  ;;  %v2186_v44 = vsel %vm2185_vm13, %v2184_v2, 0  ;;  %v5041_v47 = vand.u32 3, %v2059_v0 }
 0x25d   :  { %v1963_v50 = vsel %vm1961_vm12, %v1962_v4, %v3310_v39  ;;  %v2046_v33 = vand.u32 2147483647, %v2045_v12  ;;  %v2133_v60 = vshll.u32 %v2132_v38, 30  ;;  %v2188_v58 = vand.u32 31, %v2186_v44 }
 0x25e   :  { %v1960_v59 = vsel %vm1958_vm10, %v3308_v6, %v1959_v26  ;;  %vm2072_vm0 = vcmp.lt.s32.totalorder %v4842_v21, 0  ;;  %v2281_v14 = vand.u32 2139095040, %v5037_v18  ;;  %v5050_v40 = vadd.f32 %v350_v52, %v3536_v17 }
 0x25f   :  { %v1964_v11 = vsel %vm1957_vm14, %v1960_v59, %v1963_v50  ;;  %v2049_v7 = vmul.f32 %v2048_v31, %v2046_v33  ;;  %v2134_v15 = vsub.s32 %v2130_v63, %v2133_v60  ;;  %v2189_v16 = vsub.s32 32, %v2188_v58 }
 0x260   :  { %v1965_v9 = vsel %vm1954_vm15, nan, %v1964_v11  ;;  %v2126_v32 = vadd.s32 %v4990_v29, %v5011_v41  ;;  %v2156_v5 = vsub.s32 4, %v2132_v38  ;;  %v5054_v42 = vshll.u32 %v2182_v28, 8 }
 0x261   :  { %3021 = vst.msk [vmem:[%s5652_s3 + $0x70] sm:$0xff] %vm3006_vm11, %v1965_v9  ;;  %v2050_v45 = vxor.u32 2147483648, %v2049_v7  ;;  %v2136_v25 = vsub.s32 0, %v2134_v15  ;;  %v2187_v48 = vshrl.u32 %v2186_v44, 5  ;;  %v2192_v55 = vshrl.u32 %v5681_v61, %v2189_v16 }
 0x262   :  { %v2195_v22 = vshrl.u32 %v5674_v30, %v2189_v16  ;;  %v2191_v63 = vshll.u32 %v5680_v1, %v2188_v58  ;;  %v2198_v29 = vshrl.u32 %v5673_v13, %v2189_v16  ;;  %v2194_v41 = vshll.u32 %v5681_v61, %v2188_v58 }
 0x263   :  { %v2051_v46 = vsel %vm1968_vm7, %v2050_v45, %v2049_v7  ;;  %v3104_v53 = vmin.u32 %v2136_v25, %v2134_v15  ;;  %v2197_v51 = vshll.u32 %v5674_v30, %v2188_v58  ;;  %v2282_v3 = vshrl.u32 %v2281_v14, 23 }
 0x264   :  { %v2054_v17 = vsel %vm5006_vm6, %v4774_v62, %v2051_v46  ;;  %v5069_v34 = vsel %vm2072_vm0, %v2156_v5, %v2132_v38  ;;  %v2193_v35 = vor.u32 %v2192_v55, %v2191_v63  ;;  %v2196_v57 = vor.u32 %v2195_v22, %v2194_v41 }
 0x265   :  { %3311 = vcosq.f32 %v2054_v17  ;;  %v2138_v54 = vclz %v3104_v53  ;;  %v2199_v6 = vor.u32 %v2198_v29, %v2197_v51  ;;  %v2200_v8 = vshll.u32 %v5673_v13, %v2188_v58 }
 0x266   :  { %3313 = vsinq.f32 %v2054_v17  ;;  %v2201_v10 = vshrl.u32 %v3360_v56, %v2189_v16  ;;  %v2203_v39 = vshll.u32 %v3360_v56, %v2188_v58  ;;  %v2204_v4 = vshrl.u32 %v5675_v43, %v2189_v16 }
 0x267   :  { %v3105_v2 = vadd.s32 4294967294, %v2138_v54  ;;  %vm2206_vm1 = vcmp.lt.s32.totalorder %v2187_v48, 1  ;;  %v2190_v12 = vshrl.u32 %v5680_v1, %v2189_v16  ;;  %vm2207_vm2 = vcmp.lt.s32.totalorder %v2187_v48, 2 }
 0x268   :  { %v2202_v0 = vor.u32 %v2201_v10, %v2200_v8  ;;  %vm2209_vm3 = vcmp.lt.s32.totalorder %v2187_v48, 4  ;;  %v2205_v52 = vor.u32 %v2204_v4, %v2203_v39  ;;  %vm2208_vm5 = vcmp.lt.s32.totalorder %v2187_v48, 3 }
 0x269   :  { %vm3106_vm4 = vcmp.lt.s32.totalorder %v3105_v2, 0  ;;  %v2211_v26 = vsel %vm2209_vm3, %v2199_v6, 2102212464  ;;  %v2210_v50 = vsel %vm2206_vm1, %v2190_v12, %v2193_v35  ;;  %v2214_v33 = vsel %vm2206_vm1, %v2193_v35, %v2196_v57 }
 0x26a   :  { %v2141_v38 = vsel %vm3106_vm4, 0, %v3105_v2  ;;  %v2215_v31 = vsel %vm2209_vm3, %v2202_v0, 920167782  ;;  %v2212_v60 = vsel %vm2208_vm5, %v2196_v57, %v2211_v26  ;;  %v2218_v28 = vsel %vm2206_vm1, %v2196_v57, %v2199_v6  ;;  %v309_v2 = vpop.permute.xlu0 %308 }
 0x26b   :  { %v2142_v44 = vsub.s32 32, %v2141_v38  ;;  %v2146_v59 = vsub.s32 4294967266, %v2141_v38  ;;  %v2143_v11 = vshll.u32 %v2134_v15, %v2141_v38  ;;  %v2216_v7 = vsel %vm2208_vm5, %v2199_v6, %v2215_v31 }
 0x26c   :  { %v2219_v58 = vsel %vm2209_vm3, %v2205_v52, 1326507024  ;;  %v3111_v9 = vadd.s32 4294967169, %v2282_v3  ;;  %v2217_v14 = vsel %vm2207_vm2, %v2214_v33, %v2216_v7  ;;  %v2213_v5 = vsel %vm2207_vm2, %v2210_v50, %v2212_v60  ;;  %v5122_v50 = vld [vmem:[%s5650_s1 + $0x1] ss:$0 sm:$0xff] }
 0x26d   :  { %v2144_v45 = vshrl.u32 %v2126_v32, %v2142_v44  ;;  %v2147_v16 = vadd.s32 127, %v2146_v59  ;;  %v2220_v25 = vsel %vm2208_vm5, %v2202_v0, %v2219_v58  ;;  %vm2062_vm6 = vcmp.eq.s32.totalorder %v5041_v47, 0 }
 0x26e   :  { %v2221_v46 = vsel %vm2207_vm2, %v2218_v28, %v2220_v25  ;;  %v5086_v55 = vmul.u32.u64.low %v5054_v42, %v2217_v14  ;;  %v5087_v22 = vmul.u32.u64.high %v5054_v42, %v2217_v14, %v5086_v55  ;;  %vm5097_vm7 = vcmp.le.f32.partialorder %v2070_v20, 0.7853982 }
 0x26f   :  { %v2145_v15 = vor.u32 %v2144_v45, %v2143_v11  ;;  %v2148_v17 = vshll.u32 %v2147_v16, 23  ;;  %v5091_v53 = vmul.u32.u64.low %v5054_v42, %v2221_v46  ;;  %v5092_v63 = vmul.u32.u64.high %v5054_v42, %v2221_v46, %v5091_v53 }
 0x270   :  { %v2288_v48 = vadd.s32 1, %v3111_v9  ;;  %v5102_v29 = vmul.f32 30.0, %v5050_v40  ;;  %vm2065_vm8 = vcmp.eq.s32.totalorder %v5041_v47, 2  ;;  %v2159_v3 = vsel %vm5097_vm7, 0, %v5069_v34 }
 0x271   :  { %v2149_v51 = vor.u32 4788187, %v2148_v17  ;;  %v2278_v54 = vand.u32 2147483647, %v5037_v18  ;;  %v2229_v20 = vmul.u32 %v5054_v42, %v2213_v5  ;;  %v2232_v6 = vadd.s32 1, %v5087_v22 }
 0x272   :  { %v3312_v41 = vpop.eup %3311  ;;  %vm2289_vm9 = vcmp.gt.s32.totalorder %v2288_v48, 0  ;;  %v2152_v10 = vcvt.s32.f32 %v2145_v15  ;;  %vm2231_vm10 = vc.u32 %v5092_v63, %v5086_v55  ;;  %v2385_v12 = vand.u32 2139095040, %v5102_v29 }
 0x273   :  { %v3314_v35 = vpop.eup %3313  ;;  %v2066_v57 = vxor.u32 2147483648, %v3312_v41  ;;  %v2150_v40 = vand.u32 2147483647, %v2149_v51  ;;  %v2233_v4 = vsel %vm2231_vm10, %v2232_v6, %v5087_v22  ;;  %v2290_v34 = vsel %vm2289_vm9, %v2288_v48, 0 }
 0x274   :  { %v2063_v8 = vxor.u32 2147483648, %v3314_v35  ;;  %vm2061_vm12 = vcmp.lt.s32.totalorder %v5041_v47, 2  ;;  %v2234_v52 = vadd.s32 %v2233_v4, %v2229_v20  ;;  %vm2058_vm13 = vweird.f32 %v4774_v62 }
 0x275   :  { %v2067_v39 = vsel %vm2065_vm8, %v2066_v57, %v3314_v35  ;;  %v2153_v0 = vmul.f32 %v2152_v10, %v2150_v40  ;;  %v2292_v38 = vand.u32 31, %v2290_v34  ;;  %v5125_v33 = vmul.f32 %v5122_v50, %v309_v2 }
 0x276   :  { %v2064_v42 = vsel %vm2062_vm6, %v3312_v41, %v2063_v8  ;;  %v2163_v59 = vadd.s32 3, %v2159_v3  ;;  %v2235_v60 = vadd.s32 536870912, %v2234_v52  ;;  %v2285_v62 = vand.u32 8388607, %v2278_v54 }
 0x277   :  { %v2068_v26 = vsel %vm2061_vm12, %v2064_v42, %v2067_v39  ;;  %v2154_v44 = vxor.u32 2147483648, %v2153_v0  ;;  %v2291_v47 = vshrl.u32 %v2290_v34, 5  ;;  %v2293_v28 = vsub.s32 32, %v2292_v38 }
 0x278   :  { %v2069_v31 = vsel %vm2058_vm13, nan, %v2068_v26  ;;  %v2386_v11 = vshrl.u32 %v2385_v12, 23  ;;  %v5135_v58 = vshrl.u32 %v2235_v60, 30  ;;  %v2295_v9 = vshll.u32 %v5680_v1, %v2292_v38 }
 0x279   :  { %3022 = vst.msk [vmem:[%s5652_s3 + $0x78] sm:$0xff] %vm3006_vm11, %v2069_v31  ;;  %v2155_v7 = vsel %vm2072_vm0, %v2154_v44, %v2153_v0  ;;  %v2298_v45 = vshll.u32 %v5681_v61, %v2292_v38  ;;  %v2296_v14 = vshrl.u32 %v5681_v61, %v2293_v28  ;;  %v2299_v25 = vshrl.u32 %v5674_v30, %v2293_v28 }
 0x27a   :  { %v2158_v16 = vsel %vm5097_vm7, %v4842_v21, %v2155_v7  ;;  %v2301_v5 = vshll.u32 %v5674_v30, %v2292_v38  ;;  %v2237_v46 = vshll.u32 %v5135_v58, 30  ;;  %v2302_v22 = vshrl.u32 %v5673_v13, %v2293_v28 }
 0x27b   :  { %3315 = vcosq.f32 %v2158_v16  ;;  %v2304_v15 = vshll.u32 %v5673_v13, %v2292_v38  ;;  %v2297_v17 = vor.u32 %v2296_v14, %v2295_v9  ;;  %v2300_v53 = vor.u32 %v2299_v25, %v2298_v45 }
 0x27c   :  { %3317 = vsinq.f32 %v2158_v16  ;;  %v2305_v48 = vshrl.u32 %v3360_v56, %v2293_v28  ;;  %v5149_v32 = vsub.s32 %v2234_v52, %v2237_v46  ;;  %v2303_v41 = vor.u32 %v2302_v22, %v2301_v5 }
 0x27d   :  { %v2307_v51 = vshll.u32 %v3360_v56, %v2292_v38  ;;  %v2308_v3 = vshrl.u32 %v5675_v43, %v2293_v28  ;;  %v5153_v35 = vand.u32 3, %v2163_v59  ;;  %v2286_v57 = vor.u32 8388608, %v2285_v62 }
 0x27e   :  { %v2306_v20 = vor.u32 %v2305_v48, %v2304_v15  ;;  %v3115_v6 = vadd.s32 4294967169, %v2386_v11  ;;  %v2240_v8 = vsub.s32 0, %v5149_v32  ;;  %vm2310_vm14 = vcmp.lt.s32.totalorder %v2291_v47, 1 }
 0x27f   :  { %v2309_v40 = vor.u32 %v2308_v3, %v2307_v51  ;;  %vm2313_vm15 = vcmp.lt.s32.totalorder %v2291_v47, 4  ;;  %v2294_v10 = vshrl.u32 %v5680_v1, %v2293_v28  ;;  %vm2312_vm0 = vcmp.lt.s32.totalorder %v2291_v47, 3 }
 0x280   :  { %v2318_v2 = vsel %vm2310_vm14, %v2297_v17, %v2300_v53  ;;  %v2319_v39 = vsel %vm2313_vm15, %v2306_v20, 920167782  ;;  %v3108_v4 = vmin.u32 %v2240_v8, %v5149_v32  ;;  %vm2311_vm1 = vcmp.lt.s32.totalorder %v2291_v47, 2 }
 0x281   :  { %v2315_v34 = vsel %vm2313_vm15, %v2303_v41, 2102212464  ;;  %v2320_v12 = vsel %vm2312_vm0, %v2303_v41, %v2319_v39  ;;  %v2322_v0 = vsel %vm2310_vm14, %v2300_v53, %v2303_v41  ;;  %v2323_v52 = vsel %vm2313_vm15, %v2309_v40, 1326507024 }
 0x282   :  { %v2321_v42 = vsel %vm2311_vm1, %v2318_v2, %v2320_v12  ;;  %v2326_v26 = vshll.u32 %v2286_v57, 8  ;;  %v2242_v38 = vclz %v3108_v4  ;;  %v2314_v31 = vsel %vm2310_vm14, %v2294_v10, %v2297_v17 }
 0x283   :  { %v2382_v44 = vand.u32 2147483647, %v5102_v29  ;;  %v2316_v59 = vsel %vm2312_vm0, %v2300_v53, %v2315_v34  ;;  %v2324_v60 = vsel %vm2312_vm0, %v2306_v20, %v2323_v52  ;;  %vm2162_vm2 = vweird.f32 %v4842_v21 }
 0x284   :  { %v5160_v62 = vmul.u32.u64.low %v2326_v26, %v2321_v42  ;;  %v5161_v28 = vmul.u32.u64.high %v2326_v26, %v2321_v42, %v5160_v62  ;;  %v3109_v11 = vadd.s32 4294967294, %v2242_v38  ;;  %v2325_v7 = vsel %vm2311_vm1, %v2322_v0, %v2324_v60 }
 0x285   :  { %v2392_v9 = vadd.s32 1, %v3115_v6  ;;  %vm2166_vm3 = vcmp.eq.s32.totalorder %v5153_v35, 0  ;;  %v5167_v45 = vmul.u32.u64.low %v2326_v26, %v2325_v7  ;;  %v5168_v16 = vmul.u32.u64.high %v2326_v26, %v2325_v7, %v5167_v45 }
 0x286   :  { %v5172_v14 = vadd.f32 %v5125_v33, %v3547_v24  ;;  %vm2169_vm4 = vcmp.eq.s32.totalorder %v5153_v35, 2  ;;  %vm3110_vm5 = vcmp.lt.s32.totalorder %v3109_v11, 0  ;;  %v2317_v25 = vsel %vm2311_vm1, %v2314_v31, %v2316_v59 }
 0x287   :  { %vm2393_vm6 = vcmp.gt.s32.totalorder %v2392_v9, 0  ;;  %v2230_v46 = vadd.s32 %v5086_v55, %v5092_v63  ;;  %v2245_v22 = vsel %vm3110_vm5, 0, %v3109_v11  ;;  %v2336_v15 = vadd.s32 1, %v5161_v28 }
 0x288   :  { %v3316_v5 = vpop.eup %3315  ;;  %v2389_v17 = vand.u32 8388607, %v2382_v44  ;;  %vm2176_vm7 = vcmp.lt.s32.totalorder %v5013_v27, 0  ;;  %v2246_v24 = vsub.s32 32, %v2245_v22  ;;  %v2250_v33 = vsub.s32 4294967266, %v2245_v22 }
 0x289   :  { %v3318_v53 = vpop.eup %3317  ;;  %v2170_v48 = vxor.u32 2147483648, %v3316_v5  ;;  %v2394_v41 = vsel %vm2393_vm6, %v2392_v9, 0  ;;  %v2247_v51 = vshll.u32 %v5149_v32, %v2245_v22  ;;  %v2333_v3 = vmul.u32 %v2326_v26, %v2317_v25 }
 0x28a   :  { %v2167_v47 = vxor.u32 2147483648, %v3318_v53  ;;  %vm2335_vm8 = vc.u32 %v5168_v16, %v5160_v62  ;;  %v2248_v63 = vshrl.u32 %v2230_v46, %v2246_v24  ;;  %v2251_v57 = vadd.s32 127, %v2250_v33 }
 0x28b   :  { %v2171_v55 = vsel %vm2169_vm4, %v2170_v48, %v3318_v53  ;;  %v2337_v20 = vsel %vm2335_vm8, %v2336_v15, %v5161_v28  ;;  %vm2165_vm9 = vcmp.lt.s32.totalorder %v5153_v35, 2  ;;  %v2396_v40 = vand.u32 31, %v2394_v41 }
 0x28c   :  { %v2168_v6 = vsel %vm2166_vm3, %v3316_v5, %v2167_v47  ;;  %v2338_v8 = vadd.s32 %v2337_v20, %v2333_v3  ;;  %vm5193_vm10 = vcmp.le.f32.partialorder %v2174_v19, 0.7853982  ;;  %v2249_v2 = vor.u32 %v2248_v63, %v2247_v51 }
 0x28d   :  { %v2172_v10 = vsel %vm2165_vm9, %v2168_v6, %v2171_v55  ;;  %v2252_v39 = vshll.u32 %v2251_v57, 23  ;;  %v2260_v34 = vsub.s32 4, %v5135_v58  ;;  %v2397_v42 = vsub.s32 32, %v2396_v40 }
 0x28e   :  { %v2173_v4 = vsel %vm2162_vm2, nan, %v2172_v10  ;;  %v2339_v12 = vadd.s32 536870912, %v2338_v8  ;;  %v2256_v0 = vcvt.s32.f32 %v2249_v2  ;;  %v2390_v19 = vor.u32 8388608, %v2389_v17 }
 0x28f   :  { %3023 = vst.msk [vmem:[%s5652_s3 + $0x80] sm:$0xff] %vm3006_vm11, %v2173_v4  ;;  %v2253_v35 = vor.u32 4788187, %v2252_v39  ;;  %v2399_v52 = vshll.u32 %v5680_v1, %v2396_v40  ;;  %v2400_v38 = vshrl.u32 %v5681_v61, %v2397_v42  ;;  %v2402_v21 = vshll.u32 %v5681_v61, %v2396_v40 }
 0x290   :  { %v5205_v26 = vshrl.u32 %v2339_v12, 30  ;;  %v2403_v31 = vshrl.u32 %v5674_v30, %v2397_v42  ;;  %v2406_v60 = vshrl.u32 %v5673_v13, %v2397_v42  ;;  %v2408_v28 = vshll.u32 %v5673_v13, %v2396_v40 }
 0x291   :  { %v2254_v59 = vand.u32 2147483647, %v2253_v35  ;;  %v2409_v11 = vshrl.u32 %v3360_v56, %v2397_v42  ;;  %v2261_v7 = vsel %vm2176_vm7, %v2260_v34, %v5135_v58  ;;  %v2395_v45 = vshrl.u32 %v2394_v41, 5 }
 0x292   :  { %v2341_v9 = vshll.u32 %v5205_v26, 30  ;;  %v2405_v25 = vshll.u32 %v5674_v30, %v2396_v40  ;;  %v2401_v46 = vor.u32 %v2400_v38, %v2399_v52  ;;  %v2404_v22 = vor.u32 %v2403_v31, %v2402_v21 }
 0x293   :  { %v2257_v5 = vmul.f32 %v2256_v0, %v2254_v59  ;;  %v2410_v15 = vor.u32 %v2409_v11, %v2408_v28  ;;  %v2411_v48 = vshll.u32 %v3360_v56, %v2396_v40  ;;  %v2412_v24 = vshrl.u32 %v5675_v43, %v2397_v42 }
 0x294   :  { %v5218_v17 = vsub.s32 %v2338_v8, %v2341_v9  ;;  %v2407_v53 = vor.u32 %v2406_v60, %v2405_v25  ;;  %v2263_v58 = vsel %vm5193_vm10, 0, %v2261_v7  ;;  %v2430_v47 = vshll.u32 %v2390_v19, 8 }
 0x295   :  { %v2258_v33 = vxor.u32 2147483648, %v2257_v5  ;;  %v5225_v41 = vmul.f32 30.0, %v5172_v14  ;;  %v2413_v3 = vor.u32 %v2412_v24, %v2411_v48  ;;  %vm2414_vm12 = vcmp.lt.s32.totalorder %v2395_v45, 1 }
 0x296   :  { %v2344_v51 = vsub.s32 0, %v5218_v17  ;;  %vm2417_vm13 = vcmp.lt.s32.totalorder %v2395_v45, 4  ;;  %v2398_v63 = vshrl.u32 %v5680_v1, %v2397_v42  ;;  %vm2416_vm14 = vcmp.lt.s32.totalorder %v2395_v45, 3 }
 0x297   :  { %v2259_v55 = vsel %vm2176_vm7, %v2258_v33, %v2257_v5  ;;  %v2423_v57 = vsel %vm2417_vm13, %v2410_v15, 920167782  ;;  %v2419_v14 = vsel %vm2417_vm13, %v2407_v53, 2102212464  ;;  %v2422_v8 = vsel %vm2414_vm12, %v2401_v46, %v2404_v22 }
 0x298   :  { %v2262_v20 = vsel %vm5193_vm10, %v5013_v27, %v2259_v55  ;;  %v3112_v6 = vmin.u32 %v2344_v51, %v5218_v17  ;;  %v2424_v40 = vsel %vm2416_vm14, %v2407_v53, %v2423_v57  ;;  %v2426_v10 = vsel %vm2414_vm12, %v2404_v22, %v2407_v53 }
 0x299   :  { %3319 = vcosq.f32 %v2262_v20  ;;  %v2427_v2 = vsel %vm2417_vm13, %v2413_v3, 1326507024  ;;  %v2364_v4 = vsub.s32 4, %v5205_v26  ;;  %vm2415_vm15 = vcmp.lt.s32.totalorder %v2395_v45, 2 }
 0x29a   :  { %3321 = vsinq.f32 %v2262_v20  ;;  %v2346_v39 = vclz %v3112_v6  ;;  %v2418_v34 = vsel %vm2414_vm12, %v2398_v63, %v2401_v46  ;;  %v2420_v32 = vsel %vm2416_vm14, %v2404_v22, %v2419_v14 }
 0x29b   :  { %v2425_v12 = vsel %vm2415_vm15, %v2422_v8, %v2424_v40  ;;  %v2428_v42 = vsel %vm2416_vm14, %v2410_v15, %v2427_v2  ;;  %v2267_v38 = vadd.s32 3, %v2263_v58  ;;  %v2489_v59 = vand.u32 2139095040, %v5225_v41 }
 0x29c   :  { %v3113_v35 = vadd.s32 4294967294, %v2346_v39  ;;  %v2429_v0 = vsel %vm2415_vm15, %v2426_v10, %v2428_v42  ;;  %v5242_v19 = vmul.u32.u64.low %v2430_v47, %v2425_v12  ;;  %v5243_v52 = vmul.u32.u64.high %v2430_v47, %v2425_v12, %v5242_v19  ;;  %v317_v39 = vpop.permute.xlu0 %316 }
 0x29d   :  { %v5245_v21 = vmul.u32.u64.low %v2430_v47, %v2429_v0  ;;  %v5246_v31 = vmul.u32.u64.high %v2430_v47, %v2429_v0, %v5245_v21  ;;  %vm5251_vm0 = vcmp.le.f32.partialorder %v2278_v54, 0.7853982  ;;  %vm2280_vm1 = vcmp.lt.s32.totalorder %v5037_v18, 0 }
 0x29e   :  { %vm3114_vm2 = vcmp.lt.s32.totalorder %v3113_v35, 0  ;;  %v2421_v28 = vsel %vm2415_vm15, %v2418_v34, %v2420_v32  ;;  %v2334_v11 = vadd.s32 %v5160_v62, %v5168_v16  ;;  %v2486_v9 = vand.u32 2147483647, %v5225_v41 }
 0x29f   :  { %v2349_v7 = vsel %vm3114_vm2, 0, %v3113_v35  ;;  %v2490_v45 = vshrl.u32 %v2489_v59, 23  ;;  %v2365_v54 = vsel %vm2280_vm1, %v2364_v4, %v5205_v26  ;;  %v2440_v46 = vadd.s32 1, %v5243_v52 }
 0x2a0   :  { %v2350_v25 = vsub.s32 32, %v2349_v7  ;;  %v2354_v5 = vsub.s32 4294967266, %v2349_v7  ;;  %v2268_v22 = vand.u32 3, %v2267_v38  ;;  %v2437_v15 = vmul.u32 %v2430_v47, %v2421_v28 }
 0x2a1   :  { %vm2439_vm3 = vc.u32 %v5246_v31, %v5242_v19  ;;  %v3119_v53 = vadd.s32 4294967169, %v2490_v45  ;;  %v2351_v48 = vshll.u32 %v5218_v17, %v2349_v7  ;;  %v2367_v33 = vsel %vm5251_vm0, 0, %v2365_v54  ;;  %v313_v17 = vpop.permute.xlu1 %312 }
 0x2a2   :  { %v2352_v62 = vshrl.u32 %v2334_v11, %v2350_v25  ;;  %v2355_v16 = vadd.s32 127, %v2354_v5  ;;  %v2441_v24 = vsel %vm2439_vm3, %v2440_v46, %v5243_v52  ;;  %v2493_v26 = vand.u32 8388607, %v2486_v9 }
 0x2a3   :  { %v2442_v58 = vadd.s32 %v2441_v24, %v2437_v15  ;;  %v2496_v51 = vadd.s32 1, %v3119_v53  ;;  %vm2266_vm4 = vweird.f32 %v5013_v27  ;;  %vm2269_vm5 = vcmp.lt.s32.totalorder %v2268_v22, 2 }
 0x2a4   :  { %v2353_v3 = vor.u32 %v2352_v62, %v2351_v48  ;;  %v2356_v55 = vshll.u32 %v2355_v16, 23  ;;  %vm2273_vm7 = vcmp.eq.s32.totalorder %v2268_v22, 2  ;;  %v2371_v20 = vadd.s32 3, %v2367_v33 }
 0x2a5   :  { %v2443_v47 = vadd.s32 536870912, %v2442_v58  ;;  %vm2497_vm6 = vcmp.gt.s32.totalorder %v2496_v51, 0  ;;  %v2494_v10 = vor.u32 8388608, %v2493_v26  ;;  %v352_v12 = vmul.f32 %v5122_v50, %v313_v17 }
 0x2a6   :  { %v3320_v63 = vpop.eup %3319  ;;  %v2357_v57 = vor.u32 4788187, %v2356_v55  ;;  %v2498_v6 = vsel %vm2497_vm6, %v2496_v51, 0  ;;  %v2360_v32 = vcvt.s32.f32 %v2353_v3  ;;  %vm2270_vm8 = vcmp.eq.s32.totalorder %v2268_v22, 0 }
 0x2a7   :  { %v3322_v14 = vpop.eup %3321  ;;  %v2274_v8 = vxor.u32 2147483648, %v3320_v63  ;;  %v5271_v40 = vshrl.u32 %v2443_v47, 30  ;;  %v2500_v2 = vand.u32 31, %v2498_v6  ;;  %v5275_v21 = vand.u32 3, %v2371_v20 }
 0x2a8   :  { %v2271_v4 = vxor.u32 2147483648, %v3322_v14  ;;  %v2358_v34 = vand.u32 2147483647, %v2357_v57  ;;  %v353_v59 = vmul.f32 %v5122_v50, %v317_v39  ;;  %v2438_v11 = vadd.s32 %v5242_v19, %v5246_v31 }
 0x2a9   :  { %v2275_v42 = vsel %vm2273_vm7, %v2274_v8, %v3322_v14  ;;  %v2445_v35 = vshll.u32 %v5271_v40, 30  ;;  %v2501_v0 = vsub.s32 32, %v2500_v2  ;;  %v5282_v45 = vshll.u32 %v2494_v10, 8 }
 0x2aa   :  { %v2272_v52 = vsel %vm2270_vm8, %v3320_v63, %v2271_v4  ;;  %v2361_v38 = vmul.f32 %v2360_v32, %v2358_v34  ;;  %v377_v46 = vadd.f32 %v352_v12, %v3544_v23  ;;  %v2499_v19 = vshrl.u32 %v2498_v6, 5 }
 0x2ab   :  { %v2276_v28 = vsel %vm2269_vm5, %v2272_v52, %v2275_v42  ;;  %v5280_v7 = vsub.s32 %v2442_v58, %v2445_v35  ;;  %v2504_v54 = vshrl.u32 %v5681_v61, %v2501_v0  ;;  %v2503_v31 = vshll.u32 %v5680_v1, %v2500_v2 }
 0x2ac   :  { %v2277_v25 = vsel %vm2266_vm4, nan, %v2276_v28  ;;  %v2362_v5 = vxor.u32 2147483648, %v2361_v38  ;;  %v2507_v15 = vshrl.u32 %v5674_v30, %v2501_v0  ;;  %v2506_v53 = vshll.u32 %v5681_v61, %v2500_v2 }
 0x2ad   :  { %3024 = vst.msk [vmem:[%s5652_s3 + $0x88] sm:$0xff] %vm3006_vm11, %v2277_v25  ;;  %v2448_v22 = vsub.s32 0, %v5280_v7  ;;  %v2509_v48 = vshll.u32 %v5674_v30, %v2500_v2  ;;  %v2510_v23 = vshrl.u32 %v5673_v13, %v2501_v0  ;;  %v2505_v24 = vor.u32 %v2504_v54, %v2503_v31 }
 0x2ae   :  { %v2363_v27 = vsel %vm2280_vm1, %v2362_v5, %v2361_v38  ;;  %v2512_v33 = vshll.u32 %v5673_v13, %v2500_v2  ;;  %v2508_v58 = vor.u32 %v2507_v15, %v2506_v53  ;;  %v2513_v51 = vshrl.u32 %v3360_v56, %v2501_v0 }
 0x2af   :  { %v2366_v62 = vsel %vm5251_vm0, %v5037_v18, %v2363_v27  ;;  %v3116_v16 = vmin.u32 %v2448_v22, %v5280_v7  ;;  %v2511_v26 = vor.u32 %v2510_v23, %v2509_v48  ;;  %vm2384_vm9 = vcmp.lt.s32.totalorder %v5102_v29, 0 }
 0x2b0   :  { %3323 = vcosq.f32 %v2366_v62  ;;  %v5307_v55 = vmul.f32 30.0, %v377_v46  ;;  %v378_v47 = vadd.f32 %v353_v59, %v3557_v37  ;;  %v2468_v60 = vsub.s32 4, %v5271_v40 }
 0x2b1   :  { %3325 = vsinq.f32 %v2366_v62  ;;  %v2450_v3 = vclz %v3116_v16  ;;  %v2514_v17 = vor.u32 %v2513_v51, %v2512_v33  ;;  %v2515_v63 = vshll.u32 %v3360_v56, %v2500_v2 }
 0x2b2   :  { %v2516_v57 = vshrl.u32 %v5675_v43, %v2501_v0  ;;  %v2502_v6 = vshrl.u32 %v5680_v1, %v2501_v0  ;;  %vm2518_vm10 = vcmp.lt.s32.totalorder %v2499_v19, 1  ;;  %vm2521_vm12 = vcmp.lt.s32.totalorder %v2499_v19, 4 }
 0x2b3   :  { %v3117_v20 = vadd.s32 4294967294, %v2450_v3  ;;  %vm2519_vm13 = vcmp.lt.s32.totalorder %v2499_v19, 2  ;;  %v2523_v8 = vsel %vm2521_vm12, %v2511_v26, 2102212464  ;;  %v2526_v10 = vsel %vm2518_vm10, %v2505_v24, %v2508_v58 }
 0x2b4   :  { %v2517_v14 = vor.u32 %v2516_v57, %v2515_v63  ;;  %vm2520_vm15 = vcmp.lt.s32.totalorder %v2499_v19, 3  ;;  %v2522_v39 = vsel %vm2518_vm10, %v2502_v6, %v2505_v24  ;;  %v2527_v37 = vsel %vm2521_vm12, %v2514_v17, 920167782 }
 0x2b5   :  { %vm3118_vm14 = vcmp.lt.s32.totalorder %v3117_v20, 0  ;;  %v2528_v34 = vsel %vm2520_vm15, %v2511_v26, %v2527_v37  ;;  %v2530_v32 = vsel %vm2518_vm10, %v2508_v58, %v2511_v26  ;;  %v2524_v35 = vsel %vm2520_vm15, %v2508_v58, %v2523_v8 }
 0x2b6   :  { %v2453_v4 = vsel %vm3118_vm14, 0, %v3117_v20  ;;  %v2531_v12 = vsel %vm2521_vm12, %v2517_v14, 1326507024  ;;  %v2529_v52 = vsel %vm2519_vm13, %v2526_v10, %v2528_v34  ;;  %v2593_v46 = vand.u32 2139095040, %v5307_v55 }
 0x2b7   :  { %v2454_v2 = vsub.s32 32, %v2453_v4  ;;  %v2458_v42 = vsub.s32 4294967266, %v2453_v4  ;;  %v2455_v0 = vshll.u32 %v5280_v7, %v2453_v4  ;;  %v2532_v38 = vsel %vm2520_vm15, %v2514_v17, %v2531_v12  ;;  %v321_v4 = vpop.permute.xlu1 %320 }
 0x2b8   :  { %v5317_v59 = vmul.u32.u64.low %v5282_v45, %v2529_v52  ;;  %v5318_v28 = vmul.u32.u64.high %v5282_v45, %v2529_v52, %v5317_v59  ;;  %v2533_v54 = vsel %vm2519_vm13, %v2530_v32, %v2532_v38  ;;  %vm2370_vm0 = vweird.f32 %v5037_v18 }
 0x2b9   :  { %v2456_v25 = vshrl.u32 %v2438_v11, %v2454_v2  ;;  %v2459_v5 = vadd.s32 127, %v2458_v42  ;;  %vm5326_vm1 = vcmp.le.f32.partialorder %v2382_v44, 0.7853982  ;;  %v2469_v7 = vsel %vm2384_vm9, %v2468_v60, %v5271_v40 }
 0x2ba   :  { %v5334_v31 = vmul.u32.u64.low %v5282_v45, %v2533_v54  ;;  %v5335_v11 = vmul.u32.u64.high %v5282_v45, %v2533_v54, %v5334_v31  ;;  %v2525_v53 = vsel %vm2519_vm13, %v2522_v39, %v2524_v35  ;;  %v2594_v48 = vshrl.u32 %v2593_v46, 23 }
 0x2bb   :  { %v2457_v15 = vor.u32 %v2456_v25, %v2455_v0  ;;  %v2460_v27 = vshll.u32 %v2459_v5, 23  ;;  %vm2373_vm2 = vcmp.lt.s32.totalorder %v5275_v21, 2  ;;  %vm2377_vm3 = vcmp.eq.s32.totalorder %v5275_v21, 2 }
 0x2bc   :  { %v2544_v44 = vadd.s32 1, %v5318_v28  ;;  %v5341_v23 = vmul.f32 30.0, %v378_v47  ;;  %v2471_v40 = vsel %vm5326_vm1, 0, %v2469_v7  ;;  %v2590_v24 = vand.u32 2147483647, %v5307_v55 }
 0x2bd   :  { %v3324_v62 = vpop.eup %3323  ;;  %v2461_v16 = vor.u32 4788187, %v2460_v27  ;;  %v3123_v33 = vadd.s32 4294967169, %v2594_v48  ;;  %v2464_v26 = vcvt.s32.f32 %v2457_v15  ;;  %v2541_v51 = vmul.u32 %v5282_v45, %v2525_v53 }
 0x2be   :  { %v3326_v58 = vpop.eup %3325  ;;  %v2378_v19 = vxor.u32 2147483648, %v3324_v62  ;;  %vm2543_vm4 = vc.u32 %v5335_v11, %v5317_v59  ;;  %vm2374_vm5 = vcmp.eq.s32.totalorder %v5275_v21, 0  ;;  %v2475_v57 = vadd.s32 3, %v2471_v40 }
 0x2bf   :  { %v2375_v3 = vxor.u32 2147483648, %v3326_v58  ;;  %v2462_v60 = vand.u32 2147483647, %v2461_v16  ;;  %v2545_v47 = vsel %vm2543_vm4, %v2544_v44, %v5318_v28  ;;  %v2600_v17 = vadd.s32 1, %v3123_v33 }
 0x2c0   :  { %v2379_v63 = vsel %vm2377_vm3, %v2378_v19, %v3326_v58  ;;  %v2546_v20 = vadd.s32 %v2545_v47, %v2541_v51  ;;  %v2697_v45 = vand.u32 2139095040, %v5341_v23  ;;  %v2597_v39 = vand.u32 8388607, %v2590_v24 }
 0x2c1   :  { %v2376_v6 = vsel %vm2374_vm5, %v3324_v62, %v2375_v3  ;;  %v2465_v14 = vmul.f32 %v2464_v26, %v2462_v60  ;;  %vm2601_vm6 = vcmp.gt.s32.totalorder %v2600_v17, 0  ;;  %v354_v52 = vmul.f32 %v5122_v50, %v321_v4 }
 0x2c2   :  { %v2380_v8 = vsel %vm2373_vm2, %v2376_v6, %v2379_v63  ;;  %v2547_v10 = vadd.s32 536870912, %v2546_v20  ;;  %v2602_v37 = vsel %vm2601_vm6, %v2600_v17, 0  ;;  %v2698_v35 = vshrl.u32 %v2697_v45, 23 }
 0x2c3   :  { %v2381_v34 = vsel %vm2370_vm0, nan, %v2380_v8  ;;  %v2466_v32 = vxor.u32 2147483648, %v2465_v14  ;;  %v2604_v12 = vand.u32 31, %v2602_v37  ;;  %v5372_v0 = vand.u32 3, %v2475_v57 }
 0x2c4   :  { %3025 = vst.msk [vmem:[%s5652_s3 + $0x90] sm:$0xff] %vm3006_vm11, %v2381_v34  ;;  %v5364_v2 = vshrl.u32 %v2547_v10, 30  ;;  %v2598_v28 = vor.u32 8388608, %v2597_v39  ;;  %v2603_v31 = vshrl.u32 %v2602_v37, 5  ;;  %v3127_v53 = vadd.s32 4294967169, %v2698_v35 }
 0x2c5   :  { %v2467_v21 = vsel %vm2384_vm9, %v2466_v32, %v2465_v14  ;;  %v2605_v42 = vsub.s32 32, %v2604_v12  ;;  %v2607_v25 = vshll.u32 %v5680_v1, %v2604_v12  ;;  %v2610_v7 = vshll.u32 %v5681_v61, %v2604_v12 }
 0x2c6   :  { %v2470_v18 = vsel %vm5326_vm1, %v5102_v29, %v2467_v21  ;;  %v2549_v38 = vshll.u32 %v5364_v2, 30  ;;  %v2613_v27 = vshll.u32 %v5674_v30, %v2604_v12  ;;  %v2616_v62 = vshll.u32 %v5673_v13, %v2604_v12 }
 0x2c7   :  { %3327 = vcosq.f32 %v2470_v18  ;;  %v2608_v5 = vshrl.u32 %v5681_v61, %v2605_v42  ;;  %v2611_v54 = vshrl.u32 %v5674_v30, %v2605_v42  ;;  %v2614_v22 = vshrl.u32 %v5673_v13, %v2605_v42 }
 0x2c8   :  { %3329 = vsinq.f32 %v2470_v18  ;;  %v5378_v46 = vsub.s32 %v2546_v20, %v2549_v38  ;;  %v2617_v16 = vshrl.u32 %v3360_v56, %v2605_v42  ;;  %v2619_v33 = vshll.u32 %v3360_v56, %v2604_v12 }
 0x2c9   :  { %v2609_v15 = vor.u32 %v2608_v5, %v2607_v25  ;;  %v2612_v44 = vor.u32 %v2611_v54, %v2610_v7  ;;  %v2615_v40 = vor.u32 %v2614_v22, %v2613_v27  ;;  %v2620_v58 = vshrl.u32 %v5675_v43, %v2605_v42 }
 0x2ca   :  { %v2552_v48 = vsub.s32 0, %v5378_v46  ;;  %v5389_v19 = vadd.f32 %v354_v52, %v3554_v36  ;;  %v2618_v51 = vor.u32 %v2617_v16, %v2616_v62  ;;  %v5392_v3 = vshll.u32 %v2598_v28, 8 }
 0x2cb   :  { %v2694_v60 = vand.u32 2147483647, %v5341_v23  ;;  %v2606_v47 = vshrl.u32 %v5680_v1, %v2605_v42  ;;  %v2621_v17 = vor.u32 %v2620_v58, %v2619_v33  ;;  %vm2622_vm7 = vcmp.lt.s32.totalorder %v2603_v31, 1 }
 0x2cc   :  { %v3120_v26 = vmin.u32 %v2552_v48, %v5378_v46  ;;  %v2704_v63 = vadd.s32 1, %v3127_v53  ;;  %vm2481_vm8 = vcmp.eq.s32.totalorder %v5372_v0, 2  ;;  %vm2624_vm9 = vcmp.lt.s32.totalorder %v2603_v31, 3 }
 0x2cd   :  { %vm2625_vm10 = vcmp.lt.s32.totalorder %v2603_v31, 4  ;;  %v2630_v36 = vsel %vm2622_vm7, %v2609_v15, %v2612_v44  ;;  %vm2478_vm12 = vcmp.eq.s32.totalorder %v5372_v0, 0  ;;  %v2634_v14 = vsel %vm2622_vm7, %v2612_v44, %v2615_v40 }
 0x2ce   :  { %v2554_v57 = vclz %v3120_v26  ;;  %v2627_v20 = vsel %vm2625_vm10, %v2615_v40, 2102212464  ;;  %v2631_v6 = vsel %vm2625_vm10, %v2618_v51, 920167782  ;;  %v2635_v45 = vsel %vm2625_vm10, %v2621_v17, 1326507024 }
 0x2cf   :  { %vm2477_vm13 = vcmp.lt.s32.totalorder %v5372_v0, 2  ;;  %vm2623_vm14 = vcmp.lt.s32.totalorder %v2603_v31, 2  ;;  %v2632_v10 = vsel %vm2624_vm9, %v2615_v40, %v2631_v6  ;;  %v2636_v39 = vsel %vm2624_vm9, %v2618_v51, %v2635_v45 }
 0x2d0   :  { %v3121_v8 = vadd.s32 4294967294, %v2554_v57  ;;  %vm2474_vm15 = vweird.f32 %v5102_v29  ;;  %v2626_v37 = vsel %vm2622_vm7, %v2606_v47, %v2609_v15  ;;  %v2633_v4 = vsel %vm2623_vm14, %v2630_v36, %v2632_v10 }
 0x2d1   :  { %v2637_v34 = vsel %vm2623_vm14, %v2634_v14, %v2636_v39  ;;  %vm2705_vm0 = vcmp.gt.s32.totalorder %v2704_v63, 0  ;;  %v2628_v32 = vsel %vm2624_vm9, %v2612_v44, %v2627_v20  ;;  %v2542_v28 = vadd.s32 %v5317_v59, %v5335_v11 }
 0x2d2   :  { %vm3122_vm1 = vcmp.lt.s32.totalorder %v3121_v8, 0  ;;  %v5409_v12 = vmul.u32.u64.low %v5392_v3, %v2637_v34  ;;  %v5410_v21 = vmul.u32.u64.high %v5392_v3, %v2637_v34, %v5409_v12  ;;  %v2706_v18 = vsel %vm2705_vm0, %v2704_v63, 0 }
 0x2d3   :  { %v2557_v42 = vsel %vm3122_vm1, 0, %v3121_v8  ;;  %v5413_v35 = vmul.u32.u64.low %v5392_v3, %v2633_v4  ;;  %v5414_v52 = vmul.u32.u64.high %v5392_v3, %v2633_v4, %v5413_v35  ;;  %v5421_v54 = vand.u32 8388607, %v2694_v60 }
 0x2d4   :  { %v3328_v38 = vpop.eup %3327  ;;  %v2558_v25 = vsub.s32 32, %v2557_v42  ;;  %v2562_v5 = vsub.s32 4294967266, %v2557_v42  ;;  %v2572_v15 = vsub.s32 4, %v5364_v2  ;;  %v2629_v27 = vsel %vm2623_vm14, %v2626_v37, %v2628_v32 }
 0x2d5   :  { %v3330_v7 = vpop.eup %3329  ;;  %v2482_v22 = vxor.u32 2147483648, %v3328_v38  ;;  %v2708_v53 = vand.u32 31, %v2706_v18  ;;  %vm2488_vm2 = vcmp.lt.s32.totalorder %v5225_v41, 0  ;;  %v2559_v44 = vshll.u32 %v5378_v46, %v2557_v42 }
 0x2d6   :  { %v2479_v48 = vxor.u32 2147483648, %v3330_v7  ;;  %v2560_v62 = vshrl.u32 %v2542_v28, %v2558_v25  ;;  %v2563_v59 = vadd.s32 127, %v2562_v5  ;;  %vm2647_vm3 = vc.u32 %v5410_v21, %v5413_v35 }
 0x2d7   :  { %v2483_v11 = vsel %vm2481_vm8, %v2482_v22, %v3330_v7  ;;  %v2648_v16 = vadd.s32 1, %v5414_v52  ;;  %v2709_v40 = vsub.s32 32, %v2708_v53  ;;  %v2645_v26 = vmul.u32 %v5392_v3, %v2629_v27 }
 0x2d8   :  { %v2480_v31 = vsel %vm2478_vm12, %v3328_v38, %v2479_v48  ;;  %v2561_v33 = vor.u32 %v2560_v62, %v2559_v44  ;;  %v2564_v58 = vshll.u32 %v2563_v59, 23  ;;  %v2711_v47 = vshll.u32 %v5680_v1, %v2708_v53 }
 0x2d9   :  { %v2484_v46 = vsel %vm2477_vm13, %v2480_v31, %v2483_v11  ;;  %v2649_v51 = vsel %vm2647_vm3, %v2648_v16, %v5414_v52  ;;  %v2712_v17 = vshrl.u32 %v5681_v61, %v2709_v40  ;;  %v2707_v20 = vshrl.u32 %v2706_v18, 5 }
 0x2da   :  { %v2485_v63 = vsel %vm2474_vm15, nan, %v2484_v46  ;;  %v2565_v57 = vor.u32 4788187, %v2564_v58  ;;  %v2650_v36 = vadd.s32 %v2649_v51, %v2645_v26  ;;  %v2568_v3 = vcvt.s32.f32 %v2561_v33 }
 0x2db   :  { %3026 = vst.msk [vmem:[%s5652_s3 + $0x98] sm:$0xff] %vm3006_vm11, %v2485_v63  ;;  %v2713_v0 = vor.u32 %v2712_v17, %v2711_v47  ;;  %v2714_v6 = vshll.u32 %v5681_v61, %v2708_v53  ;;  %v2715_v14 = vshrl.u32 %v5674_v30, %v2709_v40  ;;  %v2717_v10 = vshll.u32 %v5674_v30, %v2708_v53 }
 0x2dc   :  { %v2566_v45 = vand.u32 2147483647, %v2565_v57  ;;  %v2651_v8 = vadd.s32 536870912, %v2650_v36  ;;  %v2718_v29 = vshrl.u32 %v5673_v13, %v2709_v40  ;;  %v2720_v37 = vshll.u32 %v5673_v13, %v2708_v53 }
 0x2dd   :  { %v2716_v39 = vor.u32 %v2715_v14, %v2714_v6  ;;  %v2721_v4 = vshrl.u32 %v3360_v56, %v2709_v40  ;;  %v2724_v34 = vshrl.u32 %v5675_v43, %v2709_v40  ;;  %vm5455_vm4 = vcmp.le.f32.partialorder %v2486_v9, 0.7853982 }
 0x2de   :  { %v2569_v12 = vmul.f32 %v2568_v3, %v2566_v45  ;;  %v2652_v42 = vshrl.u32 %v2651_v8, 30  ;;  %v5460_v52 = vmul.f32 30.0, %v5389_v19  ;;  %v2573_v18 = vsel %vm2488_vm2, %v2572_v15, %v5364_v2 }
 0x2df   :  { %v2719_v38 = vor.u32 %v2718_v29, %v2717_v10  ;;  %v2722_v28 = vor.u32 %v2721_v4, %v2720_v37  ;;  %v2723_v25 = vshll.u32 %v3360_v56, %v2708_v53  ;;  %vm2726_vm5 = vcmp.lt.s32.totalorder %v2707_v20, 1 }
 0x2e0   :  { %v2570_v5 = vxor.u32 2147483648, %v2569_v12  ;;  %v2653_v7 = vshll.u32 %v2652_v42, 30  ;;  %vm2729_vm6 = vcmp.lt.s32.totalorder %v2707_v20, 4  ;;  %v2702_v9 = vor.u32 8388608, %v5421_v54 }
 0x2e1   :  { %v2725_v22 = vor.u32 %v2724_v34, %v2723_v25  ;;  %v2734_v27 = vsel %vm2726_vm5, %v2713_v0, %v2716_v39  ;;  %v2735_v19 = vsel %vm2729_vm6, %v2722_v28, 920167782  ;;  %v2575_v2 = vsel %vm5455_vm4, 0, %v2573_v18  ;;  %v325_v34 = vpop.permute.xlu0 %324 }
 0x2e2   :  { %v2571_v48 = vsel %vm2488_vm2, %v2570_v5, %v2569_v12  ;;  %v2654_v15 = vsub.s32 %v2650_v36, %v2653_v7  ;;  %vm2728_vm7 = vcmp.lt.s32.totalorder %v2707_v20, 3  ;;  %vm2727_vm8 = vcmp.lt.s32.totalorder %v2707_v20, 2 }
 0x2e3   :  { %v2574_v53 = vsel %vm5455_vm4, %v5225_v41, %v2571_v48  ;;  %v2731_v54 = vsel %vm2729_vm6, %v2719_v38, 2102212464  ;;  %v2736_v44 = vsel %vm2728_vm7, %v2719_v38, %v2735_v19  ;;  %v2710_v59 = vshrl.u32 %v5680_v1, %v2709_v40 }
 0x2e4   :  { %3331 = vcosq.f32 %v2574_v53  ;;  %v2656_v62 = vsub.s32 0, %v2654_v15  ;;  %v2737_v11 = vsel %vm2727_vm8, %v2734_v27, %v2736_v44  ;;  %v2738_v16 = vsel %vm2726_vm5, %v2716_v39, %v2719_v38 }
 0x2e5   :  { %3333 = vsinq.f32 %v2574_v53  ;;  %v2739_v31 = vsel %vm2729_vm6, %v2725_v22, 1326507024  ;;  %v2742_v33 = vshll.u32 %v2702_v9, 8  ;;  %v2730_v26 = vsel %vm2726_vm5, %v2710_v59, %v2713_v0 }
 0x2e6   :  { %v3124_v58 = vmin.u32 %v2656_v62, %v2654_v15  ;;  %v2732_v46 = vsel %vm2728_vm7, %v2716_v39, %v2731_v54  ;;  %v2740_v51 = vsel %vm2728_vm7, %v2722_v28, %v2739_v31  ;;  %v2801_v40 = vand.u32 2139095040, %v5460_v52 }
 0x2e7   :  { %v2741_v47 = vsel %vm2727_vm8, %v2738_v16, %v2740_v51  ;;  %v5486_v17 = vmul.u32.u64.low %v2742_v33, %v2737_v11  ;;  %v5487_v63 = vmul.u32.u64.high %v2742_v33, %v2737_v11, %v5486_v17  ;;  %v2579_v57 = vadd.s32 3, %v2575_v2 }
 0x2e8   :  { %v2658_v36 = vclz %v3124_v58  ;;  %v5491_v3 = vmul.u32.u64.low %v2742_v33, %v2741_v47  ;;  %v5492_v6 = vmul.u32.u64.high %v2742_v33, %v2741_v47, %v5491_v3  ;;  %v2802_v14 = vshrl.u32 %v2801_v40, 23 }
 0x2e9   :  { %v2676_v0 = vsub.s32 4, %v2652_v42  ;;  %v2733_v8 = vsel %vm2727_vm8, %v2730_v26, %v2732_v46  ;;  %vm2592_vm9 = vcmp.lt.s32.totalorder %v5307_v55, 0  ;;  %v2752_v10 = vadd.s32 1, %v5487_v63 }
 0x2ea   :  { %v3125_v45 = vadd.s32 4294967294, %v2658_v36  ;;  %v3131_v29 = vadd.s32 4294967169, %v2802_v14  ;;  %v2580_v39 = vand.u32 3, %v2579_v57  ;;  %v2646_v37 = vadd.s32 %v5413_v35, %v5410_v21 }
 0x2eb   :  { %v2798_v4 = vand.u32 2147483647, %v5460_v52  ;;  %v2749_v12 = vmul.u32 %v2742_v33, %v2733_v8  ;;  %vm2751_vm12 = vc.u32 %v5492_v6, %v5486_v17  ;;  %v2677_v28 = vsel %vm2592_vm9, %v2676_v0, %v2652_v42 }
 0x2ec   :  { %vm3126_vm10 = vcmp.lt.s32.totalorder %v3125_v45, 0  ;;  %v2808_v20 = vadd.s32 1, %v3131_v29  ;;  %v2753_v25 = vsel %vm2751_vm12, %v2752_v10, %v5487_v63  ;;  %vm5507_vm13 = vcmp.le.f32.partialorder %v2590_v24, 0.7853982 }
 0x2ed   :  { %v2661_v32 = vsel %vm3126_vm10, 0, %v3125_v45  ;;  %v2754_v35 = vadd.s32 %v2753_v25, %v2749_v12  ;;  %v355_v5 = vmul.f32 %v5122_v50, %v325_v34  ;;  %vm2585_vm15 = vcmp.eq.s32.totalorder %v2580_v39, 2 }
 0x2ee   :  { %v2662_v18 = vsub.s32 32, %v2661_v32  ;;  %v2666_v38 = vsub.s32 4294967266, %v2661_v32  ;;  %vm2809_vm14 = vcmp.gt.s32.totalorder %v2808_v20, 0  ;;  %v2663_v7 = vshll.u32 %v2654_v15, %v2661_v32 }
 0x2ef   :  { %v2810_v27 = vsel %vm2809_vm14, %v2808_v20, 0  ;;  %v2679_v42 = vsel %vm5507_vm13, 0, %v2677_v28  ;;  %v2755_v48 = vadd.s32 536870912, %v2754_v35  ;;  %v2805_v62 = vand.u32 8388607, %v2798_v4 }
 0x2f0   :  { %v2664_v9 = vshrl.u32 %v2646_v37, %v2662_v18  ;;  %v2667_v22 = vadd.s32 127, %v2666_v38  ;;  %v2812_v2 = vand.u32 31, %v2810_v27  ;;  %v380_v11 = vadd.f32 %v355_v5, %v3572_v49 }
 0x2f1   :  { %v3332_v19 = vpop.eup %3331  ;;  %v5516_v50 = vshrl.u32 %v2755_v48, 30  ;;  %vm2578_vm0 = vweird.f32 %v5225_v41  ;;  %vm2582_vm1 = vcmp.eq.s32.totalorder %v2580_v39, 0  ;;  %vm2581_vm2 = vcmp.lt.s32.totalorder %v2580_v39, 2 }
 0x2f2   :  { %v3334_v53 = vpop.eup %3333  ;;  %v2586_v24 = vxor.u32 2147483648, %v3332_v19  ;;  %v2665_v54 = vor.u32 %v2664_v9, %v2663_v7  ;;  %v2668_v44 = vshll.u32 %v2667_v22, 23  ;;  %v2813_v15 = vsub.s32 32, %v2812_v2 }
 0x2f3   :  { %v2583_v59 = vxor.u32 2147483648, %v3334_v53  ;;  %v5520_v58 = vadd.s32 3, %v2679_v42  ;;  %v2757_v26 = vshll.u32 %v5516_v50, 30  ;;  %v2806_v63 = vor.u32 8388608, %v2805_v62 }
 0x2f4   :  { %v2587_v16 = vsel %vm2585_vm15, %v2586_v24, %v3334_v53  ;;  %v2669_v31 = vor.u32 4788187, %v2668_v44  ;;  %v2672_v47 = vcvt.s32.f32 %v2665_v54  ;;  %v2816_v36 = vshrl.u32 %v5681_v61, %v2813_v15 }
 0x2f5   :  { %v2584_v33 = vsel %vm2582_vm1, %v3332_v19, %v2583_v59  ;;  %v2758_v57 = vsub.s32 %v2754_v35, %v2757_v26  ;;  %v5524_v49 = vmul.f32 30.0, %v380_v11  ;;  %v2811_v3 = vshrl.u32 %v2810_v27, 5 }
 0x2f6   :  { %v2588_v46 = vsel %vm2581_vm2, %v2584_v33, %v2587_v16  ;;  %v2670_v51 = vand.u32 2147483647, %v2669_v31  ;;  %v2815_v14 = vshll.u32 %v5680_v1, %v2812_v2  ;;  %v2819_v45 = vshrl.u32 %v5674_v30, %v2813_v15 }
 0x2f7   :  { %v2589_v40 = vsel %vm2578_vm0, nan, %v2588_v46  ;;  %v2760_v0 = vsub.s32 0, %v2758_v57  ;;  %v2818_v8 = vshll.u32 %v5681_v61, %v2812_v2  ;;  %v2821_v10 = vshll.u32 %v5674_v30, %v2812_v2 }
 0x2f8   :  { %3027 = vst.msk [vmem:[%s5652_s3 + $0xa0] sm:$0xff] %vm3006_vm11, %v2589_v40  ;;  %v2673_v41 = vmul.f32 %v2672_v47, %v2670_v51  ;;  %v2822_v29 = vshrl.u32 %v5673_v13, %v2813_v15  ;;  %v2824_v37 = vshll.u32 %v5673_v13, %v2812_v2  ;;  %v2825_v34 = vshrl.u32 %v3360_v56, %v2813_v15 }
 0x2f9   :  { %v2828_v32 = vshrl.u32 %v5675_v43, %v2813_v15  ;;  %v2750_v12 = vadd.s32 %v5486_v17, %v5492_v6  ;;  %v3128_v20 = vmin.u32 %v2760_v0, %v2758_v57  ;;  %v2817_v18 = vor.u32 %v2816_v36, %v2815_v14 }
 0x2fa   :  { %v2674_v39 = vxor.u32 2147483648, %v2673_v41  ;;  %v2827_v38 = vshll.u32 %v3360_v56, %v2812_v2  ;;  %v2820_v25 = vor.u32 %v2819_v45, %v2818_v8  ;;  %v2823_v35 = vor.u32 %v2822_v29, %v2821_v10 }
 0x2fb   :  { %v2826_v5 = vor.u32 %v2825_v34, %v2824_v37  ;;  %v2762_v9 = vclz %v3128_v20  ;;  %v2846_v27 = vshll.u32 %v2806_v63, 8  ;;  %v2814_v17 = vshrl.u32 %v5680_v1, %v2813_v15 }
 0x2fc   :  { %v2675_v28 = vsel %vm2592_vm9, %v2674_v39, %v2673_v41  ;;  %v2829_v22 = vor.u32 %v2828_v32, %v2827_v38  ;;  %vm2830_vm3 = vcmp.lt.s32.totalorder %v2811_v3, 1  ;;  %v2905_v6 = vand.u32 2139095040, %v5524_v49 }
 0x2fd   :  { %v2678_v7 = vsel %vm5507_vm13, %v5307_v55, %v2675_v28  ;;  %v3129_v19 = vadd.s32 4294967294, %v2762_v9  ;;  %vm2832_vm4 = vcmp.lt.s32.totalorder %v2811_v3, 3  ;;  %vm2833_vm5 = vcmp.lt.s32.totalorder %v2811_v3, 4 }
 0x2fe   :  { %3335 = vcosq.f32 %v2678_v7  ;;  %v2835_v42 = vsel %vm2833_vm5, %v2823_v35, 2102212464  ;;  %v2838_v48 = vsel %vm2830_vm3, %v2817_v18, %v2820_v25  ;;  %v2839_v2 = vsel %vm2833_vm5, %v2826_v5, 920167782 }
 0x2ff   :  { %3337 = vsinq.f32 %v2678_v7  ;;  %v2842_v53 = vsel %vm2830_vm3, %v2820_v25, %v2823_v35  ;;  %vm3130_vm6 = vcmp.lt.s32.totalorder %v3129_v19, 0  ;;  %vm2831_vm7 = vcmp.lt.s32.totalorder %v2811_v3, 2 }
 0x300   :  { %v2840_v21 = vsel %vm2832_vm4, %v2823_v35, %v2839_v2  ;;  %v2843_v24 = vsel %vm2833_vm5, %v2829_v22, 1326507024  ;;  %v2765_v54 = vsel %vm3130_vm6, 0, %v3129_v19  ;;  %v2834_v44 = vsel %vm2830_vm3, %v2814_v17, %v2817_v18 }
 0x301   :  { %v2841_v62 = vsel %vm2831_vm7, %v2838_v48, %v2840_v21  ;;  %v2844_v59 = vsel %vm2832_vm4, %v2826_v5, %v2843_v24  ;;  %v2766_v15 = vsub.s32 32, %v2765_v54  ;;  %v2770_v11 = vsub.s32 4294967266, %v2765_v54 }
 0x302   :  { %v2836_v16 = vsel %vm2832_vm4, %v2820_v25, %v2835_v42  ;;  %v2845_v31 = vsel %vm2831_vm7, %v2842_v53, %v2844_v59  ;;  %v5556_v46 = vmul.u32.u64.low %v2846_v27, %v2841_v62  ;;  %v5557_v51 = vmul.u32.u64.high %v2846_v27, %v2841_v62, %v5556_v46 }
 0x303   :  { %v5553_v33 = vmul.u32.u64.low %v2846_v27, %v2845_v31  ;;  %v5554_v26 = vmul.u32.u64.high %v2846_v27, %v2845_v31, %v5553_v33  ;;  %v2767_v47 = vshll.u32 %v2758_v57, %v2765_v54  ;;  %v2768_v63 = vshrl.u32 %v2750_v12, %v2766_v15 }
 0x304   :  { %v2771_v40 = vadd.s32 127, %v2770_v11  ;;  %v2906_v36 = vshrl.u32 %v2905_v6, 23  ;;  %v2837_v41 = vsel %vm2831_vm7, %v2834_v44, %v2836_v16  ;;  %v2780_v8 = vsub.s32 4, %v5516_v50 }
 0x305   :  { %v2769_v14 = vor.u32 %v2768_v63, %v2767_v47  ;;  %vm2855_vm8 = vc.u32 %v5554_v26, %v5556_v46  ;;  %v2856_v10 = vadd.s32 1, %v5557_v51  ;;  %v2684_v29 = vand.u32 3, %v5520_v58 }
 0x306   :  { %v2772_v45 = vshll.u32 %v2771_v40, 23  ;;  %v3135_v0 = vadd.s32 4294967169, %v2906_v36  ;;  %v2853_v37 = vmul.u32 %v2846_v27, %v2837_v41  ;;  %vm5568_vm9 = vcmp.le.f32.partialorder %v2694_v60, 0.7853982 }
 0x307   :  { %vm2696_vm10 = vcmp.lt.s32.totalorder %v5341_v23, 0  ;;  %v2857_v34 = vsel %vm2855_vm8, %v2856_v10, %v5557_v51  ;;  %v2776_v20 = vcvt.s32.f32 %v2769_v14  ;;  %v2902_v60 = vand.u32 2147483647, %v5524_v49 }
 0x308   :  { %v2773_v39 = vor.u32 4788187, %v2772_v45  ;;  %v2912_v57 = vadd.s32 1, %v3135_v0  ;;  %v2858_v18 = vadd.s32 %v2857_v34, %v2853_v37  ;;  %v2781_v28 = vsel %vm2696_vm10, %v2780_v8, %v5516_v50 }
 0x309   :  { %vm2689_vm13 = vcmp.eq.s32.totalorder %v2684_v29, 2  ;;  %vm2685_vm14 = vcmp.lt.s32.totalorder %v2684_v29, 2  ;;  %vm2686_vm15 = vcmp.eq.s32.totalorder %v2684_v29, 0  ;;  %v2783_v6 = vsel %vm5568_vm9, 0, %v2781_v28 }
 0x30a   :  { %v2774_v12 = vand.u32 2147483647, %v2773_v39  ;;  %vm2913_vm12 = vcmp.gt.s32.totalorder %v2912_v57, 0  ;;  %v2859_v7 = vadd.s32 536870912, %v2858_v18  ;;  %vm2682_vm0 = vweird.f32 %v5307_v55 }
 0x30b   :  { %v3336_v32 = vpop.eup %3335  ;;  %v2914_v25 = vsel %vm2913_vm12, %v2912_v57, 0  ;;  %v2909_v42 = vand.u32 8388607, %v2902_v60  ;;  %v2787_v24 = vadd.s32 3, %v2783_v6  ;;  %vm2800_vm12 = vcmp.lt.s32.totalorder %v5460_v52, 0 }
 0x30c   :  { %v3338_v38 = vpop.eup %3337  ;;  %v2690_v58 = vxor.u32 2147483648, %v3336_v32  ;;  %v2777_v5 = vmul.f32 %v2776_v20, %v2774_v12  ;;  %v2916_v22 = vand.u32 31, %v2914_v25  ;;  %v5580_v19 = vshrl.u32 %v2859_v7, 30 }
 0x30d   :  { %v2687_v35 = vxor.u32 2147483648, %v3338_v38  ;;  %v2910_v11 = vor.u32 8388608, %v2909_v42  ;;  %v2915_v16 = vshrl.u32 %v2914_v25, 5 }
 0x30e   :  { %v2691_v9 = vsel %vm2689_vm13, %v2690_v58, %v3338_v38  ;;  %v2778_v17 = vxor.u32 2147483648, %v2777_v5  ;;  %v2917_v48 = vsub.s32 32, %v2916_v22  ;;  %v2861_v21 = vshll.u32 %v5580_v19, 30 }
 0x30f   :  { %v2688_v27 = vsel %vm2686_vm15, %v3336_v32, %v2687_v35  ;;  %v2919_v59 = vshll.u32 %v5680_v1, %v2916_v22  ;;  %v2922_v15 = vshll.u32 %v5681_v61, %v2916_v22  ;;  %v2925_v31 = vshll.u32 %v5674_v30, %v2916_v22 }
 0x310   :  { %v2692_v50 = vsel %vm2685_vm14, %v2688_v27, %v2691_v9  ;;  %v2779_v53 = vsel %vm2696_vm10, %v2778_v17, %v2777_v5  ;;  %v2920_v54 = vshrl.u32 %v5681_v61, %v2917_v48  ;;  %v2923_v44 = vshrl.u32 %v5674_v30, %v2917_v48 }
 0x311   :  { %v2693_v2 = vsel %vm2682_vm0, nan, %v2692_v50  ;;  %v2782_v55 = vsel %vm5568_vm9, %v5341_v23, %v2779_v53  ;;  %v5597_v62 = vsub.s32 %v2858_v18, %v2861_v21  ;;  %v2926_v63 = vshrl.u32 %v5673_v13, %v2917_v48 }
 0x312   :  { %3028 = vst.msk [vmem:[%s5652_s3 + $0xa8] sm:$0xff] %vm3006_vm11, %v2693_v2  ;;  %3339 = vcosq.f32 %v2782_v55  ;;  %v2921_v51 = vor.u32 %v2920_v54, %v2919_v59  ;;  %v2924_v47 = vor.u32 %v2923_v44, %v2922_v15  ;;  %v2928_v40 = vshll.u32 %v5673_v13, %v2916_v22 }
 0x313   :  { %3341 = vsinq.f32 %v2782_v55  ;;  %v2864_v33 = vsub.s32 0, %v5597_v62  ;;  %v2929_v36 = vshrl.u32 %v3360_v56, %v2917_v48  ;;  %v2931_v41 = vshll.u32 %v3360_v56, %v2916_v22 }
 0x314   :  { %v2932_v14 = vshrl.u32 %v5675_v43, %v2917_v48  ;;  %v2788_v61 = vand.u32 3, %v2787_v24  ;;  %v2927_v0 = vor.u32 %v2926_v63, %v2925_v31  ;;  %vm2934_vm1 = vcmp.lt.s32.totalorder %v2915_v16, 1 }
 0x315   :  { %v3132_v45 = vmin.u32 %v2864_v33, %v5597_v62  ;;  %v2930_v8 = vor.u32 %v2929_v36, %v2928_v40  ;;  %v2950_v10 = vshll.u32 %v2910_v11, 8  ;;  %v2918_v39 = vshrl.u32 %v5680_v1, %v2917_v48 }
 0x316   :  { %v2933_v30 = vor.u32 %v2932_v14, %v2931_v41  ;;  %vm2936_vm2 = vcmp.lt.s32.totalorder %v2915_v16, 3  ;;  %vm2937_vm3 = vcmp.lt.s32.totalorder %v2915_v16, 4  ;;  %v2942_v37 = vsel %vm2934_vm1, %v2921_v51, %v2924_v47 }
 0x317   :  { %v2866_v29 = vclz %v3132_v45  ;;  %v2939_v13 = vsel %vm2937_vm3, %v2927_v0, 2102212464  ;;  %v2943_v57 = vsel %vm2937_vm3, %v2930_v8, 920167782  ;;  %v2946_v3 = vsel %vm2934_vm1, %v2924_v47, %v2927_v0 }
 0x318   :  { %vm2935_vm4 = vcmp.lt.s32.totalorder %v2915_v16, 2  ;;  %v2944_v43 = vsel %vm2936_vm2, %v2927_v0, %v2943_v57  ;;  %v2947_v34 = vsel %vm2937_vm3, %v2933_v30, 1326507024  ;;  %v2938_v32 = vsel %vm2934_vm1, %v2918_v39, %v2921_v51 }
 0x319   :  { %v3133_v56 = vadd.s32 4294967294, %v2866_v29  ;;  %v2940_v12 = vsel %vm2936_vm2, %v2924_v47, %v2939_v13  ;;  %v2945_v20 = vsel %vm2935_vm4, %v2942_v37, %v2944_v43  ;;  %v2948_v18 = vsel %vm2936_vm2, %v2930_v8, %v2947_v34 }
 0x31a   :  { %v2949_v38 = vsel %vm2935_vm4, %v2946_v3, %v2948_v18  ;;  %v5610_v58 = vmul.u32.u64.low %v2950_v10, %v2945_v20  ;;  %v5611_v28 = vmul.u32.u64.high %v2950_v10, %v2945_v20, %v5610_v58  ;;  %v2854_v5 = vadd.s32 %v5556_v46, %v5554_v26 }
 0x31b   :  { %vm3134_vm5 = vcmp.lt.s32.totalorder %v3133_v56, 0  ;;  %v5613_v25 = vmul.u32.u64.low %v2950_v10, %v2949_v38  ;;  %v5614_v35 = vmul.u32.u64.high %v2950_v10, %v2949_v38, %v5613_v25  ;;  %v2941_v22 = vsel %vm2935_vm4, %v2938_v32, %v2940_v12 }
 0x31c   :  { %v2869_v1 = vsel %vm3134_vm5, 0, %v3133_v56  ;;  %vm2790_vm6 = vcmp.eq.s32.totalorder %v2788_v61, 0  ;;  %v2960_v2 = vadd.s32 1, %v5611_v28  ;;  %vm2793_vm7 = vcmp.eq.s32.totalorder %v2788_v61, 2 }
 0x31d   :  { %v2870_v7 = vsub.s32 32, %v2869_v1  ;;  %v2874_v9 = vsub.s32 4294967266, %v2869_v1  ;;  %v2871_v17 = vshll.u32 %v5597_v62, %v2869_v1  ;;  %v2957_v21 = vmul.u32 %v2950_v10, %v2941_v22 }
 0x31e   :  { %vm2959_vm8 = vc.u32 %v5614_v35, %v5610_v58  ;;  %vm2789_vm9 = vcmp.lt.s32.totalorder %v2788_v61, 2  ;;  %vm2786_vm10 = vweird.f32 %v5341_v23  ;;  %v2884_v40 = vsub.s32 4, %v5580_v19 }
 0x31f   :  { %v3340_v27 = vpop.eup %3339  ;;  %v2872_v42 = vshrl.u32 %v2854_v5, %v2870_v7  ;;  %v2875_v48 = vadd.s32 127, %v2874_v9  ;;  %v2961_v24 = vsel %vm2959_vm8, %v2960_v2, %v5611_v28  ;;  %vm2799_vm13 = vcmp.le.f32.partialorder %v2798_v4, 0.7853982 }
 0x320   :  { %v3342_v6 = vpop.eup %3341  ;;  %v2794_v50 = vxor.u32 2147483648, %v3340_v27  ;;  %v2962_v44 = vadd.s32 %v2961_v24, %v2957_v21  ;;  %v2885_v61 = vsel %vm2800_vm12, %v2884_v40, %v5580_v19  ;;  %v2958_v39 = vadd.s32 %v5610_v58, %v5614_v35 }
 0x321   :  { %v2791_v53 = vxor.u32 2147483648, %v3342_v6  ;;  %v2873_v26 = vor.u32 %v2872_v42, %v2871_v17  ;;  %v2876_v46 = vshll.u32 %v2875_v48, 23  ;;  %v2887_v8 = vsel %vm2799_vm13, 0, %v2885_v61 }
 0x322   :  { %v2795_v55 = vsel %vm2793_vm7, %v2794_v50, %v3342_v6  ;;  %v2963_v11 = vadd.s32 536870912, %v2962_v44  ;;  %v2891_v10 = vadd.s32 3, %v2887_v8  ;;  %vm2890_vm2 = vweird.f32 %v5460_v52 }
 0x323   :  { %v2792_v54 = vsel %vm2790_vm6, %v3340_v27, %v2791_v53  ;;  %v2877_v59 = vor.u32 4788187, %v2876_v46  ;;  %v2880_v31 = vcvt.s32.f32 %v2873_v26  ;;  %vm2904_vm3 = vcmp.lt.s32.totalorder %v5524_v49, 0 }
 0x324   :  { %v2796_v62 = vsel %vm2789_vm9, %v2792_v54, %v2795_v55  ;;  %v2964_v33 = vshrl.u32 %v2963_v11, 30  ;;  %v2892_v4 = vand.u32 3, %v2891_v10  ;;  %vm2903_vm4 = vcmp.le.f32.partialorder %v2902_v60, 0.7853982 }
 0x325   :  { %v2797_v15 = vsel %vm2786_vm10, nan, %v2796_v62  ;;  %v2878_v16 = vand.u32 2147483647, %v2877_v59  ;;  %vm2994_vm8 = vweird.f32 %v5524_v49 }
 0x326   :  { %3029 = vst.msk [vmem:[%s5652_s3 + $0xb0] sm:$0xff] %vm3006_vm11, %v2797_v15  ;;  %v2965_v47 = vshll.u32 %v2964_v33, 30  ;;  %vm2897_vm15 = vcmp.eq.s32.totalorder %v2892_v4, 2  ;;  %vm2894_vm0 = vcmp.eq.s32.totalorder %v2892_v4, 0  ;;  %vm2893_vm1 = vcmp.lt.s32.totalorder %v2892_v4, 2 }
 0x327   :  { %v2881_v51 = vmul.f32 %v2880_v31, %v2878_v16  ;;  %v2988_v9 = vsub.s32 4, %v2964_v33 }
 0x328   :  { %v2966_v23 = vsub.s32 %v2962_v44, %v2965_v47 }
 0x329   :  { %v2882_v63 = vxor.u32 2147483648, %v2881_v51 }
 0x32a   :  { %v2968_v14 = vsub.s32 0, %v2966_v23 }
 0x32b   :  { %v2883_v36 = vsel %vm2800_vm12, %v2882_v63, %v2881_v51 }
 0x32c   :  { %v2886_v41 = vsel %vm2799_vm13, %v5460_v52, %v2883_v36  ;;  %v3136_v45 = vmin.u32 %v2968_v14, %v2966_v23  ;;  %v2989_v52 = vsel %vm2904_vm3, %v2988_v9, %v2964_v33 }
 0x32d   :  { %3343 = vcosq.f32 %v2886_v41  ;;  %v2991_v17 = vsel %vm2903_vm4, 0, %v2989_v52 }
 0x32e   :  { %3345 = vsinq.f32 %v2886_v41  ;;  %v2970_v0 = vclz %v3136_v45  ;;  %v2995_v6 = vadd.s32 3, %v2991_v17 }
 0x330   :  { %v3137_v30 = vadd.s32 4294967294, %v2970_v0  ;;  %v2996_v50 = vand.u32 3, %v2995_v6 }
 0x332   :  { %vm3138_vm14 = vcmp.lt.s32.totalorder %v3137_v30, 0  ;;  %vm3001_vm5 = vcmp.eq.s32.totalorder %v2996_v50, 2  ;;  %vm2998_vm6 = vcmp.eq.s32.totalorder %v2996_v50, 0  ;;  %vm2997_vm7 = vcmp.lt.s32.totalorder %v2996_v50, 2 }
 0x333   :  { %v2973_v29 = vsel %vm3138_vm14, 0, %v3137_v30 }
 0x334   :  { %v2974_v13 = vsub.s32 32, %v2973_v29  ;;  %v2978_v37 = vsub.s32 4294967266, %v2973_v29  ;;  %v2975_v57 = vshll.u32 %v2966_v23, %v2973_v29 }
 0x336   :  { %v2976_v3 = vshrl.u32 %v2958_v39, %v2974_v13  ;;  %v2979_v56 = vadd.s32 127, %v2978_v37 }
 0x338   :  { %v2977_v34 = vor.u32 %v2976_v3, %v2975_v57  ;;  %v2980_v32 = vshll.u32 %v2979_v56, 23 }
 0x33a   :  { %v3344_v43 = vpop.eup %3343  ;;  %v2981_v18 = vor.u32 4788187, %v2980_v32  ;;  %v2984_v58 = vcvt.s32.f32 %v2977_v34 }
 0x33b   :  { %v3346_v19 = vpop.eup %3345  ;;  %v2898_v12 = vxor.u32 2147483648, %v3344_v43 }
 0x33c   :  { %v2895_v20 = vxor.u32 2147483648, %v3346_v19  ;;  %v2982_v1 = vand.u32 2147483647, %v2981_v18 }
 0x33d   :  { %v2899_v38 = vsel %vm2897_vm15, %v2898_v12, %v3346_v19 }
 0x33e   :  { %v2896_v28 = vsel %vm2894_vm0, %v3344_v43, %v2895_v20  ;;  %v2985_v5 = vmul.f32 %v2984_v58, %v2982_v1 }
 0x33f   :  { %v2900_v25 = vsel %vm2893_vm1, %v2896_v28, %v2899_v38 }
 0x340   :  { %v2901_v35 = vsel %vm2890_vm2, nan, %v2900_v25  ;;  %v2986_v7 = vxor.u32 2147483648, %v2985_v5 }
 0x341   :  { %3030 = vst.msk [vmem:[%s5652_s3 + $0xb8] sm:$0xff] %vm3006_vm11, %v2901_v35 }
 0x342   :  { %v2987_v22 = vsel %vm2904_vm3, %v2986_v7, %v2985_v5 }
 0x343   :  { %v2990_v27 = vsel %vm2903_vm4, %v5524_v49, %v2987_v22 }
 0x344   :  { %3347 = vcosq.f32 %v2990_v27 }
 0x345   :  { %3349 = vsinq.f32 %v2990_v27 }
 0x351   :  { %v3348_v42 = vpop.eup %3347 }
 0x352   :  { %v3350_v48 = vpop.eup %3349  ;;  %v3002_v2 = vxor.u32 2147483648, %v3348_v42 }
 0x353   :  { %v2999_v53 = vxor.u32 2147483648, %v3350_v48 }
 0x354   :  { %v3003_v21 = vsel %vm3001_vm5, %v3002_v2, %v3350_v48 }
 0x355   :  { %v3000_v55 = vsel %vm2998_vm6, %v3348_v42, %v2999_v53 }
 0x356   :  { %v3004_v60 = vsel %vm2997_vm7, %v3000_v55, %v3003_v21 }
 0x357   :  { %v3005_v26 = vsel %vm2994_vm8, nan, %v3004_v60 }
 0x358   :  { %3031 = vst.msk [vmem:[%s5652_s3 + $0xc0] sm:$0xff] %vm3006_vm11, %v3005_v26 }

</bundles_post_ra>
